<compile_context>
chip_gen: v5e
topology: v5e:2x2
jax: 0.10.0
libtpu: 0.0.40
codegen_flags: <defaults>
</compile_context>

<pallas_src>
import jax
import jax.numpy as jnp
from jax.experimental import pallas as pl
from jax.experimental.pallas import tpu as pltpu

_LANES = 128  # TPU lane width


def _basic_block_kernel(x_ref, w1_ref, s1_ref, b1_ref, w2_ref, s2_ref, b2_ref,
                        out_ref, mid_ref):
    """One batch element per grid step, everything channel-padded to Cp lanes.

    x_ref   : (H+2, W+2, Cp)  spatially zero-padded input (compute dtype)
    w1_ref  : (9, Cp, Cp)     conv1 weights, tap-major (ky*3+kx), (cin, cout)
    w2_ref  : (9, Cp, Cp)     conv2 weights
    s*_ref  : (1, Cp) f32     folded BN scale
    b*_ref  : (1, Cp) f32     folded BN bias
    out_ref : (H, W, Cp) f32
    mid_ref : (H+2, W+2, Cp)  VMEM scratch for the zero-halo'd conv1 output
    """
    Hp, Wp, Cp = x_ref.shape
    H, W = Hp - 2, Wp - 2
    HW = H * W
    f32 = jnp.float32

    # ---- conv1 (3x3, stride 1, pad 1) on the MXU + folded BN1 + ReLU --------
    acc = None
    identity = None
    for ky in range(3):
        for kx in range(3):
            patch = x_ref[ky:ky + H, kx:kx + W, :].reshape(HW, Cp)
            if ky == 1 and kx == 1:
                identity = patch            # centre tap == unpadded input
            d = jnp.dot(patch, w1_ref[ky * 3 + kx], preferred_element_type=f32)
            acc = d if acc is None else acc + d
    out1 = jnp.maximum(acc * s1_ref[...] + b1_ref[...], 0.0)        # (HW, Cp)

    # ---- stage intermediate with a zero halo (zero the halo only) -----------
    zrow = jnp.zeros((1, Wp, Cp), mid_ref.dtype)
    zcol = jnp.zeros((Hp, 1, Cp), mid_ref.dtype)
    mid_ref[0:1, :, :] = zrow
    mid_ref[H + 1:H + 2, :, :] = zrow
    mid_ref[:, 0:1, :] = zcol
    mid_ref[:, W + 1:W + 2, :] = zcol
    mid_ref[1:H + 1, 1:W + 1, :] = out1.reshape(H, W, Cp).astype(mid_ref.dtype)

    # ---- conv2 (3x3, stride 1, pad 1) on the MXU + folded BN2 ---------------
    acc2 = None
    for ky in range(3):
        for kx in range(3):
            patch = mid_ref[ky:ky + H, kx:kx + W, :].reshape(HW, Cp)
            d = jnp.dot(patch, w2_ref[ky * 3 + kx], preferred_element_type=f32)
            acc2 = d if acc2 is None else acc2 + d
    out2 = acc2 * s2_ref[...] + b2_ref[...]

    # ---- residual add (downsample=None => identity) + ReLU ------------------
    res = jnp.maximum(out2 + identity.astype(f32), 0.0)
    out_ref[...] = res.reshape(H, W, Cp).astype(out_ref.dtype)


def _fold_bn(gamma, beta, mean, var, eps=1e-5):
    scale = gamma / jnp.sqrt(var + eps)
    shift = beta - mean * scale
    return scale, shift


def basic_block_forward(x_nchw, params, compute_dtype=jnp.float32):
    """BasicBlock forward (stride=1, downsample=None). x_nchw: (N, C, H, W).

    Set compute_dtype=jnp.bfloat16 on v6e/v5e to run the conv matmuls on the
    bf16 MXU path (accumulation stays f32).
    """
    # TODO(synk): accept NHWC directly / fold the boundary transpose+pad into
    #             the producer to avoid the extra HBM passes in the wrapper.
    x = jnp.transpose(x_nchw, (0, 2, 3, 1)).astype(jnp.float32)   # NCHW -> NHWC
    N, H, W, Cin = x.shape

    # PyTorch conv weight (Cout, Cin, 3, 3) -> HWIO
    w1_hwio = jnp.transpose(params["conv1_w"], (2, 3, 1, 0)).astype(jnp.float32)
    w2_hwio = jnp.transpose(params["conv2_w"], (2, 3, 1, 0)).astype(jnp.float32)
    Cout = w1_hwio.shape[-1]
    assert Cin == Cout, "identity residual requires inplanes == planes"

    # Lane-dense channel padding (multiple of 128). Padded channels carry
    # exact zeros end-to-end and are sliced off at the boundary.
    Cp = ((Cout + _LANES - 1) // _LANES) * _LANES

    def prep_w(w_hwio):
        w = jnp.pad(w_hwio, ((0, 0), (0, 0),
                             (0, Cp - w_hwio.shape[2]), (0, Cp - w_hwio.shape[3])))
        return w.reshape(9, Cp, Cp).astype(compute_dtype)   # tap-major (ky,kx)

    w1 = prep_w(w1_hwio)
    w2 = prep_w(w2_hwio)

    s1, b1 = _fold_bn(params["bn1_gamma"], params["bn1_beta"],
                      params["bn1_mean"], params["bn1_var"])
    s2, b2 = _fold_bn(params["bn2_gamma"], params["bn2_beta"],
                      params["bn2_mean"], params["bn2_var"])

    def prep_sb(v):
        return jnp.pad(v.astype(jnp.float32), (0, Cp - Cout)).reshape(1, Cp)

    s1, b1, s2, b2 = prep_sb(s1), prep_sb(b1), prep_sb(s2), prep_sb(b2)

    # Spatial pad=1 and channel pad to Cp in one shot.
    xpad = jnp.pad(x, ((0, 0), (1, 1), (1, 1), (0, Cp - Cin))).astype(compute_dtype)

    # TODO(synk): for large H*W add an H-band grid axis (with halo handling) so
    #             the per-image block stays well inside v7x's 64 MiB VMEM.
    grid_spec = pltpu.PrefetchScalarGridSpec(
        num_scalar_prefetch=0,
        grid=(N,),
        in_specs=[
            pl.BlockSpec((None, H + 2, W + 2, Cp), lambda n: (n, 0, 0, 0)),
            pl.BlockSpec((9, Cp, Cp), lambda n: (0, 0, 0)),
            pl.BlockSpec((1, Cp), lambda n: (0, 0)),
            pl.BlockSpec((1, Cp), lambda n: (0, 0)),
            pl.BlockSpec((9, Cp, Cp), lambda n: (0, 0, 0)),
            pl.BlockSpec((1, Cp), lambda n: (0, 0)),
            pl.BlockSpec((1, Cp), lambda n: (0, 0)),
        ],
        out_specs=pl.BlockSpec((None, H, W, Cp), lambda n: (n, 0, 0, 0)),
        scratch_shapes=[pltpu.VMEM((H + 2, W + 2, Cp), compute_dtype)],
    )

    out_nhwc = pl.pallas_call(
        _basic_block_kernel,
        out_shape=jax.ShapeDtypeStruct((N, H, W, Cp), jnp.float32),
        grid_spec=grid_spec,
        compiler_params=pltpu.CompilerParams(
            dimension_semantics=("parallel",),          # batch across TCs (v7x)
            vmem_limit_bytes=32 * 1024 * 1024,
        ),
    )(xpad, w1, s1, b1, w2, s2, b2)

    out_nhwc = out_nhwc[..., :Cout]                    # drop padded channels
    return jnp.transpose(out_nhwc, (0, 3, 1, 2))       # NHWC -> NCHW


def basic_block_reference(x_nchw, params):
    """Pure-JAX reference (XLA convs) for correctness checking."""
    x = jnp.transpose(x_nchw, (0, 2, 3, 1)).astype(jnp.float32)
    w1 = jnp.transpose(params["conv1_w"], (2, 3, 1, 0)).astype(jnp.float32)
    w2 = jnp.transpose(params["conv2_w"], (2, 3, 1, 0)).astype(jnp.float32)
    dn = ("NHWC", "HWIO", "NHWC")
    s1, b1 = _fold_bn(params["bn1_gamma"], params["bn1_beta"],
                      params["bn1_mean"], params["bn1_var"])
    s2, b2 = _fold_bn(params["bn2_gamma"], params["bn2_beta"],
                      params["bn2_mean"], params["bn2_var"])
    out = jax.lax.conv_general_dilated(x, w1, (1, 1), "SAME", dimension_numbers=dn)
    out = jnp.maximum(out * s1 + b1, 0.0)
    out = jax.lax.conv_general_dilated(out, w2, (1, 1), "SAME", dimension_numbers=dn)
    out = out * s2 + b2
    out = jnp.maximum(out + x, 0.0)
    return jnp.transpose(out, (0, 3, 1, 2))


if __name__ == "__main__":
    inplanes = planes = 4
    N, H, W = 2, 16, 16

    key = jax.random.PRNGKey(0)
    ks = jax.random.split(key, 11)
    params = {
        "conv1_w": 0.1 * jax.random.normal(ks[0], (planes, inplanes, 3, 3), jnp.float32),
        "conv2_w": 0.1 * jax.random.normal(ks[1], (planes, planes, 3, 3), jnp.float32),
        "bn1_gamma": jax.random.uniform(ks[2], (planes,), jnp.float32, 0.5, 1.5),
        "bn1_beta": 0.1 * jax.random.normal(ks[3], (planes,), jnp.float32),
        "bn1_mean": 0.1 * jax.random.normal(ks[4], (planes,), jnp.float32),
        "bn1_var": jax.random.uniform(ks[5], (planes,), jnp.float32, 0.5, 1.5),
        "bn2_gamma": jax.random.uniform(ks[6], (planes,), jnp.float32, 0.5, 1.5),
        "bn2_beta": 0.1 * jax.random.normal(ks[7], (planes,), jnp.float32),
        "bn2_mean": 0.1 * jax.random.normal(ks[8], (planes,), jnp.float32),
        "bn2_var": jax.random.uniform(ks[9], (planes,), jnp.float32, 0.5, 1.5),
    }
    x = jax.random.normal(ks[10], (N, inplanes, H, W), jnp.float32)

    fwd = jax.jit(basic_block_forward)
    out = jax.block_until_ready(fwd(x, params))
    ref = jax.block_until_ready(basic_block_reference(x, params))

    assert out.shape == (N, planes, H, W), out.shape
    assert jnp.allclose(out, ref, rtol=1e-3, atol=1e-3), \
        float(jnp.max(jnp.abs(out - ref)))
    print("KERNEL_OK")
</pallas_src>

<mosaic_0001>
module attributes {stable_mosaic.version = 11 : i64} {
  func.func @_basic_block_kernel(%arg0: i32, %arg1: memref<1x18x18x128xf32, #tpu.memory_space<vmem>>, %arg2: memref<9x128x128xf32, #tpu.memory_space<vmem>>, %arg3: memref<1x128xf32, #tpu.memory_space<vmem>>, %arg4: memref<1x128xf32, #tpu.memory_space<vmem>>, %arg5: memref<9x128x128xf32, #tpu.memory_space<vmem>>, %arg6: memref<1x128xf32, #tpu.memory_space<vmem>>, %arg7: memref<1x128xf32, #tpu.memory_space<vmem>>, %arg8: memref<1x16x16x128xf32, #tpu.memory_space<vmem>>, %arg9: memref<18x18x128xf32, #tpu.memory_space<vmem>>) attributes {dimension_semantics = [#tpu.dimension_semantics<parallel>], iteration_bounds = array<i64: 2>, scalar_prefetch = 0 : i64, scratch_operands = 1 : i64, tpu.core_type = #tpu.core_type<tc>, window_params = [{transform_indices = @transform_0, window_bounds = array<i64: 1, 18, 18, 128>}, {pipeline_mode = #tpu.pipeline_mode<synchronous>, transform_indices = @transform_1, window_bounds = array<i64: 9, 128, 128>}, {pipeline_mode = #tpu.pipeline_mode<synchronous>, transform_indices = @transform_2, window_bounds = array<i64: 1, 128>}, {pipeline_mode = #tpu.pipeline_mode<synchronous>, transform_indices = @transform_3, window_bounds = array<i64: 1, 128>}, {pipeline_mode = #tpu.pipeline_mode<synchronous>, transform_indices = @transform_4, window_bounds = array<i64: 9, 128, 128>}, {pipeline_mode = #tpu.pipeline_mode<synchronous>, transform_indices = @transform_5, window_bounds = array<i64: 1, 128>}, {pipeline_mode = #tpu.pipeline_mode<synchronous>, transform_indices = @transform_6, window_bounds = array<i64: 1, 128>}, {transform_indices = @transform_7, window_bounds = array<i64: 1, 16, 16, 128>}]} {
    %c0 = arith.constant 0 : index
    %c0_0 = arith.constant 0 : index
    %c0_1 = arith.constant 0 : index
    %c0_2 = arith.constant 0 : index
    %0 = vector.load %arg1[%c0, %c0_0, %c0_1, %c0_2] : memref<1x18x18x128xf32, #tpu.memory_space<vmem>>, vector<1x16x16x128xf32>
    %1 = vector.shape_cast %0 : vector<1x16x16x128xf32> to vector<16x16x128xf32>
    %2 = vector.shape_cast %1 : vector<16x16x128xf32> to vector<256x128xf32>
    %c0_3 = arith.constant 0 : index
    %c0_4 = arith.constant 0 : index
    %c0_5 = arith.constant 0 : index
    %3 = vector.load %arg2[%c0_3, %c0_4, %c0_5] : memref<9x128x128xf32, #tpu.memory_space<vmem>>, vector<1x128x128xf32>
    %4 = vector.shape_cast %3 : vector<1x128x128xf32> to vector<128x128xf32>
    %cst = arith.constant dense<0.000000e+00> : vector<256x128xf32>
    %5 = tpu.matmul %2, %4, %cst {dimension_numbers = #tpu.dot_dimension_numbers<[1], [0], [0], [1], [0, 0, 1, 1], [], []>} : vector<256x128xf32>, vector<128x128xf32>, vector<256x128xf32> -> vector<256x128xf32>
    %c0_6 = arith.constant 0 : index
    %c0_7 = arith.constant 0 : index
    %c1 = arith.constant 1 : index
    %c0_8 = arith.constant 0 : index
    %6 = vector.load %arg1[%c0_6, %c0_7, %c1, %c0_8] : memref<1x18x18x128xf32, #tpu.memory_space<vmem>>, vector<1x16x16x128xf32>
    %7 = vector.shape_cast %6 : vector<1x16x16x128xf32> to vector<16x16x128xf32>
    %8 = vector.shape_cast %7 : vector<16x16x128xf32> to vector<256x128xf32>
    %c1_9 = arith.constant 1 : index
    %c0_10 = arith.constant 0 : index
    %c0_11 = arith.constant 0 : index
    %9 = vector.load %arg2[%c1_9, %c0_10, %c0_11] : memref<9x128x128xf32, #tpu.memory_space<vmem>>, vector<1x128x128xf32>
    %10 = vector.shape_cast %9 : vector<1x128x128xf32> to vector<128x128xf32>
    %cst_12 = arith.constant dense<0.000000e+00> : vector<256x128xf32>
    %11 = tpu.matmul %8, %10, %cst_12 {dimension_numbers = #tpu.dot_dimension_numbers<[1], [0], [0], [1], [0, 0, 1, 1], [], []>} : vector<256x128xf32>, vector<128x128xf32>, vector<256x128xf32> -> vector<256x128xf32>
    %12 = arith.addf %5, %11 : vector<256x128xf32>
    %c0_13 = arith.constant 0 : index
    %c0_14 = arith.constant 0 : index
    %c2 = arith.constant 2 : index
    %c0_15 = arith.constant 0 : index
    %13 = vector.load %arg1[%c0_13, %c0_14, %c2, %c0_15] : memref<1x18x18x128xf32, #tpu.memory_space<vmem>>, vector<1x16x16x128xf32>
    %14 = vector.shape_cast %13 : vector<1x16x16x128xf32> to vector<16x16x128xf32>
    %15 = vector.shape_cast %14 : vector<16x16x128xf32> to vector<256x128xf32>
    %c2_16 = arith.constant 2 : index
    %c0_17 = arith.constant 0 : index
    %c0_18 = arith.constant 0 : index
    %16 = vector.load %arg2[%c2_16, %c0_17, %c0_18] : memref<9x128x128xf32, #tpu.memory_space<vmem>>, vector<1x128x128xf32>
    %17 = vector.shape_cast %16 : vector<1x128x128xf32> to vector<128x128xf32>
    %cst_19 = arith.constant dense<0.000000e+00> : vector<256x128xf32>
    %18 = tpu.matmul %15, %17, %cst_19 {dimension_numbers = #tpu.dot_dimension_numbers<[1], [0], [0], [1], [0, 0, 1, 1], [], []>} : vector<256x128xf32>, vector<128x128xf32>, vector<256x128xf32> -> vector<256x128xf32>
    %19 = arith.addf %12, %18 : vector<256x128xf32>
    %c0_20 = arith.constant 0 : index
    %c1_21 = arith.constant 1 : index
    %c0_22 = arith.constant 0 : index
    %c0_23 = arith.constant 0 : index
    %20 = vector.load %arg1[%c0_20, %c1_21, %c0_22, %c0_23] : memref<1x18x18x128xf32, #tpu.memory_space<vmem>>, vector<1x16x16x128xf32>
    %21 = vector.shape_cast %20 : vector<1x16x16x128xf32> to vector<16x16x128xf32>
    %22 = vector.shape_cast %21 : vector<16x16x128xf32> to vector<256x128xf32>
    %c3 = arith.constant 3 : index
    %c0_24 = arith.constant 0 : index
    %c0_25 = arith.constant 0 : index
    %23 = vector.load %arg2[%c3, %c0_24, %c0_25] : memref<9x128x128xf32, #tpu.memory_space<vmem>>, vector<1x128x128xf32>
    %24 = vector.shape_cast %23 : vector<1x128x128xf32> to vector<128x128xf32>
    %cst_26 = arith.constant dense<0.000000e+00> : vector<256x128xf32>
    %25 = tpu.matmul %22, %24, %cst_26 {dimension_numbers = #tpu.dot_dimension_numbers<[1], [0], [0], [1], [0, 0, 1, 1], [], []>} : vector<256x128xf32>, vector<128x128xf32>, vector<256x128xf32> -> vector<256x128xf32>
    %26 = arith.addf %19, %25 : vector<256x128xf32>
    %c0_27 = arith.constant 0 : index
    %c1_28 = arith.constant 1 : index
    %c1_29 = arith.constant 1 : index
    %c0_30 = arith.constant 0 : index
    %27 = vector.load %arg1[%c0_27, %c1_28, %c1_29, %c0_30] : memref<1x18x18x128xf32, #tpu.memory_space<vmem>>, vector<1x16x16x128xf32>
    %28 = vector.shape_cast %27 : vector<1x16x16x128xf32> to vector<16x16x128xf32>
    %29 = vector.shape_cast %28 : vector<16x16x128xf32> to vector<256x128xf32>
    %c4 = arith.constant 4 : index
    %c0_31 = arith.constant 0 : index
    %c0_32 = arith.constant 0 : index
    %30 = vector.load %arg2[%c4, %c0_31, %c0_32] : memref<9x128x128xf32, #tpu.memory_space<vmem>>, vector<1x128x128xf32>
    %31 = vector.shape_cast %30 : vector<1x128x128xf32> to vector<128x128xf32>
    %cst_33 = arith.constant dense<0.000000e+00> : vector<256x128xf32>
    %32 = tpu.matmul %29, %31, %cst_33 {dimension_numbers = #tpu.dot_dimension_numbers<[1], [0], [0], [1], [0, 0, 1, 1], [], []>} : vector<256x128xf32>, vector<128x128xf32>, vector<256x128xf32> -> vector<256x128xf32>
    %33 = arith.addf %26, %32 : vector<256x128xf32>
    %c0_34 = arith.constant 0 : index
    %c1_35 = arith.constant 1 : index
    %c2_36 = arith.constant 2 : index
    %c0_37 = arith.constant 0 : index
    %34 = vector.load %arg1[%c0_34, %c1_35, %c2_36, %c0_37] : memref<1x18x18x128xf32, #tpu.memory_space<vmem>>, vector<1x16x16x128xf32>
    %35 = vector.shape_cast %34 : vector<1x16x16x128xf32> to vector<16x16x128xf32>
    %36 = vector.shape_cast %35 : vector<16x16x128xf32> to vector<256x128xf32>
    %c5 = arith.constant 5 : index
    %c0_38 = arith.constant 0 : index
    %c0_39 = arith.constant 0 : index
    %37 = vector.load %arg2[%c5, %c0_38, %c0_39] : memref<9x128x128xf32, #tpu.memory_space<vmem>>, vector<1x128x128xf32>
    %38 = vector.shape_cast %37 : vector<1x128x128xf32> to vector<128x128xf32>
    %cst_40 = arith.constant dense<0.000000e+00> : vector<256x128xf32>
    %39 = tpu.matmul %36, %38, %cst_40 {dimension_numbers = #tpu.dot_dimension_numbers<[1], [0], [0], [1], [0, 0, 1, 1], [], []>} : vector<256x128xf32>, vector<128x128xf32>, vector<256x128xf32> -> vector<256x128xf32>
    %40 = arith.addf %33, %39 : vector<256x128xf32>
    %c0_41 = arith.constant 0 : index
    %c2_42 = arith.constant 2 : index
    %c0_43 = arith.constant 0 : index
    %c0_44 = arith.constant 0 : index
    %41 = vector.load %arg1[%c0_41, %c2_42, %c0_43, %c0_44] : memref<1x18x18x128xf32, #tpu.memory_space<vmem>>, vector<1x16x16x128xf32>
    %42 = vector.shape_cast %41 : vector<1x16x16x128xf32> to vector<16x16x128xf32>
    %43 = vector.shape_cast %42 : vector<16x16x128xf32> to vector<256x128xf32>
    %c6 = arith.constant 6 : index
    %c0_45 = arith.constant 0 : index
    %c0_46 = arith.constant 0 : index
    %44 = vector.load %arg2[%c6, %c0_45, %c0_46] : memref<9x128x128xf32, #tpu.memory_space<vmem>>, vector<1x128x128xf32>
    %45 = vector.shape_cast %44 : vector<1x128x128xf32> to vector<128x128xf32>
    %cst_47 = arith.constant dense<0.000000e+00> : vector<256x128xf32>
    %46 = tpu.matmul %43, %45, %cst_47 {dimension_numbers = #tpu.dot_dimension_numbers<[1], [0], [0], [1], [0, 0, 1, 1], [], []>} : vector<256x128xf32>, vector<128x128xf32>, vector<256x128xf32> -> vector<256x128xf32>
    %47 = arith.addf %40, %46 : vector<256x128xf32>
    %c0_48 = arith.constant 0 : index
    %c2_49 = arith.constant 2 : index
    %c1_50 = arith.constant 1 : index
    %c0_51 = arith.constant 0 : index
    %48 = vector.load %arg1[%c0_48, %c2_49, %c1_50, %c0_51] : memref<1x18x18x128xf32, #tpu.memory_space<vmem>>, vector<1x16x16x128xf32>
    %49 = vector.shape_cast %48 : vector<1x16x16x128xf32> to vector<16x16x128xf32>
    %50 = vector.shape_cast %49 : vector<16x16x128xf32> to vector<256x128xf32>
    %c7 = arith.constant 7 : index
    %c0_52 = arith.constant 0 : index
    %c0_53 = arith.constant 0 : index
    %51 = vector.load %arg2[%c7, %c0_52, %c0_53] : memref<9x128x128xf32, #tpu.memory_space<vmem>>, vector<1x128x128xf32>
    %52 = vector.shape_cast %51 : vector<1x128x128xf32> to vector<128x128xf32>
    %cst_54 = arith.constant dense<0.000000e+00> : vector<256x128xf32>
    %53 = tpu.matmul %50, %52, %cst_54 {dimension_numbers = #tpu.dot_dimension_numbers<[1], [0], [0], [1], [0, 0, 1, 1], [], []>} : vector<256x128xf32>, vector<128x128xf32>, vector<256x128xf32> -> vector<256x128xf32>
    %54 = arith.addf %47, %53 : vector<256x128xf32>
    %c0_55 = arith.constant 0 : index
    %c2_56 = arith.constant 2 : index
    %c2_57 = arith.constant 2 : index
    %c0_58 = arith.constant 0 : index
    %55 = vector.load %arg1[%c0_55, %c2_56, %c2_57, %c0_58] : memref<1x18x18x128xf32, #tpu.memory_space<vmem>>, vector<1x16x16x128xf32>
    %56 = vector.shape_cast %55 : vector<1x16x16x128xf32> to vector<16x16x128xf32>
    %57 = vector.shape_cast %56 : vector<16x16x128xf32> to vector<256x128xf32>
    %c8 = arith.constant 8 : index
    %c0_59 = arith.constant 0 : index
    %c0_60 = arith.constant 0 : index
    %58 = vector.load %arg2[%c8, %c0_59, %c0_60] : memref<9x128x128xf32, #tpu.memory_space<vmem>>, vector<1x128x128xf32>
    %59 = vector.shape_cast %58 : vector<1x128x128xf32> to vector<128x128xf32>
    %cst_61 = arith.constant dense<0.000000e+00> : vector<256x128xf32>
    %60 = tpu.matmul %57, %59, %cst_61 {dimension_numbers = #tpu.dot_dimension_numbers<[1], [0], [0], [1], [0, 0, 1, 1], [], []>} : vector<256x128xf32>, vector<128x128xf32>, vector<256x128xf32> -> vector<256x128xf32>
    %61 = arith.addf %54, %60 : vector<256x128xf32>
    %c0_62 = arith.constant 0 : index
    %c0_63 = arith.constant 0 : index
    %62 = vector.load %arg3[%c0_62, %c0_63] : memref<1x128xf32, #tpu.memory_space<vmem>>, vector<1x128xf32>
    %63 = vector.broadcast %62 : vector<1x128xf32> to vector<256x128xf32>
    %64 = arith.mulf %61, %63 : vector<256x128xf32>
    %c0_64 = arith.constant 0 : index
    %c0_65 = arith.constant 0 : index
    %65 = vector.load %arg4[%c0_64, %c0_65] : memref<1x128xf32, #tpu.memory_space<vmem>>, vector<1x128xf32>
    %66 = vector.broadcast %65 : vector<1x128xf32> to vector<256x128xf32>
    %67 = arith.addf %64, %66 : vector<256x128xf32>
    %cst_66 = arith.constant 0.000000e+00 : f32
    %68 = vector.broadcast %cst_66 : f32 to vector<256x128xf32>
    %69 = arith.maximumf %67, %68 : vector<256x128xf32>
    %cst_67 = arith.constant 0.000000e+00 : f32
    %70 = vector.broadcast %cst_67 : f32 to vector<1x18x128xf32>
    %cst_68 = arith.constant 0.000000e+00 : f32
    %71 = vector.broadcast %cst_68 : f32 to vector<18x1x128xf32>
    %c0_69 = arith.constant 0 : index
    %c0_70 = arith.constant 0 : index
    %c0_71 = arith.constant 0 : index
    %72 = vector.load %arg9[%c0_69, %c0_70, %c0_71] : memref<18x18x128xf32, #tpu.memory_space<vmem>>, vector<1x18x128xf32>
    tpu.vector_store %arg9[%c0_69, %c0_70, %c0_71], %70 {strides = array<i32>} : memref<18x18x128xf32, #tpu.memory_space<vmem>>, vector<1x18x128xf32>,
    %c17 = arith.constant 17 : index
    %c0_72 = arith.constant 0 : index
    %c0_73 = arith.constant 0 : index
    %73 = vector.load %arg9[%c17, %c0_72, %c0_73] : memref<18x18x128xf32, #tpu.memory_space<vmem>>, vector<1x18x128xf32>
    tpu.vector_store %arg9[%c17, %c0_72, %c0_73], %70 {strides = array<i32>} : memref<18x18x128xf32, #tpu.memory_space<vmem>>, vector<1x18x128xf32>,
    %c0_74 = arith.constant 0 : index
    %c0_75 = arith.constant 0 : index
    %c0_76 = arith.constant 0 : index
    %74 = vector.load %arg9[%c0_74, %c0_75, %c0_76] : memref<18x18x128xf32, #tpu.memory_space<vmem>>, vector<18x1x128xf32>
    tpu.vector_store %arg9[%c0_74, %c0_75, %c0_76], %71 {strides = array<i32>} : memref<18x18x128xf32, #tpu.memory_space<vmem>>, vector<18x1x128xf32>,
    %c0_77 = arith.constant 0 : index
    %c17_78 = arith.constant 17 : index
    %c0_79 = arith.constant 0 : index
    %75 = vector.load %arg9[%c0_77, %c17_78, %c0_79] : memref<18x18x128xf32, #tpu.memory_space<vmem>>, vector<18x1x128xf32>
    tpu.vector_store %arg9[%c0_77, %c17_78, %c0_79], %71 {strides = array<i32>} : memref<18x18x128xf32, #tpu.memory_space<vmem>>, vector<18x1x128xf32>,
    %76 = vector.shape_cast %69 : vector<256x128xf32> to vector<16x16x128xf32>
    %c1_80 = arith.constant 1 : index
    %c1_81 = arith.constant 1 : index
    %c0_82 = arith.constant 0 : index
    %77 = vector.load %arg9[%c1_80, %c1_81, %c0_82] : memref<18x18x128xf32, #tpu.memory_space<vmem>>, vector<16x16x128xf32>
    tpu.vector_store %arg9[%c1_80, %c1_81, %c0_82], %76 {strides = array<i32>} : memref<18x18x128xf32, #tpu.memory_space<vmem>>, vector<16x16x128xf32>,
    %c0_83 = arith.constant 0 : index
    %c0_84 = arith.constant 0 : index
    %c0_85 = arith.constant 0 : index
    %78 = vector.load %arg9[%c0_83, %c0_84, %c0_85] : memref<18x18x128xf32, #tpu.memory_space<vmem>>, vector<16x16x128xf32>
    %79 = vector.shape_cast %78 : vector<16x16x128xf32> to vector<256x128xf32>
    %c0_86 = arith.constant 0 : index
    %c0_87 = arith.constant 0 : index
    %c0_88 = arith.constant 0 : index
    %80 = vector.load %arg5[%c0_86, %c0_87, %c0_88] : memref<9x128x128xf32, #tpu.memory_space<vmem>>, vector<1x128x128xf32>
    %81 = vector.shape_cast %80 : vector<1x128x128xf32> to vector<128x128xf32>
    %cst_89 = arith.constant dense<0.000000e+00> : vector<256x128xf32>
    %82 = tpu.matmul %79, %81, %cst_89 {dimension_numbers = #tpu.dot_dimension_numbers<[1], [0], [0], [1], [0, 0, 1, 1], [], []>} : vector<256x128xf32>, vector<128x128xf32>, vector<256x128xf32> -> vector<256x128xf32>
    %c0_90 = arith.constant 0 : index
    %c1_91 = arith.constant 1 : index
    %c0_92 = arith.constant 0 : index
    %83 = vector.load %arg9[%c0_90, %c1_91, %c0_92] : memref<18x18x128xf32, #tpu.memory_space<vmem>>, vector<16x16x128xf32>
    %84 = vector.shape_cast %83 : vector<16x16x128xf32> to vector<256x128xf32>
    %c1_93 = arith.constant 1 : index
    %c0_94 = arith.constant 0 : index
    %c0_95 = arith.constant 0 : index
    %85 = vector.load %arg5[%c1_93, %c0_94, %c0_95] : memref<9x128x128xf32, #tpu.memory_space<vmem>>, vector<1x128x128xf32>
    %86 = vector.shape_cast %85 : vector<1x128x128xf32> to vector<128x128xf32>
    %cst_96 = arith.constant dense<0.000000e+00> : vector<256x128xf32>
    %87 = tpu.matmul %84, %86, %cst_96 {dimension_numbers = #tpu.dot_dimension_numbers<[1], [0], [0], [1], [0, 0, 1, 1], [], []>} : vector<256x128xf32>, vector<128x128xf32>, vector<256x128xf32> -> vector<256x128xf32>
    %88 = arith.addf %82, %87 : vector<256x128xf32>
    %c0_97 = arith.constant 0 : index
    %c2_98 = arith.constant 2 : index
    %c0_99 = arith.constant 0 : index
    %89 = vector.load %arg9[%c0_97, %c2_98, %c0_99] : memref<18x18x128xf32, #tpu.memory_space<vmem>>, vector<16x16x128xf32>
    %90 = vector.shape_cast %89 : vector<16x16x128xf32> to vector<256x128xf32>
    %c2_100 = arith.constant 2 : index
    %c0_101 = arith.constant 0 : index
    %c0_102 = arith.constant 0 : index
    %91 = vector.load %arg5[%c2_100, %c0_101, %c0_102] : memref<9x128x128xf32, #tpu.memory_space<vmem>>, vector<1x128x128xf32>
    %92 = vector.shape_cast %91 : vector<1x128x128xf32> to vector<128x128xf32>
    %cst_103 = arith.constant dense<0.000000e+00> : vector<256x128xf32>
    %93 = tpu.matmul %90, %92, %cst_103 {dimension_numbers = #tpu.dot_dimension_numbers<[1], [0], [0], [1], [0, 0, 1, 1], [], []>} : vector<256x128xf32>, vector<128x128xf32>, vector<256x128xf32> -> vector<256x128xf32>
    %94 = arith.addf %88, %93 : vector<256x128xf32>
    %c1_104 = arith.constant 1 : index
    %c0_105 = arith.constant 0 : index
    %c0_106 = arith.constant 0 : index
    %95 = vector.load %arg9[%c1_104, %c0_105, %c0_106] : memref<18x18x128xf32, #tpu.memory_space<vmem>>, vector<16x16x128xf32>
    %96 = vector.shape_cast %95 : vector<16x16x128xf32> to vector<256x128xf32>
    %c3_107 = arith.constant 3 : index
    %c0_108 = arith.constant 0 : index
    %c0_109 = arith.constant 0 : index
    %97 = vector.load %arg5[%c3_107, %c0_108, %c0_109] : memref<9x128x128xf32, #tpu.memory_space<vmem>>, vector<1x128x128xf32>
    %98 = vector.shape_cast %97 : vector<1x128x128xf32> to vector<128x128xf32>
    %cst_110 = arith.constant dense<0.000000e+00> : vector<256x128xf32>
    %99 = tpu.matmul %96, %98, %cst_110 {dimension_numbers = #tpu.dot_dimension_numbers<[1], [0], [0], [1], [0, 0, 1, 1], [], []>} : vector<256x128xf32>, vector<128x128xf32>, vector<256x128xf32> -> vector<256x128xf32>
    %100 = arith.addf %94, %99 : vector<256x128xf32>
    %c1_111 = arith.constant 1 : index
    %c1_112 = arith.constant 1 : index
    %c0_113 = arith.constant 0 : index
    %101 = vector.load %arg9[%c1_111, %c1_112, %c0_113] : memref<18x18x128xf32, #tpu.memory_space<vmem>>, vector<16x16x128xf32>
    %102 = vector.shape_cast %101 : vector<16x16x128xf32> to vector<256x128xf32>
    %c4_114 = arith.constant 4 : index
    %c0_115 = arith.constant 0 : index
    %c0_116 = arith.constant 0 : index
    %103 = vector.load %arg5[%c4_114, %c0_115, %c0_116] : memref<9x128x128xf32, #tpu.memory_space<vmem>>, vector<1x128x128xf32>
    %104 = vector.shape_cast %103 : vector<1x128x128xf32> to vector<128x128xf32>
    %cst_117 = arith.constant dense<0.000000e+00> : vector<256x128xf32>
    %105 = tpu.matmul %102, %104, %cst_117 {dimension_numbers = #tpu.dot_dimension_numbers<[1], [0], [0], [1], [0, 0, 1, 1], [], []>} : vector<256x128xf32>, vector<128x128xf32>, vector<256x128xf32> -> vector<256x128xf32>
    %106 = arith.addf %100, %105 : vector<256x128xf32>
    %c1_118 = arith.constant 1 : index
    %c2_119 = arith.constant 2 : index
    %c0_120 = arith.constant 0 : index
    %107 = vector.load %arg9[%c1_118, %c2_119, %c0_120] : memref<18x18x128xf32, #tpu.memory_space<vmem>>, vector<16x16x128xf32>
    %108 = vector.shape_cast %107 : vector<16x16x128xf32> to vector<256x128xf32>
    %c5_121 = arith.constant 5 : index
    %c0_122 = arith.constant 0 : index
    %c0_123 = arith.constant 0 : index
    %109 = vector.load %arg5[%c5_121, %c0_122, %c0_123] : memref<9x128x128xf32, #tpu.memory_space<vmem>>, vector<1x128x128xf32>
    %110 = vector.shape_cast %109 : vector<1x128x128xf32> to vector<128x128xf32>
    %cst_124 = arith.constant dense<0.000000e+00> : vector<256x128xf32>
    %111 = tpu.matmul %108, %110, %cst_124 {dimension_numbers = #tpu.dot_dimension_numbers<[1], [0], [0], [1], [0, 0, 1, 1], [], []>} : vector<256x128xf32>, vector<128x128xf32>, vector<256x128xf32> -> vector<256x128xf32>
    %112 = arith.addf %106, %111 : vector<256x128xf32>
    %c2_125 = arith.constant 2 : index
    %c0_126 = arith.constant 0 : index
    %c0_127 = arith.constant 0 : index
    %113 = vector.load %arg9[%c2_125, %c0_126, %c0_127] : memref<18x18x128xf32, #tpu.memory_space<vmem>>, vector<16x16x128xf32>
    %114 = vector.shape_cast %113 : vector<16x16x128xf32> to vector<256x128xf32>
    %c6_128 = arith.constant 6 : index
    %c0_129 = arith.constant 0 : index
    %c0_130 = arith.constant 0 : index
    %115 = vector.load %arg5[%c6_128, %c0_129, %c0_130] : memref<9x128x128xf32, #tpu.memory_space<vmem>>, vector<1x128x128xf32>
    %116 = vector.shape_cast %115 : vector<1x128x128xf32> to vector<128x128xf32>
    %cst_131 = arith.constant dense<0.000000e+00> : vector<256x128xf32>
    %117 = tpu.matmul %114, %116, %cst_131 {dimension_numbers = #tpu.dot_dimension_numbers<[1], [0], [0], [1], [0, 0, 1, 1], [], []>} : vector<256x128xf32>, vector<128x128xf32>, vector<256x128xf32> -> vector<256x128xf32>
    %118 = arith.addf %112, %117 : vector<256x128xf32>
    %c2_132 = arith.constant 2 : index
    %c1_133 = arith.constant 1 : index
    %c0_134 = arith.constant 0 : index
    %119 = vector.load %arg9[%c2_132, %c1_133, %c0_134] : memref<18x18x128xf32, #tpu.memory_space<vmem>>, vector<16x16x128xf32>
    %120 = vector.shape_cast %119 : vector<16x16x128xf32> to vector<256x128xf32>
    %c7_135 = arith.constant 7 : index
    %c0_136 = arith.constant 0 : index
    %c0_137 = arith.constant 0 : index
    %121 = vector.load %arg5[%c7_135, %c0_136, %c0_137] : memref<9x128x128xf32, #tpu.memory_space<vmem>>, vector<1x128x128xf32>
    %122 = vector.shape_cast %121 : vector<1x128x128xf32> to vector<128x128xf32>
    %cst_138 = arith.constant dense<0.000000e+00> : vector<256x128xf32>
    %123 = tpu.matmul %120, %122, %cst_138 {dimension_numbers = #tpu.dot_dimension_numbers<[1], [0], [0], [1], [0, 0, 1, 1], [], []>} : vector<256x128xf32>, vector<128x128xf32>, vector<256x128xf32> -> vector<256x128xf32>
    %124 = arith.addf %118, %123 : vector<256x128xf32>
    %c2_139 = arith.constant 2 : index
    %c2_140 = arith.constant 2 : index
    %c0_141 = arith.constant 0 : index
    %125 = vector.load %arg9[%c2_139, %c2_140, %c0_141] : memref<18x18x128xf32, #tpu.memory_space<vmem>>, vector<16x16x128xf32>
    %126 = vector.shape_cast %125 : vector<16x16x128xf32> to vector<256x128xf32>
    %c8_142 = arith.constant 8 : index
    %c0_143 = arith.constant 0 : index
    %c0_144 = arith.constant 0 : index
    %127 = vector.load %arg5[%c8_142, %c0_143, %c0_144] : memref<9x128x128xf32, #tpu.memory_space<vmem>>, vector<1x128x128xf32>
    %128 = vector.shape_cast %127 : vector<1x128x128xf32> to vector<128x128xf32>
    %cst_145 = arith.constant dense<0.000000e+00> : vector<256x128xf32>
    %129 = tpu.matmul %126, %128, %cst_145 {dimension_numbers = #tpu.dot_dimension_numbers<[1], [0], [0], [1], [0, 0, 1, 1], [], []>} : vector<256x128xf32>, vector<128x128xf32>, vector<256x128xf32> -> vector<256x128xf32>
    %130 = arith.addf %124, %129 : vector<256x128xf32>
    %c0_146 = arith.constant 0 : index
    %c0_147 = arith.constant 0 : index
    %131 = vector.load %arg6[%c0_146, %c0_147] : memref<1x128xf32, #tpu.memory_space<vmem>>, vector<1x128xf32>
    %132 = vector.broadcast %131 : vector<1x128xf32> to vector<256x128xf32>
    %133 = arith.mulf %130, %132 : vector<256x128xf32>
    %c0_148 = arith.constant 0 : index
    %c0_149 = arith.constant 0 : index
    %134 = vector.load %arg7[%c0_148, %c0_149] : memref<1x128xf32, #tpu.memory_space<vmem>>, vector<1x128xf32>
    %135 = vector.broadcast %134 : vector<1x128xf32> to vector<256x128xf32>
    %136 = arith.addf %133, %135 : vector<256x128xf32>
    %137 = arith.addf %136, %29 : vector<256x128xf32>
    %cst_150 = arith.constant 0.000000e+00 : f32
    %138 = vector.broadcast %cst_150 : f32 to vector<256x128xf32>
    %139 = arith.maximumf %137, %138 : vector<256x128xf32>
    %140 = vector.shape_cast %139 : vector<256x128xf32> to vector<16x16x128xf32>
    %c0_151 = arith.constant 0 : index
    %c0_152 = arith.constant 0 : index
    %c0_153 = arith.constant 0 : index
    %c0_154 = arith.constant 0 : index
    %141 = vector.load %arg8[%c0_151, %c0_152, %c0_153, %c0_154] : memref<1x16x16x128xf32, #tpu.memory_space<vmem>>, vector<1x16x16x128xf32>
    %142 = vector.shape_cast %141 : vector<1x16x16x128xf32> to vector<16x16x128xf32>
    %143 = vector.shape_cast %140 : vector<16x16x128xf32> to vector<1x16x16x128xf32>
    tpu.vector_store %arg8[%c0_151, %c0_152, %c0_153, %c0_154], %143 {strides = array<i32>} : memref<1x16x16x128xf32, #tpu.memory_space<vmem>>, vector<1x16x16x128xf32>,
    return
  }
  func.func @transform_0(%arg0: i32) -> (i32, i32, i32, i32) {
    %c0_i32 = arith.constant 0 : i32
    %c0_i32_0 = arith.constant 0 : i32
    %c0_i32_1 = arith.constant 0 : i32
    %c0_i32_2 = arith.constant 0 : i32
    return %arg0, %c0_i32, %c0_i32_0, %c0_i32_1 : i32, i32, i32, i32
  }
  func.func @transform_1(%arg0: i32) -> (i32, i32, i32) {
    %c0_i32 = arith.constant 0 : i32
    %c0_i32_0 = arith.constant 0 : i32
    %c0_i32_1 = arith.constant 0 : i32
    %c0_i32_2 = arith.constant 0 : i32
    return %c0_i32, %c0_i32_0, %c0_i32_1 : i32, i32, i32
  }
  func.func @transform_2(%arg0: i32) -> (i32, i32) {
    %c0_i32 = arith.constant 0 : i32
    %c0_i32_0 = arith.constant 0 : i32
    %c0_i32_1 = arith.constant 0 : i32
    return %c0_i32, %c0_i32_0 : i32, i32
  }
  func.func @transform_3(%arg0: i32) -> (i32, i32) {
    %c0_i32 = arith.constant 0 : i32
    %c0_i32_0 = arith.constant 0 : i32
    %c0_i32_1 = arith.constant 0 : i32
    return %c0_i32, %c0_i32_0 : i32, i32
  }
  func.func @transform_4(%arg0: i32) -> (i32, i32, i32) {
    %c0_i32 = arith.constant 0 : i32
    %c0_i32_0 = arith.constant 0 : i32
    %c0_i32_1 = arith.constant 0 : i32
    %c0_i32_2 = arith.constant 0 : i32
    return %c0_i32, %c0_i32_0, %c0_i32_1 : i32, i32, i32
  }
  func.func @transform_5(%arg0: i32) -> (i32, i32) {
    %c0_i32 = arith.constant 0 : i32
    %c0_i32_0 = arith.constant 0 : i32
    %c0_i32_1 = arith.constant 0 : i32
    return %c0_i32, %c0_i32_0 : i32, i32
  }
  func.func @transform_6(%arg0: i32) -> (i32, i32) {
    %c0_i32 = arith.constant 0 : i32
    %c0_i32_0 = arith.constant 0 : i32
    %c0_i32_1 = arith.constant 0 : i32
    return %c0_i32, %c0_i32_0 : i32, i32
  }
  func.func @transform_7(%arg0: i32) -> (i32, i32, i32, i32) {
    %c0_i32 = arith.constant 0 : i32
    %c0_i32_0 = arith.constant 0 : i32
    %c0_i32_1 = arith.constant 0 : i32
    %c0_i32_2 = arith.constant 0 : i32
    return %arg0, %c0_i32, %c0_i32_0, %c0_i32_1 : i32, i32, i32, i32
  }
}

</mosaic_0001>

<bundles_post_ra>
// kernel: basic_block_forward.1
= control target key start
LH: loop header
LB: loop body
LE: loop exit
PB: predicated region body
PF: predicated region fallthrough
CT: control target
= control target key end

     0   :  { %s4639_s24 = smov 0   ;;  %s7191_s0 = inlined_call_operand.vmem [shape: f32[2,18,18,128], index: 0, kind: input, shape index: {}]   ;;  %s7192_s1 = inlined_call_operand.vmem [shape: f32[9,128,128], index: 1, kind: input, shape index: {}]   ;;  %s7193_s2 = inlined_call_operand.vmem [shape: f32[1,128], index: 2, kind: input, shape index: {}]   ;;  %s7194_s3 = inlined_call_operand.vmem [shape: f32[1,128], index: 3, kind: input, shape index: {}]   ;;  %s7195_s4 = inlined_call_operand.vmem [shape: f32[9,128,128], index: 4, kind: input, shape index: {}]   ;;  %s7196_s5 = inlined_call_operand.vmem [shape: f32[1,128], index: 5, kind: input, shape index: {}]   ;;  %s7197_s6 = inlined_call_operand.vmem [shape: f32[1,128], index: 6, kind: input, shape index: {}]   ;;  %s7198_s7 = inlined_call_operand.vmem [shape: f32[2,16,16,128], index: 7, kind: output, shape index: {}]  }
   0x1 LB: > { %s4047_s25 = sadd.s32 4294967295, %s4596_s24   ;;  %p4051_p0 = scmp.ge.s32.totalorder %s4596_s24, 1  ;;  %s4596_s24 = sphi %s4639_s24, %s17_s24  }
   0x2   : > { %p237_p1 = scmp.lt.s32.totalorder %s4596_s24, 3 }
   0x4   : > { %p238_p2 = pnand %p4051_p0, %p237_p1 }
   0x6   : > { %241 = sbr.rel (%p238_p2) target bundleno = 1454 (0x5ae), region = 48 }
   0xb   : > { %v4070_v0 = vld [vmem:[%s7192_s1 + $0xf8] sm:$0xff]  ;;  %v4069_v2 = vld [vmem:[%s7192_s1 + $0xf0] sm:$0xff]  ;;  %v4068_v4 = vld [vmem:[%s7192_s1 + $0xe8] sm:$0xff]  ;;  %p269_p3 = scmp.lt.s32.totalorder %s4047_s25, 1 }
   0xc   : > { %v326_v1 = vld [vmem:[%s7192_s1 + $0x78] sm:$0xff]  ;;  %376 = vmatpush.msra.mxu0 %v4070_v0  ;;  %4506 = vmatpush.msra.mxu2 %v4070_v0  ;;  %v325_v3 = vld [vmem:[%s7192_s1 + $0x70] sm:$0xff]  ;;  %v324_v5 = vld [vmem:[%s7192_s1 + $0x68] sm:$0xff] }
   0xd   : > { %4522 = vmatpush.msra.mxu3 %v326_v1  ;;  %489 = vmatpush.msra.mxu1 %v326_v1  ;;  %v4067_v6 = vld [vmem:[%s7192_s1 + $0xe0] sm:$0xff]  ;;  %v4066_v8 = vld [vmem:[%s7192_s1 + $0xd8] sm:$0xff]  ;;  %v4065_v10 = vld [vmem:[%s7192_s1 + $0xd0] sm:$0xff]  ;;  %s7301_s25 = smov (!%p269_p3, %s4047_s25), 1 }
   0xe   : > { %377 = vmatpush.msra.mxu0 %v4069_v2  ;;  %4507 = vmatpush.msra.mxu2 %v4069_v2  ;;  %v323_v7 = vld [vmem:[%s7192_s1 + $0x60] sm:$0xff]  ;;  %v322_v9 = vld [vmem:[%s7192_s1 + $0x58] sm:$0xff]  ;;  %v321_v11 = vld [vmem:[%s7192_s1 + $0x50] sm:$0xff]  ;;  %s4538_s11 = smul.u32 432, %s7301_s25  ;;  %s4505_s12 = sshll.u32 %s7301_s25, 8 }
   0xf   : > { %4523 = vmatpush.msra.mxu3 %v325_v3  ;;  %490 = vmatpush.msra.mxu1 %v325_v3  ;;  %v4064_v12 = vld [vmem:[%s7192_s1 + $0xc8] sm:$0xff]  ;;  %v4063_v14 = vld [vmem:[%s7192_s1 + $0xc0] sm:$0xff]  ;;  %v4062_v16 = vld [vmem:[%s7192_s1 + $0xb8] sm:$0xff]  ;;  %s6897_s15 = scalar_lea.vmem %s7198_s7, %s4505_s12 }
  0x10   : > { %378 = vmatpush.msra.mxu0 %v4068_v4  ;;  %4508 = vmatpush.msra.mxu2 %v4068_v4  ;;  %v320_v13 = vld [vmem:[%s7192_s1 + $0x48] sm:$0xff]  ;;  %v319_v15 = vld [vmem:[%s7192_s1 + $0x40] sm:$0xff]  ;;  %v318_v17 = vld [vmem:[%s7192_s1 + $0x38] sm:$0xff]  ;;  %s4744_s22 = scalar_lea.vmem %s7191_s0, %s4538_s11 }
  0x11   : > { %4524 = vmatpush.msra.mxu3 %v324_v5  ;;  %491 = vmatpush.msra.mxu1 %v324_v5  ;;  %v4061_v18 = vld [vmem:[%s7192_s1 + $0xb0] sm:$0xff]  ;;  %v4060_v20 = vld [vmem:[%s7192_s1 + $0xa8] sm:$0xff]  ;;  %v4059_v22 = vld [vmem:[%s7192_s1 + $0xa0] sm:$0xff] }
  0x12   : > { %379 = vmatpush.msra.mxu0 %v4067_v6  ;;  %4509 = vmatpush.msra.mxu2 %v4067_v6  ;;  %v317_v19 = vld [vmem:[%s7192_s1 + $0x30] sm:$0xff]  ;;  %v316_v21 = vld [vmem:[%s7192_s1 + $0x28] sm:$0xff]  ;;  %v315_v23 = vld [vmem:[%s7192_s1 + $0x20] sm:$0xff] }
  0x13   : > { %4525 = vmatpush.msra.mxu3 %v323_v7  ;;  %492 = vmatpush.msra.mxu1 %v323_v7  ;;  %v4058_v24 = vld [vmem:[%s7192_s1 + $0x98] sm:$0xff]  ;;  %v4057_v26 = vld [vmem:[%s7192_s1 + $0x90] sm:$0xff]  ;;  %v4056_v28 = vld [vmem:[%s7192_s1 + $0x88] sm:$0xff] }
  0x14   : > { %380 = vmatpush.msra.mxu0 %v4066_v8  ;;  %4510 = vmatpush.msra.mxu2 %v4066_v8  ;;  %v314_v25 = vld [vmem:[%s7192_s1 + $0x18] sm:$0xff]  ;;  %v313_v27 = vld [vmem:[%s7192_s1 + $0x10] sm:$0xff]  ;;  %v312_v29 = vld [vmem:[%s7192_s1 + $0x8] sm:$0xff] }
  0x15   : > { %4526 = vmatpush.msra.mxu3 %v322_v9  ;;  %493 = vmatpush.msra.mxu1 %v322_v9  ;;  %v4055_v30 = vld [vmem:[%s7192_s1 + $0x80] sm:$0xff]  ;;  %v4086_v35 = vld [vmem:[%s7192_s1 + $0x178] sm:$0xff]  ;;  %v4085_v38 = vld [vmem:[%s7192_s1 + $0x170] sm:$0xff] }
  0x16   : > { %381 = vmatpush.msra.mxu0 %v4065_v10  ;;  %4511 = vmatpush.msra.mxu2 %v4065_v10  ;;  %v311_v31 = vld [vmem:[%s7192_s1] sm:$0xff]  ;;  %v4134_v36 = vld [vmem:[%s7192_s1 + $0x1f8] sm:$0xff]  ;;  %v4133_v40 = vld [vmem:[%s7192_s1 + $0x1f0] sm:$0xff] }
  0x17   : > { %4527 = vmatpush.msra.mxu3 %v321_v11  ;;  %494 = vmatpush.msra.mxu1 %v321_v11  ;;  %v327_v32 = vld [vmem:[%s4744_s22 + $0x1] sm:$0xff]  ;;  %v4182_v37 = vld [vmem:[%s7192_s1 + $0x278] sm:$0xff]  ;;  %v4181_v41 = vld [vmem:[%s7192_s1 + $0x270] sm:$0xff] }
  0x18   : > { %382 = vmatpush.msra.mxu0 %v4064_v12  ;;  %4512 = vmatpush.msra.mxu2 %v4064_v12  ;;  %v4757_v33 = vld [vmem:[%s4744_s22 + $0xc1] sm:$0xff]  ;;  %v328_v45 = vld [vmem:[%s4744_s22 + $0x9] sm:$0xff]  ;;  %v4082_v50 = vld [vmem:[%s7192_s1 + $0x158] sm:$0xff] }
  0x19   : > { %4528 = vmatpush.msra.mxu3 %v320_v13  ;;  %495 = vmatpush.msra.mxu1 %v320_v13  ;;  %v4760_v34 = vld [vmem:[%s4744_s22 + $0xc0] sm:$0xff]  ;;  %v4084_v42 = vld [vmem:[%s7192_s1 + $0x168] sm:$0xff]  ;;  %v4130_v53 = vld [vmem:[%s7192_s1 + $0x1d8] sm:$0xff] }
  0x1a   : > { %383 = vmatpush.msra.mxu0 %v4063_v14  ;;  %4513 = vmatpush.msra.mxu2 %v4063_v14  ;;  %v279_v39 = vld [vmem:[%s4744_s22] sm:$0xff]  ;;  %v4132_v43 = vld [vmem:[%s7192_s1 + $0x1e8] sm:$0xff]  ;;  %v4081_v54 = vld [vmem:[%s7192_s1 + $0x150] sm:$0xff] }
  0x1b   : > { %4529 = vmatpush.msra.mxu3 %v319_v15  ;;  %496 = vmatpush.msra.mxu1 %v319_v15  ;;  %v4180_v44 = vld [vmem:[%s7192_s1 + $0x268] sm:$0xff]  ;;  %v4083_v46 = vld [vmem:[%s7192_s1 + $0x160] sm:$0xff]  ;;  %v4178_v55 = vld [vmem:[%s7192_s1 + $0x258] sm:$0xff] }
  0x1c   : > { %384 = vmatpush.msra.mxu0 %v4062_v16  ;;  %4514 = vmatpush.msra.mxu2 %v4062_v16  ;;  %v4797_v47 = vld [vmem:[%s4744_s22 + $0xc9] sm:$0xff]  ;;  %v4131_v49 = vld [vmem:[%s7192_s1 + $0x1e0] sm:$0xff]  ;;  %v4833_v59 = vld [vmem:[%s4744_s22 + $0xd8] sm:$0xff] }
  0x1d   : > { %4530 = vmatpush.msra.mxu3 %v318_v17  ;;  %497 = vmatpush.msra.mxu1 %v318_v17  ;;  %v4800_v48 = vld [vmem:[%s4744_s22 + $0xc8] sm:$0xff]  ;;  %v4179_v51 = vld [vmem:[%s7192_s1 + $0x260] sm:$0xff]  ;;  %v4129_v56 = vld [vmem:[%s7192_s1 + $0x1d0] sm:$0xff] }
  0x1e   : > { %385 = vmatpush.msra.mxu0 %v4061_v18  ;;  %4515 = vmatpush.msra.mxu2 %v4061_v18  ;;  %v280_v52 = vld [vmem:[%s4744_s22 + $0x8] sm:$0xff]  ;;  %v4827_v57 = vld [vmem:[%s4744_s22 + $0x19] sm:$0xff]  ;;  %v4177_v63 = vld [vmem:[%s7192_s1 + $0x250] sm:$0xff] }
  0x1f   : > { %4531 = vmatpush.msra.mxu3 %v317_v19  ;;  %498 = vmatpush.msra.mxu1 %v317_v19  ;;  %v4830_v58 = vld [vmem:[%s4744_s22 + $0xd9] sm:$0xff]  ;;  %v4080_v61 = vld [vmem:[%s7192_s1 + $0x148] sm:$0xff]  ;;  %v4877_v7 = vld [vmem:[%s4744_s22 + $0x31] sm:$0xff] }
  0x20   : > { %386 = vmatpush.msra.mxu0 %v4060_v20  ;;  %4516 = vmatpush.msra.mxu2 %v4060_v20  ;;  %v4839_v60 = vld [vmem:[%s4744_s22 + $0x18] sm:$0xff]  ;;  %v4128_v62 = vld [vmem:[%s7192_s1 + $0x1c8] sm:$0xff]  ;;  %v4858_v2 = vld [vmem:[%s4744_s22 + $0xe0] sm:$0xff] }
  0x21   : > { %4532 = vmatpush.msra.mxu3 %v316_v21  ;;  %499 = vmatpush.msra.mxu1 %v316_v21  ;;  %v4852_v0 = vld [vmem:[%s4744_s22 + $0x21] sm:$0xff]  ;;  %v347_v8 = vld [vmem:[%s4744_s22 + $0xf1] sm:$0xff]  ;;  %v4899_v14 = vld [vmem:[%s4744_s22 + $0x39] sm:$0xff] }
  0x22   : > { %387 = vmatpush.msra.mxu0 %v4059_v22  ;;  %4517 = vmatpush.msra.mxu2 %v4059_v22  ;;  %v4855_v1 = vld [vmem:[%s4744_s22 + $0xe1] sm:$0xff]  ;;  %v4881_v9 = vld [vmem:[%s4744_s22 + $0xf0] sm:$0xff]  ;;  %v4078_v11 = vld [vmem:[%s7192_s1 + $0x138] sm:$0xff] }
  0x23   : > { %4533 = vmatpush.msra.mxu3 %v315_v23  ;;  %500 = vmatpush.msra.mxu1 %v315_v23  ;;  %v4864_v3 = vld [vmem:[%s4744_s22 + $0x20] sm:$0xff]  ;;  %v4176_v6 = vld [vmem:[%s7192_s1 + $0x248] sm:$0xff]  ;;  %v4886_v10 = vld [vmem:[%s4744_s22 + $0x30] sm:$0xff] }
  0x24   : > { %388 = vmatpush.msra.mxu0 %v4058_v24  ;;  %4518 = vmatpush.msra.mxu2 %v4058_v24  ;;  %v4079_v4 = vld [vmem:[%s7192_s1 + $0x140] sm:$0xff]  ;;  %v4126_v12 = vld [vmem:[%s7192_s1 + $0x1b8] sm:$0xff]  ;;  %v4077_v18 = vld [vmem:[%s7192_s1 + $0x130] sm:$0xff] }
  0x25   : > { %4534 = vmatpush.msra.mxu3 %v314_v25  ;;  %501 = vmatpush.msra.mxu1 %v314_v25  ;;  %v4127_v5 = vld [vmem:[%s7192_s1 + $0x1c0] sm:$0xff]  ;;  %v300_v16 = vld [vmem:[%s4744_s22 + $0xf8] sm:$0xff]  ;;  %v4125_v19 = vld [vmem:[%s7192_s1 + $0x1b0] sm:$0xff] }
  0x26   : > { %389 = vmatpush.msra.mxu0 %v4057_v26  ;;  %4519 = vmatpush.msra.mxu2 %v4057_v26  ;;  %v4175_v13 = vld [vmem:[%s7192_s1 + $0x240] sm:$0xff]  ;;  %v4905_v17 = vld [vmem:[%s4744_s22 + $0x38] sm:$0xff]  ;;  %v4918_v21 = vld [vmem:[%s4744_s22 + $0x49] sm:$0xff] }
  0x27   : > { %4535 = vmatpush.msra.mxu3 %v313_v27  ;;  %502 = vmatpush.msra.mxu1 %v313_v27  ;;  %v348_v15 = vld [vmem:[%s4744_s22 + $0xf9] sm:$0xff]  ;;  %v349_v22 = vld [vmem:[%s4744_s22 + $0x109] sm:$0xff] }
  0x28   : > { %390 = vmatpush.msra.mxu0 %v4056_v28  ;;  %4520 = vmatpush.msra.mxu2 %v4056_v28  ;;  %v4174_v20 = vld [vmem:[%s7192_s1 + $0x238] sm:$0xff]  ;;  %v301_v23 = vld [vmem:[%s4744_s22 + $0x108] sm:$0xff]  ;;  %v4173_v27 = vld [vmem:[%s7192_s1 + $0x230] sm:$0xff] }
  0x29   : > { %4536 = vmatpush.msra.mxu3 %v312_v29  ;;  %503 = vmatpush.msra.mxu1 %v312_v29  ;;  %v4924_v24 = vld [vmem:[%s4744_s22 + $0x48] sm:$0xff]  ;;  %v4937_v28 = vld [vmem:[%s4744_s22 + $0x51] sm:$0xff] }
  0x2a   : > { %391 = vmatpush.msra.mxu0 %v4055_v30  ;;  %4521 = vmatpush.msra.mxu2 %v4055_v30  ;;  %v4076_v25 = vld [vmem:[%s7192_s1 + $0x128] sm:$0xff]  ;;  %v350_v29 = vld [vmem:[%s4744_s22 + $0x111] sm:$0xff] }
  0x2b   : > { %4537 = vmatpush.msra.mxu3 %v311_v31  ;;  %392 = vmatmul.f32.vlgmr.msra.gmra.mxu0 %v327_v32  ;;  %v4124_v26 = vld [vmem:[%s7192_s1 + $0x1a8] sm:$0xff]  ;;  %v302_v30 = vld [vmem:[%s4744_s22 + $0x110] sm:$0xff]  ;;  %v4075_v32 = vld [vmem:[%s7192_s1 + $0x120] sm:$0xff] }
  0x2c   : > { %440 = vmatmul.f32.vlgmr.msra.gmra.mxu2 %v4757_v33  ;;  %553 = vmatmul.f32.vlgmr.msra.gmra.mxu3 %v4760_v34 }
  0x2d   : > { %651 = vmatpush.msrb.mxu2 %v4086_v35  ;;  %846 = vmatpush.msrb.mxu3 %v4134_v36  ;;  %v4123_v35 = vld [vmem:[%s7192_s1 + $0x1a0] sm:$0xff]  ;;  %v4172_v36 = vld [vmem:[%s7192_s1 + $0x228] sm:$0xff] }
  0x2e   : > { %504 = vmatpush.msra.mxu1 %v311_v31  ;;  %1040 = vmatpush.msrb.mxu0 %v4182_v37  ;;  %v4943_v31 = vld [vmem:[%s4744_s22 + $0x50] sm:$0xff]  ;;  %v4956_v37 = vld [vmem:[%s4744_s22 + $0x61] sm:$0xff] }
  0x2f   : > { %652 = vmatpush.msrb.mxu2 %v4085_v38  ;;  %505 = vmatmul.f32.vlgmr.msra.gmra.mxu1 %v279_v39  ;;  %v351_v38 = vld [vmem:[%s4744_s22 + $0x121] sm:$0xff] }
  0x30   : > { %847 = vmatpush.msrb.mxu3 %v4133_v40  ;;  %1041 = vmatpush.msrb.mxu0 %v4181_v41  ;;  %v303_v39 = vld [vmem:[%s4744_s22 + $0x120] sm:$0xff]  ;;  %v4074_v41 = vld [vmem:[%s7192_s1 + $0x118] sm:$0xff] }
  0x31   : > { %653 = vmatpush.msrb.mxu2 %v4084_v42  ;;  %v4962_v40 = vld [vmem:[%s4744_s22 + $0x60] sm:$0xff]  ;;  %v4122_v42 = vld [vmem:[%s7192_s1 + $0x198] sm:$0xff] }
  0x32   : > { %848 = vmatpush.msrb.mxu3 %v4132_v43  ;;  %1042 = vmatpush.msrb.mxu0 %v4180_v44  ;;  %v4171_v43 = vld [vmem:[%s7192_s1 + $0x220] sm:$0xff]  ;;  %v4975_v44 = vld [vmem:[%s4744_s22 + $0x69] sm:$0xff] }
  0x33   : > { %395 = vmatmul.f32.gmra.mxu0 %v328_v45  ;;  %654 = vmatpush.msrb.mxu2 %v4083_v46  ;;  %v352_v45 = vld [vmem:[%s4744_s22 + $0x129] sm:$0xff] }
  0x34   : > { %443 = vmatmul.f32.gmra.mxu2 %v4797_v47  ;;  %556 = vmatmul.f32.gmra.mxu3 %v4800_v48  ;;  %v304_v46 = vld [vmem:[%s4744_s22 + $0x128] sm:$0xff] }
  0x35   : > { %849 = vmatpush.msrb.mxu3 %v4131_v49  ;;  %655 = vmatpush.msrb.mxu2 %v4082_v50  ;;  %v4981_v49 = vld [vmem:[%s4744_s22 + $0x68] sm:$0xff]  ;;  %v4073_v50 = vld [vmem:[%s7192_s1 + $0x110] sm:$0xff] }
  0x36   : > { %1043 = vmatpush.msrb.mxu0 %v4179_v51  ;;  %v4121_v51 = vld [vmem:[%s7192_s1 + $0x190] sm:$0xff] }
  0x37   : > { %508 = vmatmul.f32.gmra.mxu1 %v280_v52  ;;  %850 = vmatpush.msrb.mxu3 %v4130_v53  ;;  %v4170_v52 = vld [vmem:[%s7192_s1 + $0x218] sm:$0xff] }
  0x38   : > { %656 = vmatpush.msrb.mxu2 %v4081_v54  ;;  %1044 = vmatpush.msrb.mxu0 %v4178_v55  ;;  %v4230_v53 = vld [vmem:[%s7192_s1 + $0x2f8] sm:$0xff]  ;;  %v4229_v54 = vld [vmem:[%s7192_s1 + $0x2f0] sm:$0xff] }
  0x39   : > { %851 = vmatpush.msrb.mxu3 %v4129_v56  ;;  %1234 = vmatpush.msrb.mxu1 %v4230_v53  ;;  %v5000_v55 = vld [vmem:[%s4744_s22 + $0x79] sm:$0xff]  ;;  %v4217_v53 = vld [vmem:[%s7192_s1 + $0x290] sm:$0xff] }
  0x3a   : > { %657 = vmatpush.msrb.mxu2 %v4080_v61  ;;  %1045 = vmatpush.msrb.mxu0 %v4177_v63  ;;  %v353_v56 = vld [vmem:[%s4744_s22 + $0x139] sm:$0xff]  ;;  %v4072_v63 = vld [vmem:[%s7192_s1 + $0x108] sm:$0xff] }
  0x3b   : > { %398 = vmatmul.f32.gmra.mxu0 %v4827_v57  ;;  %852 = vmatpush.msrb.mxu3 %v4128_v62  ;;  %v305_v61 = vld [vmem:[%s4744_s22 + $0x138] sm:$0xff] }
  0x3c   : > { %446 = vmatmul.f32.gmra.mxu2 %v4830_v58  ;;  %559 = vmatmul.f32.gmra.mxu3 %v4833_v59  ;;  %v5006_v62 = vld [vmem:[%s4744_s22 + $0x78] sm:$0xff] }
  0x3d   : > { %658 = vmatpush.msrb.mxu2 %v4079_v4  ;;  %853 = vmatpush.msrb.mxu3 %v4127_v5  ;;  %v4228_v4 = vld [vmem:[%s7192_s1 + $0x2e8] sm:$0xff] }
  0x3e   : > { %1046 = vmatpush.msrb.mxu0 %v4176_v6  ;;  %1235 = vmatpush.msrb.mxu1 %v4229_v54  ;;  %v4120_v5 = vld [vmem:[%s7192_s1 + $0x188] sm:$0xff]  ;;  %v4169_v6 = vld [vmem:[%s7192_s1 + $0x210] sm:$0xff] }
  0x3f   : > { %511 = vmatmul.f32.gmra.mxu1 %v4839_v60  ;;  %659 = vmatpush.msrb.mxu2 %v4078_v11  ;;  %v4226_v11 = vld [vmem:[%s7192_s1 + $0x2d8] sm:$0xff]  ;;  %v5106_v54 = vld [vmem:[%s4744_s22 + $0xa9] sm:$0xff] }
  0x40   : > { %854 = vmatpush.msrb.mxu3 %v4126_v12  ;;  %1047 = vmatpush.msrb.mxu0 %v4175_v13  ;;  %v5028_v12 = vld [vmem:[%s4744_s22 + $0x81] sm:$0xff] }
  0x41   : > { %660 = vmatpush.msrb.mxu2 %v4077_v18  ;;  %1236 = vmatpush.msrb.mxu1 %v4228_v4  ;;  %v354_v13 = vld [vmem:[%s4744_s22 + $0x141] sm:$0xff] }
  0x42   : > { %855 = vmatpush.msrb.mxu3 %v4125_v19  ;;  %1048 = vmatpush.msrb.mxu0 %v4174_v20  ;;  %v5037_v18 = vld [vmem:[%s4744_s22 + $0x80] sm:$0xff]  ;;  %v4224_v20 = vld [vmem:[%s7192_s1 + $0x2c8] sm:$0xff] }
  0x43   : > { %401 = vmatmul.f32.gmra.mxu0 %v4852_v0  ;;  %661 = vmatpush.msrb.mxu2 %v4076_v25  ;;  %v4071_v19 = vld [vmem:[%s7192_s1 + $0x100] sm:$0xff]  ;;  %v5115_v4 = vld [vmem:[%s4744_s22 + $0xa8] sm:$0xff] }
  0x44   : > { %449 = vmatmul.f32.gmra.mxu2 %v4855_v1  ;;  %562 = vmatmul.f32.gmra.mxu3 %v4858_v2  ;;  %v4223_v25 = vld [vmem:[%s7192_s1 + $0x2c0] sm:$0xff] }
  0x45   : > { %856 = vmatpush.msrb.mxu3 %v4124_v26  ;;  %1049 = vmatpush.msrb.mxu0 %v4173_v27  ;;  %v5056_v26 = vld [vmem:[%s4744_s22 + $0x91] sm:$0xff]  ;;  %v4167_v27 = vld [vmem:[%s7192_s1 + $0x200] sm:$0xff] }
  0x46   : > { %662 = vmatpush.msrb.mxu2 %v4075_v32  ;;  %v4222_v32 = vld [vmem:[%s7192_s1 + $0x2b8] sm:$0xff] }
  0x47   : > { %514 = vmatmul.f32.gmra.mxu1 %v4864_v3  ;;  %857 = vmatpush.msrb.mxu3 %v4123_v35  ;;  %v5068_v35 = vld [vmem:[%s4744_s22 + $0x90] sm:$0xff] }
  0x48   : > { %1050 = vmatpush.msrb.mxu0 %v4172_v36  ;;  %663 = vmatpush.msrb.mxu2 %v4074_v41  ;;  %v4278_v36 = vld [vmem:[%s7192_s1 + $0x378] sm:$0xff]  ;;  %v4220_v41 = vld [vmem:[%s7192_s1 + $0x2a8] sm:$0xff] }
  0x49   : > { %858 = vmatpush.msrb.mxu3 %v4122_v42  ;;  %v5084_v42 = vld [vmem:[%s4744_s22 + $0x99] sm:$0xff] }
  0x4a   : > { %1051 = vmatpush.msrb.mxu0 %v4171_v43  ;;  %664 = vmatpush.msrb.mxu2 %v4073_v50  ;;  %v356_v43 = vld [vmem:[%s4744_s22 + $0x159] sm:$0xff] }
  0x4b   : > { %404 = vmatmul.f32.gmra.mxu0 %v4877_v7  ;;  %859 = vmatpush.msrb.mxu3 %v4121_v51  ;;  %v5093_v50 = vld [vmem:[%s4744_s22 + $0x98] sm:$0xff] }
  0x4c   : > { %452 = vmatmul.f32.gmra.mxu2 %v347_v8  ;;  %565 = vmatmul.f32.gmra.mxu3 %v4881_v9  ;;  %v4227_v8 = vld [vmem:[%s7192_s1 + $0x2e0] sm:$0xff]  ;;  %v4374_v51 = vld [vmem:[%s7192_s1 + $0x478] sm:$0xff] }
  0x4d   : > { %1052 = vmatpush.msrb.mxu0 %v4170_v52  ;;  %665 = vmatpush.msrb.mxu2 %v4072_v63  ;;  %v4218_v52 = vld [vmem:[%s7192_s1 + $0x298] sm:$0xff]  ;;  %v4216_v63 = vld [vmem:[%s7192_s1 + $0x288] sm:$0xff] }
  0x4e   : > { %860 = vmatpush.msrb.mxu3 %v4120_v5  ;;  %1237 = vmatpush.msrb.mxu1 %v4227_v8  ;;  %v4277_v5 = vld [vmem:[%s7192_s1 + $0x370] sm:$0xff]  ;;  %v4215_v8 = vld [vmem:[%s7192_s1 + $0x280] sm:$0xff] }
  0x4f   : > { %517 = vmatmul.f32.gmra.mxu1 %v4886_v10  ;;  %1053 = vmatpush.msrb.mxu0 %v4169_v6  ;;  %v4325_v6 = vld [vmem:[%s7192_s1 + $0x3f0] sm:$0xff] }
  0x50   : > { %1238 = vmatpush.msrb.mxu1 %v4226_v11  ;;  %666 = vmatpush.msrb.mxu2 %v4071_v19  ;;  %v5128_v11 = vld [vmem:[%s4744_s22 + $0xb1] sm:$0xff] }
  0x51   : > { %v4373_v19 = vld [vmem:[%s7192_s1 + $0x470] sm:$0xff] }
  0x52   : > { %1429 = vmatpush.msra.mxu2 %v4278_v36  ;;  %v603_v36 = vld [vmem:[%s4744_s22 + $0xa] sm:$0xff] }
  0x53   : > { %407 = vmatmul.f32.gmra.mxu0 %v4899_v14 }
  0x54   : > { %455 = vmatmul.f32.gmra.mxu2 %v348_v15  ;;  %568 = vmatmul.f32.gmra.mxu3 %v300_v16  ;;  %v306_v15 = vld [vmem:[%s4744_s22 + $0x140] sm:$0xff]  ;;  %v4225_v16 = vld [vmem:[%s7192_s1 + $0x2d0] sm:$0xff] }
  0x55   : > { %1239 = vmatpush.msrb.mxu1 %v4225_v16  ;;  %1430 = vmatpush.msra.mxu2 %v4277_v5  ;;  %v5134_v16 = vld [vmem:[%s4744_s22 + $0xb0] sm:$0xff]  ;;  %v4186_v5 = vld [vmem:[%s4744_s22 + $0x3a] sm:$0xff] }
  0x57   : > { %520 = vmatmul.f32.gmra.mxu1 %v4905_v17 }
  0x58   : > { %1240 = vmatpush.msrb.mxu1 %v4224_v20 }
  0x5a   : > { %1241 = vmatpush.msrb.mxu1 %v4223_v25  ;;  %v4183_v25 = vld [vmem:[%s4744_s22 + $0x1a] sm:$0xff] }
  0x5b   : > { %410 = vmatmul.f32.gmra.mxu0 %v4918_v21 }
  0x5c   : > { %458 = vmatmul.f32.gmra.mxu2 %v349_v22  ;;  %571 = vmatmul.f32.gmra.mxu3 %v301_v23  ;;  %v4119_v22 = vld [vmem:[%s7192_s1 + $0x180] sm:$0xff]  ;;  %v4168_v23 = vld [vmem:[%s7192_s1 + $0x208] sm:$0xff] }
  0x5d   : > { %861 = vmatpush.msrb.mxu3 %v4119_v22  ;;  %1054 = vmatpush.msrb.mxu0 %v4168_v23  ;;  %v602_v22 = vld [vmem:[%s4744_s22 + $0x2] sm:$0xff] }
  0x5e   : > { %1242 = vmatpush.msrb.mxu1 %v4222_v32 }
  0x5f   : > { %523 = vmatmul.f32.gmra.mxu1 %v4924_v24  ;;  %1055 = vmatpush.msrb.mxu0 %v4167_v27  ;;  %v4276_v27 = vld [vmem:[%s7192_s1 + $0x368] sm:$0xff] }
  0x60   : > { %1431 = vmatpush.msra.mxu2 %v4276_v27 }
  0x61   : > { %1817 = vmatpush.msra.mxu0 %v4374_v51 }
  0x63   : > { %413 = vmatmul.f32.gmra.mxu0 %v4937_v28 }
  0x64   : > { %461 = vmatmul.f32.gmra.mxu2 %v350_v29  ;;  %574 = vmatmul.f32.gmra.mxu3 %v302_v30  ;;  %v355_v29 = vld [vmem:[%s4744_s22 + $0x151] sm:$0xff] }
  0x65   : > { %v307_v30 = vld [vmem:[%s4744_s22 + $0x150] sm:$0xff]  ;;  %1818 = vmatpush.msra.mxu0 %v4373_v19 }
  0x67   : > { %526 = vmatmul.f32.gmra.mxu1 %v4943_v31 }
  0x6b   : > { %416 = vmatmul.f32.gmra.mxu0 %v4956_v37 }
  0x6c   : > { %464 = vmatmul.f32.gmra.mxu2 %v351_v38  ;;  %577 = vmatmul.f32.gmra.mxu3 %v303_v39  ;;  %v4221_v38 = vld [vmem:[%s7192_s1 + $0x2b0] sm:$0xff]  ;;  %v4326_v39 = vld [vmem:[%s7192_s1 + $0x3f8] sm:$0xff] }
  0x6d   : > { %1623 = vmatpush.msra.mxu3 %v4326_v39  ;;  %1243 = vmatpush.msrb.mxu1 %v4221_v38  ;;  %v4184_v39 = vld [vmem:[%s4744_s22 + $0x22] sm:$0xff] }
  0x6f   : > { %529 = vmatmul.f32.gmra.mxu1 %v4962_v40  ;;  %1624 = vmatpush.msra.mxu3 %v4325_v6  ;;  %v4371_v6 = vld [vmem:[%s7192_s1 + $0x460] sm:$0xff] }
  0x70   : > { %1244 = vmatpush.msrb.mxu1 %v4220_v41  ;;  %v4372_v41 = vld [vmem:[%s7192_s1 + $0x468] sm:$0xff] }
  0x71   : > { %1819 = vmatpush.msra.mxu0 %v4372_v41 }
  0x73   : > { %419 = vmatmul.f32.gmra.mxu0 %v4975_v44 }
  0x74   : > { %467 = vmatmul.f32.gmra.mxu2 %v352_v45  ;;  %580 = vmatmul.f32.gmra.mxu3 %v304_v46  ;;  %v308_v45 = vld [vmem:[%s4744_s22 + $0x158] sm:$0xff]  ;;  %v4219_v46 = vld [vmem:[%s7192_s1 + $0x2a0] sm:$0xff] }
  0x75   : > { %1245 = vmatpush.msrb.mxu1 %v4219_v46  ;;  %1820 = vmatpush.msra.mxu0 %v4371_v6  ;;  %v4369_v6 = vld [vmem:[%s7192_s1 + $0x450] sm:$0xff] }
  0x77   : > { %532 = vmatmul.f32.gmra.mxu1 %v4981_v49 }
  0x78   : > { %1246 = vmatpush.msrb.mxu1 %v4218_v52  ;;  %v4275_v52 = vld [vmem:[%s7192_s1 + $0x360] sm:$0xff] }
  0x79   : > { %1432 = vmatpush.msra.mxu2 %v4275_v52  ;;  %v4321_v52 = vld [vmem:[%s7192_s1 + $0x3d0] sm:$0xff] }
  0x7a   : > { %1247 = vmatpush.msrb.mxu1 %v4217_v53  ;;  %v4323_v53 = vld [vmem:[%s7192_s1 + $0x3e0] sm:$0xff] }
  0x7b   : > { %422 = vmatmul.f32.gmra.mxu0 %v5000_v55 }
  0x7c   : > { %470 = vmatmul.f32.gmra.mxu2 %v353_v56  ;;  %583 = vmatmul.f32.gmra.mxu3 %v305_v61  ;;  %v357_v56 = vld [vmem:[%s4744_s22 + $0x169] sm:$0xff] }
  0x7d   : > { %v309_v61 = vld [vmem:[%s4744_s22 + $0x168] sm:$0xff]  ;;  %1248 = vmatpush.msrb.mxu1 %v4216_v63 }
  0x7f   : > { %535 = vmatmul.f32.gmra.mxu1 %v5006_v62 }
  0x80   : > { %1249 = vmatpush.msrb.mxu1 %v4215_v8 }
  0x83   : > { %425 = vmatmul.f32.gmra.mxu0 %v5028_v12 }
  0x84   : > { %473 = vmatmul.f32.gmra.mxu2 %v354_v13  ;;  %586 = vmatmul.f32.gmra.mxu3 %v306_v15  ;;  %v358_v13 = vld [vmem:[%s4744_s22 + $0x171] sm:$0xff] }
  0x85   : > { %v310_v15 = vld [vmem:[%s4744_s22 + $0x170] sm:$0xff] }
  0x87   : > { %538 = vmatmul.f32.gmra.mxu1 %v5037_v18 }
  0x8b   : > { %428 = vmatmul.f32.gmra.mxu0 %v5056_v26 }
  0x8c   : > { %476 = vmatmul.f32.gmra.mxu2 %v355_v29  ;;  %589 = vmatmul.f32.gmra.mxu3 %v307_v30  ;;  %v4324_v29 = vld [vmem:[%s7192_s1 + $0x3e8] sm:$0xff] }
  0x8d   : > { %1625 = vmatpush.msra.mxu3 %v4324_v29 }
  0x8f   : > { %541 = vmatmul.f32.gmra.mxu1 %v5068_v35  ;;  %1626 = vmatpush.msra.mxu3 %v4323_v53 }
  0x93   : > { %431 = vmatmul.f32.gmra.mxu0 %v5084_v42 }
  0x94   : > { %479 = vmatmul.f32.gmra.mxu2 %v356_v43  ;;  %592 = vmatmul.f32.gmra.mxu3 %v308_v45 }
  0x97   : > { %544 = vmatmul.f32.gmra.mxu1 %v5093_v50 }
  0x9b   : > { %434 = vmatmul.f32.gmra.mxu0 %v5106_v54 }
  0x9c   : > { %482 = vmatmul.f32.gmra.mxu2 %v357_v56  ;;  %595 = vmatmul.f32.gmra.mxu3 %v309_v61 }
  0x9f   : > { %547 = vmatmul.f32.gmra.mxu1 %v5115_v4 }
  0xa3   : > { %437 = vmatmul.f32.gmra.mxu0 %v5128_v11 }
  0xa4   : > { %485 = vmatmul.f32.gmra.mxu2 %v358_v13  ;;  %598 = vmatmul.f32.gmra.mxu3 %v310_v15 }
  0xa7   : > { %550 = vmatmul.f32.gmra.mxu1 %v5134_v16 }
  0xa8   : > { %v5140_v20 = vpop.f32.mrf.mxu0 }
  0xab   : > { %1056 = vmatmul.f32.vlgmr.msrb.gmra.mxu0 %v4827_v57 }
  0xac   : > { %667 = vmatmul.f32.vlgmr.msrb.gmra.mxu2 %v602_v22  ;;  %862 = vmatmul.f32.vlgmr.msrb.gmra.mxu3 %v4839_v60  ;;  %v5145_v23 = vpop.f32.mrf.mxu1  ;;  %v4274_v22 = vld [vmem:[%s7192_s1 + $0x358] sm:$0xff] }
  0xad   : > { %1433 = vmatpush.msra.mxu2 %v4274_v22 }
  0xaf   : > { %v441_v30 = vpop.f32.mrf.mxu2  ;;  %v554_v32 = vpop.f32.mrf.mxu3  ;;  %1250 = vmatmul.f32.vlgmr.msrb.gmra.mxu1 %v4183_v25 }
  0xb0   : > { %v5154_v57 = vadd.f32 %v554_v32, %v441_v30  ;;  %v5156_v60 = vpop.f32.mrf.mxu0  ;;  %v4188_v32 = vld [vmem:[%s4744_s22 + $0x52] sm:$0xff] }
  0xb3   : > { %1059 = vmatmul.f32.gmra.mxu0 %v4852_v0 }
  0xb4   : > { %670 = vmatmul.f32.gmra.mxu2 %v603_v36  ;;  %865 = vmatmul.f32.gmra.mxu3 %v4864_v3  ;;  %v5161_v38 = vpop.f32.mrf.mxu1  ;;  %v4185_v3 = vld [vmem:[%s4744_s22 + $0x32] sm:$0xff] }
  0xb5   : > { %v4370_v36 = vld [vmem:[%s7192_s1 + $0x458] sm:$0xff] }
  0xb6   : > { %1821 = vmatpush.msra.mxu0 %v4370_v36 }
  0xb7   : > { %v444_v43 = vpop.f32.mrf.mxu2  ;;  %v557_v45 = vpop.f32.mrf.mxu3  ;;  %1253 = vmatmul.f32.gmra.mxu1 %v4184_v39 }
  0xb8   : > { %v5167_v46 = vadd.f32 %v557_v45, %v444_v43  ;;  %v5169_v51 = vpop.f32.mrf.mxu0  ;;  %1822 = vmatpush.msra.mxu0 %v4369_v6 }
  0xbb   : > { %1062 = vmatmul.f32.gmra.mxu0 %v4877_v7 }
  0xbc   : > { %673 = vmatmul.f32.gmra.mxu2 %v4183_v25  ;;  %868 = vmatmul.f32.gmra.mxu3 %v4886_v10  ;;  %v5173_v0 = vpop.f32.mrf.mxu1  ;;  %v4322_v25 = vld [vmem:[%s7192_s1 + $0x3d8] sm:$0xff] }
  0xbd   : > { %1627 = vmatpush.msra.mxu3 %v4322_v25  ;;  %v4272_v25 = vld [vmem:[%s7192_s1 + $0x348] sm:$0xff] }
  0xbf   : > { %v447_v56 = vpop.f32.mrf.mxu2  ;;  %v560_v61 = vpop.f32.mrf.mxu3  ;;  %1256 = vmatmul.f32.gmra.mxu1 %v4185_v3  ;;  %1628 = vmatpush.msra.mxu3 %v4321_v52 }
  0xc0   : > { %v5182_v7 = vadd.f32 %v560_v61, %v447_v56  ;;  %v5184_v10 = vpop.f32.mrf.mxu0 }
  0xc3   : > { %1065 = vmatmul.f32.gmra.mxu0 %v4899_v14 }
  0xc4   : > { %676 = vmatmul.f32.gmra.mxu2 %v4184_v39  ;;  %871 = vmatmul.f32.gmra.mxu3 %v4905_v17  ;;  %v5188_v63 = vpop.f32.mrf.mxu1  ;;  %v4187_v17 = vld [vmem:[%s4744_s22 + $0x4a] sm:$0xff] }
  0xc7   : > { %v450_v8 = vpop.f32.mrf.mxu2  ;;  %v563_v13 = vpop.f32.mrf.mxu3  ;;  %1259 = vmatmul.f32.gmra.mxu1 %v4186_v5 }
  0xc8   : > { %v5194_v15 = vadd.f32 %v563_v13, %v450_v8  ;;  %v5196_v19 = vpop.f32.mrf.mxu0 }
  0xcb   : > { %1068 = vmatmul.f32.gmra.mxu0 %v4918_v21 }
  0xcc   : > { %679 = vmatmul.f32.gmra.mxu2 %v4185_v3  ;;  %874 = vmatmul.f32.gmra.mxu3 %v4924_v24  ;;  %v5200_v14 = vpop.f32.mrf.mxu1  ;;  %v4273_v3 = vld [vmem:[%s7192_s1 + $0x350] sm:$0xff] }
  0xcd   : > { %1434 = vmatpush.msra.mxu2 %v4273_v3 }
  0xcf   : > { %v453_v27 = vpop.f32.mrf.mxu2  ;;  %v566_v29 = vpop.f32.mrf.mxu3  ;;  %1262 = vmatmul.f32.gmra.mxu1 %v4187_v17  ;;  %1435 = vmatpush.msra.mxu2 %v4272_v25  ;;  %v4367_v25 = vld [vmem:[%s7192_s1 + $0x440] sm:$0xff] }
  0xd0   : > { %v5209_v21 = vadd.f32 %v566_v29, %v453_v27  ;;  %v5211_v24 = vpop.f32.mrf.mxu0  ;;  %v4320_v27 = vld [vmem:[%s7192_s1 + $0x3c8] sm:$0xff] }
  0xd1   : > { %1629 = vmatpush.msra.mxu3 %v4320_v27 }
  0xd3   : > { %1071 = vmatmul.f32.gmra.mxu0 %v4937_v28 }
  0xd4   : > { %682 = vmatmul.f32.gmra.mxu2 %v4186_v5  ;;  %877 = vmatmul.f32.gmra.mxu3 %v4943_v31  ;;  %v5215_v30 = vpop.f32.mrf.mxu1  ;;  %v4189_v31 = vld [vmem:[%s4744_s22 + $0x62] sm:$0xff]  ;;  %v4190_v5 = vld [vmem:[%s4744_s22 + $0x6a] sm:$0xff] }
  0xd7   : > { %v456_v39 = vpop.f32.mrf.mxu2  ;;  %v569_v41 = vpop.f32.mrf.mxu3  ;;  %1265 = vmatmul.f32.gmra.mxu1 %v4188_v32 }
  0xd8   : > { %v5221_v43 = vadd.f32 %v569_v41, %v456_v39  ;;  %v5223_v45 = vpop.f32.mrf.mxu0  ;;  %v4192_v39 = vld [vmem:[%s4744_s22 + $0x82] sm:$0xff] }
  0xd9   : > { %v4368_v41 = vld [vmem:[%s7192_s1 + $0x448] sm:$0xff] }
  0xda   : > { %1823 = vmatpush.msra.mxu0 %v4368_v41  ;;  %v4270_v41 = vld [vmem:[%s7192_s1 + $0x338] sm:$0xff] }
  0xdb   : > { %1074 = vmatmul.f32.gmra.mxu0 %v4956_v37 }
  0xdc   : > { %685 = vmatmul.f32.gmra.mxu2 %v4187_v17  ;;  %880 = vmatmul.f32.gmra.mxu3 %v4962_v40  ;;  %v5227_v28 = vpop.f32.mrf.mxu1 }
  0xdd   : > { %1824 = vmatpush.msra.mxu0 %v4367_v25 }
  0xdf   : > { %v459_v53 = vpop.f32.mrf.mxu2  ;;  %v572_v56 = vpop.f32.mrf.mxu3  ;;  %1268 = vmatmul.f32.gmra.mxu1 %v4189_v31 }
  0xe0   : > { %v5236_v37 = vadd.f32 %v572_v56, %v459_v53  ;;  %v5238_v40 = vpop.f32.mrf.mxu0  ;;  %v4271_v56 = vld [vmem:[%s7192_s1 + $0x340] sm:$0xff] }
  0xe1   : > { %1436 = vmatpush.msra.mxu2 %v4271_v56 }
  0xe3   : > { %1077 = vmatmul.f32.gmra.mxu0 %v4975_v44  ;;  %1437 = vmatpush.msra.mxu2 %v4270_v41  ;;  %v5352_v41 = vld [vmem:[%s4744_s22 + $0xc2] sm:$0xff] }
  0xe4   : > { %688 = vmatmul.f32.gmra.mxu2 %v4188_v32  ;;  %883 = vmatmul.f32.gmra.mxu3 %v4981_v49  ;;  %v5242_v61 = vpop.f32.mrf.mxu1  ;;  %v4191_v49 = vld [vmem:[%s4744_s22 + $0x7a] sm:$0xff] }
  0xe7   : > { %v462_v8 = vpop.f32.mrf.mxu2  ;;  %v575_v13 = vpop.f32.mrf.mxu3  ;;  %1271 = vmatmul.f32.gmra.mxu1 %v4190_v5 }
  0xe8   : > { %v5248_v17 = vadd.f32 %v575_v13, %v462_v8  ;;  %v5250_v22 = vpop.f32.mrf.mxu0 }
  0xeb   : > { %1080 = vmatmul.f32.gmra.mxu0 %v5000_v55 }
  0xec   : > { %691 = vmatmul.f32.gmra.mxu2 %v4189_v31  ;;  %886 = vmatmul.f32.gmra.mxu3 %v5006_v62  ;;  %v5254_v44 = vpop.f32.mrf.mxu1 }
  0xef   : > { %v465_v29 = vpop.f32.mrf.mxu2  ;;  %v578_v32 = vpop.f32.mrf.mxu3  ;;  %1274 = vmatmul.f32.gmra.mxu1 %v4191_v49 }
  0xf0   : > { %v5263_v55 = vadd.f32 %v578_v32, %v465_v29  ;;  %v5265_v62 = vpop.f32.mrf.mxu0 }
  0xf3   : > { %1083 = vmatmul.f32.gmra.mxu0 %v5028_v12 }
  0xf4   : > { %694 = vmatmul.f32.gmra.mxu2 %v4190_v5  ;;  %889 = vmatmul.f32.gmra.mxu3 %v5037_v18  ;;  %v5269_v36 = vpop.f32.mrf.mxu1  ;;  %v4193_v18 = vld [vmem:[%s4744_s22 + $0x92] sm:$0xff]  ;;  %v4319_v5 = vld [vmem:[%s7192_s1 + $0x3c0] sm:$0xff] }
  0xf5   : > { %1630 = vmatpush.msra.mxu3 %v4319_v5  ;;  %v5333_v5 = vld [vmem:[%s4744_s22 + $0xb2] sm:$0xff] }
  0xf7   : > { %v468_v31 = vpop.f32.mrf.mxu2  ;;  %v581_v3 = vpop.f32.mrf.mxu3  ;;  %1277 = vmatmul.f32.gmra.mxu1 %v4192_v39 }
  0xf8   : > { %v5275_v52 = vadd.f32 %v581_v3, %v468_v31  ;;  %v5277_v53 = vpop.f32.mrf.mxu0  ;;  %v4318_v31 = vld [vmem:[%s7192_s1 + $0x3b8] sm:$0xff] }
  0xf9   : > { %1631 = vmatpush.msra.mxu3 %v4318_v31  ;;  %v4269_v31 = vld [vmem:[%s7192_s1 + $0x330] sm:$0xff] }
  0xfa   : > { %1438 = vmatpush.msra.mxu2 %v4269_v31  ;;  %v4365_v31 = vld [vmem:[%s7192_s1 + $0x430] sm:$0xff] }
  0xfb   : > { %1086 = vmatmul.f32.gmra.mxu0 %v5056_v26 }
  0xfc   : > { %697 = vmatmul.f32.gmra.mxu2 %v4191_v49  ;;  %892 = vmatmul.f32.gmra.mxu3 %v5068_v35  ;;  %v5281_v12 = vpop.f32.mrf.mxu1  ;;  %v5299_v49 = vld [vmem:[%s4744_s22 + $0x9a] sm:$0xff] }
  0xff   : > { %v471_v6 = vpop.f32.mrf.mxu2  ;;  %v584_v8 = vpop.f32.mrf.mxu3  ;;  %1280 = vmatmul.f32.gmra.mxu1 %v4193_v18 }
 0x100   : > { %v5290_v26 = vadd.f32 %v584_v8, %v471_v6  ;;  %v5292_v35 = vpop.f32.mrf.mxu0  ;;  %v4390_v6 = vld [vmem:[%s7195_s4 + $0xf8] sm:$0xff] }
 0x101   : > { %2239 = vmatpush.msra.mxu1 %v4390_v6  ;;  %v4366_v8 = vld [vmem:[%s7192_s1 + $0x438] sm:$0xff] }
 0x102   : > { %1825 = vmatpush.msra.mxu0 %v4366_v8 }
 0x103   : > { %1089 = vmatmul.f32.gmra.mxu0 %v5084_v42 }
 0x104   : > { %700 = vmatmul.f32.gmra.mxu2 %v4192_v39  ;;  %895 = vmatmul.f32.gmra.mxu3 %v5093_v50  ;;  %v5296_v13 = vpop.f32.mrf.mxu1  ;;  %v5314_v39 = vld [vmem:[%s4744_s22 + $0xaa] sm:$0xff] }
 0x105   : > { %1826 = vmatpush.msra.mxu0 %v4365_v31  ;;  %v507_v31 = vadd.f32 %v5145_v23, %v5140_v20 }
 0x107   : > { %v474_v27 = vpop.f32.mrf.mxu2  ;;  %v587_v29 = vpop.f32.mrf.mxu3  ;;  %1283 = vmatmul.f32.gmra.mxu1 %v5299_v49 }
 0x108   : > { %v5305_v32 = vadd.f32 %v587_v29, %v474_v27  ;;  %v5307_v42 = vpop.f32.mrf.mxu0 }
 0x10b   : > { %1092 = vmatmul.f32.gmra.mxu0 %v5106_v54 }
 0x10c   : > { %703 = vmatmul.f32.gmra.mxu2 %v4193_v18  ;;  %898 = vmatmul.f32.gmra.mxu3 %v5115_v4  ;;  %v5311_v50 = vpop.f32.mrf.mxu1 }
 0x10f   : > { %v477_v3 = vpop.f32.mrf.mxu2  ;;  %v590_v54 = vpop.f32.mrf.mxu3  ;;  %1286 = vmatmul.f32.gmra.mxu1 %v5314_v39 }
 0x110   : > { %v5323_v4 = vadd.f32 %v590_v54, %v477_v3  ;;  %v5325_v18 = vpop.f32.mrf.mxu0  ;;  %v4317_v3 = vld [vmem:[%s7192_s1 + $0x3b0] sm:$0xff] }
 0x111   : > { %1632 = vmatpush.msra.mxu3 %v4317_v3 }
 0x112   : > { %7202 = vst [vmem:[#allocation3_spill] sm:$0xff] %v5323_v4  ;;  %v4388_v4 = vld [vmem:[%s7195_s4 + $0xe8] sm:$0xff] }
 0x113   : > { %1095 = vmatmul.f32.gmra.mxu0 %v5128_v11 }
 0x114   : > { %706 = vmatmul.f32.gmra.mxu2 %v5299_v49  ;;  %901 = vmatmul.f32.gmra.mxu3 %v5134_v16  ;;  %v5330_v56 = vpop.f32.mrf.mxu1 }
 0x117   : > { %v480_v25 = vpop.f32.mrf.mxu2  ;;  %v593_v11 = vpop.f32.mrf.mxu3  ;;  %1289 = vmatmul.f32.gmra.mxu1 %v5333_v5 }
 0x118   : > { %v5342_v16 = vadd.f32 %v593_v11, %v480_v25  ;;  %v5344_v27 = vpop.f32.mrf.mxu0  ;;  %v5371_v25 = vld [vmem:[%s4744_s22 + $0xca] sm:$0xff] }
 0x119   : > { %v4389_v11 = vld [vmem:[%s7195_s4 + $0xf0] sm:$0xff] }
 0x11a   : > { %7203 = vst [vmem:[#allocation4_spill] sm:$0xff] %v5342_v16  ;;  %2240 = vmatpush.msra.mxu1 %v4389_v11  ;;  %v5386_v11 = vld [vmem:[%s4744_s22 + $0xda] sm:$0xff] }
 0x11b   : > { %1098 = vmatmul.f32.gmra.mxu0 %v4757_v33 }
 0x11c   : > { %709 = vmatmul.f32.gmra.mxu2 %v5314_v39  ;;  %904 = vmatmul.f32.gmra.mxu3 %v4760_v34  ;;  %v5349_v29 = vpop.f32.mrf.mxu1 }
 0x11d   : > { %2241 = vmatpush.msra.mxu1 %v4388_v4  ;;  %v4201_v4 = vld [vmem:[%s4744_s22 + $0xf2] sm:$0xff] }
 0x11f   : > { %v483_v54 = vpop.f32.mrf.mxu2  ;;  %v596_v33 = vpop.f32.mrf.mxu3  ;;  %1292 = vmatmul.f32.gmra.mxu1 %v5352_v41 }
 0x120   : > { %v5361_v34 = vadd.f32 %v596_v33, %v483_v54  ;;  %v5363_v6 = vpop.f32.mrf.mxu0 }
 0x122   : > { %7204 = vst [vmem:[#allocation5_spill] sm:$0xff] %v5361_v34  ;;  %v4268_v34 = vld [vmem:[%s7192_s1 + $0x328] sm:$0xff] }
 0x123   : > { %1101 = vmatmul.f32.gmra.mxu0 %v4797_v47  ;;  %1439 = vmatpush.msra.mxu2 %v4268_v34  ;;  %v5401_v34 = vld [vmem:[%s4744_s22 + $0xe2] sm:$0xff] }
 0x124   : > { %712 = vmatmul.f32.gmra.mxu2 %v5333_v5  ;;  %907 = vmatmul.f32.gmra.mxu3 %v4800_v48  ;;  %v5368_v8 = vpop.f32.mrf.mxu1 }
 0x127   : > { %v486_v3 = vpop.f32.mrf.mxu2  ;;  %v599_v47 = vpop.f32.mrf.mxu3  ;;  %1295 = vmatmul.f32.gmra.mxu1 %v5371_v25 }
 0x128   : > { %v5380_v48 = vadd.f32 %v599_v47, %v486_v3  ;;  %v1057_v54 = vpop.f32.mrf.mxu0 }
 0x12a   : > { %7205 = vst [vmem:[#allocation6_spill] sm:$0xff] %v5380_v48 }
 0x12b   : > { %1104 = vmatmul.f32.gmra.mxu0 %v4830_v58  ;;  %v4316_v58 = vld [vmem:[%s7192_s1 + $0x3a8] sm:$0xff] }
 0x12c   : > { %715 = vmatmul.f32.gmra.mxu2 %v5352_v41  ;;  %910 = vmatmul.f32.gmra.mxu3 %v4833_v59  ;;  %v1251_v33 = vpop.f32.mrf.mxu1 }
 0x12d   : > { %1633 = vmatpush.msra.mxu3 %v4316_v58 }
 0x12f   : > { %v668_v3 = vpop.f32.mrf.mxu2  ;;  %v863_v47 = vpop.f32.mrf.mxu3  ;;  %1298 = vmatmul.f32.gmra.mxu1 %v5386_v11 }
 0x130   : > { %v764_v59 = vadd.f32 %v668_v3, %v507_v31  ;;  %v1060_v48 = vpop.f32.mrf.mxu0  ;;  %v510_v31 = vadd.f32 %v5161_v38, %v5156_v60 }
 0x132   : > { %v959_v16 = vadd.f32 %v863_v47, %v764_v59  ;;  %v4153_v47 = vld [vmem:[%s4744_s22 + $0xf1] sm:$0xff] }
 0x133   : > { %1107 = vmatmul.f32.gmra.mxu0 %v4855_v1  ;;  %v4364_v1 = vld [vmem:[%s7192_s1 + $0x428] sm:$0xff] }
 0x134   : > { %718 = vmatmul.f32.gmra.mxu2 %v5371_v25  ;;  %913 = vmatmul.f32.gmra.mxu3 %v4858_v2  ;;  %v1153_v20 = vadd.f32 %v1057_v54, %v959_v16  ;;  %v1254_v23 = vpop.f32.mrf.mxu1 }
 0x135   : > { %1827 = vmatpush.msra.mxu0 %v4364_v1  ;;  %v4315_v1 = vld [vmem:[%s7192_s1 + $0x3a0] sm:$0xff] }
 0x136   : > { %v5408_v58 = vadd.f32 %v1251_v33, %v1153_v20  ;;  %v4267_v33 = vld [vmem:[%s7192_s1 + $0x320] sm:$0xff]  ;;  %v513_v20 = vadd.f32 %v5173_v0, %v5169_v51  ;;  %1634 = vmatpush.msra.mxu3 %v4315_v1 }
 0x137   : > { %v671_v2 = vpop.f32.mrf.mxu2  ;;  %v866_v16 = vpop.f32.mrf.mxu3  ;;  %1301 = vmatmul.f32.gmra.mxu1 %v5401_v34  ;;  %1440 = vmatpush.msra.mxu2 %v4267_v33  ;;  %v516_v33 = vadd.f32 %v5188_v63, %v5184_v10  ;;  %v4363_v1 = vld [vmem:[%s7192_s1 + $0x420] sm:$0xff] }
 0x138   : > { %v765_v54 = vadd.f32 %v671_v2, %v510_v31  ;;  %v1063_v3 = vpop.f32.mrf.mxu0  ;;  %1828 = vmatpush.msra.mxu0 %v4363_v1 }
 0x13a   : > { %v960_v59 = vadd.f32 %v866_v16, %v765_v54  ;;  %v4154_v54 = vld [vmem:[%s4744_s22 + $0xf9] sm:$0xff] }
 0x13b   : > { %1110 = vmatmul.f32.gmra.mxu0 %v4153_v47  ;;  %v4106_v47 = vld [vmem:[%s4744_s22 + $0xf8] sm:$0xff] }
 0x13c   : > { %721 = vmatmul.f32.gmra.mxu2 %v5386_v11  ;;  %916 = vmatmul.f32.gmra.mxu3 %v4881_v9  ;;  %v1154_v60 = vadd.f32 %v1060_v48, %v960_v59  ;;  %v1257_v38 = vpop.f32.mrf.mxu1 }
 0x13e   : > { %v5423_v31 = vadd.f32 %v1254_v23, %v1154_v60  ;;  %v4202_v23 = vld [vmem:[%s4744_s22 + $0xfa] sm:$0xff] }
 0x13f   : > { %v674_v9 = vpop.f32.mrf.mxu2  ;;  %v869_v2 = vpop.f32.mrf.mxu3  ;;  %1304 = vmatmul.f32.gmra.mxu1 %v4201_v4  ;;  %v4387_v60 = vld [vmem:[%s7195_s4 + $0xe0] sm:$0xff] }
 0x140   : > { %v766_v48 = vadd.f32 %v674_v9, %v513_v20  ;;  %v1066_v16 = vpop.f32.mrf.mxu0  ;;  %2242 = vmatpush.msra.mxu1 %v4387_v60  ;;  %v519_v60 = vadd.f32 %v5200_v14, %v5196_v19  ;;  %v4204_v14 = vld [vmem:[%s4744_s22 + $0x112] sm:$0xff] }
 0x142   : > { %v961_v59 = vadd.f32 %v869_v2, %v766_v48 }
 0x143   : > { %1113 = vmatmul.f32.gmra.mxu0 %v4154_v54  ;;  %v4155_v54 = vld [vmem:[%s4744_s22 + $0x109] sm:$0xff] }
 0x144   : > { %724 = vmatmul.f32.gmra.mxu2 %v5401_v34  ;;  %919 = vmatmul.f32.gmra.mxu3 %v4106_v47  ;;  %v1155_v51 = vadd.f32 %v1063_v3, %v961_v59  ;;  %v1260_v0 = vpop.f32.mrf.mxu1  ;;  %v4107_v47 = vld [vmem:[%s4744_s22 + $0x108] sm:$0xff] }
 0x146   : > { %v5437_v20 = vadd.f32 %v1257_v38, %v1155_v51  ;;  %v4203_v38 = vld [vmem:[%s4744_s22 + $0x10a] sm:$0xff]  ;;  %v4266_v51 = vld [vmem:[%s7192_s1 + $0x318] sm:$0xff] }
 0x147   : > { %v677_v9 = vpop.f32.mrf.mxu2  ;;  %v872_v2 = vpop.f32.mrf.mxu3  ;;  %1307 = vmatmul.f32.gmra.mxu1 %v4202_v23  ;;  %1441 = vmatpush.msra.mxu2 %v4266_v51 }
 0x148   : > { %v767_v3 = vadd.f32 %v677_v9, %v516_v33  ;;  %v1069_v48 = vpop.f32.mrf.mxu0 }
 0x14a   : > { %v962_v59 = vadd.f32 %v872_v2, %v767_v3  ;;  %v4156_v3 = vld [vmem:[%s4744_s22 + $0x111] sm:$0xff] }
 0x14b   : > { %1116 = vmatmul.f32.gmra.mxu0 %v4155_v54  ;;  %v4108_v54 = vld [vmem:[%s4744_s22 + $0x110] sm:$0xff] }
 0x14c   : > { %727 = vmatmul.f32.gmra.mxu2 %v4201_v4  ;;  %922 = vmatmul.f32.gmra.mxu3 %v4107_v47  ;;  %v1156_v10 = vadd.f32 %v1066_v16, %v962_v59  ;;  %v1263_v63 = vpop.f32.mrf.mxu1  ;;  %v4314_v4 = vld [vmem:[%s7192_s1 + $0x398] sm:$0xff]  ;;  %v522_v59 = vadd.f32 %v5215_v30, %v5211_v24  ;;  %v4205_v30 = vld [vmem:[%s4744_s22 + $0x122] sm:$0xff] }
 0x14d   : > { %1635 = vmatpush.msra.mxu3 %v4314_v4 }
 0x14e   : > { %v5450_v33 = vadd.f32 %v1260_v0, %v1156_v10  ;;  %v4386_v0 = vld [vmem:[%s7195_s4 + $0xd8] sm:$0xff] }
 0x14f   : > { %v680_v1 = vpop.f32.mrf.mxu2  ;;  %v875_v9 = vpop.f32.mrf.mxu3  ;;  %1310 = vmatmul.f32.gmra.mxu1 %v4203_v38 }
 0x150   : > { %v768_v16 = vadd.f32 %v680_v1, %v519_v60  ;;  %v1072_v2 = vpop.f32.mrf.mxu0  ;;  %2243 = vmatpush.msra.mxu1 %v4386_v0 }
 0x152   : > { %v963_v47 = vadd.f32 %v875_v9, %v768_v16  ;;  %v4157_v9 = vld [vmem:[%s4744_s22 + $0x121] sm:$0xff] }
 0x153   : > { %1119 = vmatmul.f32.gmra.mxu0 %v4156_v3  ;;  %v4109_v16 = vld [vmem:[%s4744_s22 + $0x120] sm:$0xff] }
 0x154   : > { %730 = vmatmul.f32.gmra.mxu2 %v4202_v23  ;;  %925 = vmatmul.f32.gmra.mxu3 %v4108_v54  ;;  %v1157_v19 = vadd.f32 %v1069_v48, %v963_v47  ;;  %v1266_v51 = vpop.f32.mrf.mxu1  ;;  %v4362_v23 = vld [vmem:[%s7192_s1 + $0x418] sm:$0xff]  ;;  %v525_v54 = vadd.f32 %v5227_v28, %v5223_v45  ;;  %v4206_v28 = vld [vmem:[%s4744_s22 + $0x12a] sm:$0xff] }
 0x155   : > { %1829 = vmatpush.msra.mxu0 %v4362_v23  ;;  %v4158_v23 = vld [vmem:[%s4744_s22 + $0x129] sm:$0xff] }
 0x156   : > { %v5463_v10 = vadd.f32 %v1263_v63, %v1157_v19  ;;  %v4265_v63 = vld [vmem:[%s7192_s1 + $0x310] sm:$0xff] }
 0x157   : > { %v683_v60 = vpop.f32.mrf.mxu2  ;;  %v878_v4 = vpop.f32.mrf.mxu3  ;;  %1313 = vmatmul.f32.gmra.mxu1 %v4204_v14  ;;  %1442 = vmatpush.msra.mxu2 %v4265_v63  ;;  %v4313_v19 = vld [vmem:[%s7192_s1 + $0x390] sm:$0xff] }
 0x158   : > { %v769_v48 = vadd.f32 %v683_v60, %v522_v59  ;;  %v1075_v1 = vpop.f32.mrf.mxu0  ;;  %1636 = vmatpush.msra.mxu3 %v4313_v19  ;;  %v4110_v60 = vld [vmem:[%s4744_s22 + $0x128] sm:$0xff]  ;;  %v4111_v19 = vld [vmem:[%s4744_s22 + $0x138] sm:$0xff] }
 0x15a   : > { %v964_v3 = vadd.f32 %v878_v4, %v769_v48 }
 0x15b   : > { %1122 = vmatmul.f32.gmra.mxu0 %v4157_v9  ;;  %v528_v9 = vadd.f32 %v5242_v61, %v5238_v40  ;;  %v4207_v61 = vld [vmem:[%s4744_s22 + $0x13a] sm:$0xff] }
 0x15c   : > { %733 = vmatmul.f32.gmra.mxu2 %v4203_v38  ;;  %928 = vmatmul.f32.gmra.mxu3 %v4109_v16  ;;  %v1158_v24 = vadd.f32 %v1072_v2, %v964_v3  ;;  %v1269_v4 = vpop.f32.mrf.mxu1  ;;  %v4361_v3 = vld [vmem:[%s7192_s1 + $0x410] sm:$0xff] }
 0x15d   : > { %1830 = vmatpush.msra.mxu0 %v4361_v3 }
 0x15e   : > { %v5476_v47 = vadd.f32 %v1266_v51, %v1158_v24  ;;  %v4385_v51 = vld [vmem:[%s7195_s4 + $0xd0] sm:$0xff] }
 0x15f   : > { %v686_v38 = vpop.f32.mrf.mxu2  ;;  %v881_v0 = vpop.f32.mrf.mxu3  ;;  %1316 = vmatmul.f32.gmra.mxu1 %v4205_v30 }
 0x160   : > { %v770_v2 = vadd.f32 %v686_v38, %v525_v54  ;;  %v1078_v59 = vpop.f32.mrf.mxu0  ;;  %2244 = vmatpush.msra.mxu1 %v4385_v51  ;;  %v4159_v54 = vld [vmem:[%s4744_s22 + $0x139] sm:$0xff]  ;;  %v4160_v51 = vld [vmem:[%s4744_s22 + $0x141] sm:$0xff] }
 0x162   : > { %v965_v48 = vadd.f32 %v881_v0, %v770_v2  ;;  %v4264_v2 = vld [vmem:[%s7192_s1 + $0x308] sm:$0xff] }
 0x163   : > { %1125 = vmatmul.f32.gmra.mxu0 %v4158_v23  ;;  %1443 = vmatpush.msra.mxu2 %v4264_v2  ;;  %v531_v23 = vadd.f32 %v5254_v44, %v5250_v22  ;;  %v4208_v44 = vld [vmem:[%s4744_s22 + $0x142] sm:$0xff] }
 0x164   : > { %736 = vmatmul.f32.gmra.mxu2 %v4204_v14  ;;  %931 = vmatmul.f32.gmra.mxu3 %v4110_v60  ;;  %v1159_v45 = vadd.f32 %v1075_v1, %v965_v48  ;;  %v1272_v0 = vpop.f32.mrf.mxu1 }
 0x166   : > { %v5489_v16 = vadd.f32 %v1269_v4, %v1159_v45  ;;  %v4312_v4 = vld [vmem:[%s7192_s1 + $0x388] sm:$0xff] }
 0x167   : > { %v689_v14 = vpop.f32.mrf.mxu2  ;;  %v884_v24 = vpop.f32.mrf.mxu3  ;;  %1319 = vmatmul.f32.gmra.mxu1 %v4206_v28  ;;  %1637 = vmatpush.msra.mxu3 %v4312_v4  ;;  %v4311_v4 = vld [vmem:[%s7192_s1 + $0x380] sm:$0xff] }
 0x168   : > { %v771_v1 = vadd.f32 %v689_v14, %v528_v9  ;;  %v1081_v63 = vpop.f32.mrf.mxu0  ;;  %v4112_v9 = vld [vmem:[%s4744_s22 + $0x140] sm:$0xff]  ;;  %v4384_v14 = vld [vmem:[%s7195_s4 + $0xc8] sm:$0xff] }
 0x169   : > { %2245 = vmatpush.msra.mxu1 %v4384_v14  ;;  %1638 = vmatpush.msra.mxu3 %v4311_v4  ;;  %v540_v14 = vadd.f32 %v5296_v13, %v5292_v35  ;;  %v4211_v13 = vld [vmem:[%s4744_s22 + $0x16a] sm:$0xff] }
 0x16a   : > { %v966_v38 = vadd.f32 %v884_v24, %v771_v1  ;;  %v534_v24 = vadd.f32 %v5269_v36, %v5265_v62  ;;  %v4360_v1 = vld [vmem:[%s7192_s1 + $0x408] sm:$0xff]  ;;  %v4209_v62 = vld [vmem:[%s4744_s22 + $0x152] sm:$0xff]  ;;  %v4263_v36 = vld [vmem:[%s7192_s1 + $0x300] sm:$0xff] }
 0x16b   : > { %1128 = vmatmul.f32.gmra.mxu0 %v4159_v54  ;;  %1444 = vmatpush.msra.mxu2 %v4263_v36 }
 0x16c   : > { %739 = vmatmul.f32.gmra.mxu2 %v4205_v30  ;;  %934 = vmatmul.f32.gmra.mxu3 %v4111_v19  ;;  %v1160_v40 = vadd.f32 %v1078_v59, %v966_v38  ;;  %v4161_v38 = vld [vmem:[%s4744_s22 + $0x151] sm:$0xff] }
 0x16d   : > { %1831 = vmatpush.msra.mxu0 %v4360_v1 }
 0x16e   : > { %v5502_v60 = vadd.f32 %v1272_v0, %v1160_v40  ;;  %v4113_v0 = vld [vmem:[%s4744_s22 + $0x150] sm:$0xff] }
 0x16f   : > { %v692_v30 = vpop.f32.mrf.mxu2  ;;  %v887_v48 = vpop.f32.mrf.mxu3  ;;  %1322 = vmatmul.f32.gmra.mxu1 %v4207_v61 }
 0x170   : > { %v772_v59 = vadd.f32 %v692_v30, %v531_v23  ;;  %v1084_v45 = vpop.f32.mrf.mxu0  ;;  %v537_v23 = vadd.f32 %v5281_v12, %v5277_v53  ;;  %v4210_v53 = vld [vmem:[%s4744_s22 + $0x15a] sm:$0xff] }
 0x171   : > { %v4383_v12 = vld [vmem:[%s7195_s4 + $0xc0] sm:$0xff] }
 0x172   : > { %v967_v3 = vadd.f32 %v887_v48, %v772_v59  ;;  %2246 = vmatpush.msra.mxu1 %v4383_v12 }
 0x173   : > { %1131 = vmatmul.f32.gmra.mxu0 %v4160_v51  ;;  %v4114_v51 = vld [vmem:[%s4744_s22 + $0x158] sm:$0xff] }
 0x174   : > { %742 = vmatmul.f32.gmra.mxu2 %v4206_v28  ;;  %937 = vmatmul.f32.gmra.mxu3 %v4112_v9  ;;  %v5509_v22 = vadd.f32 %v1081_v63, %v967_v3 }
 0x177   : > { %v695_v54 = vpop.f32.mrf.mxu2  ;;  %v890_v19 = vpop.f32.mrf.mxu3  ;;  %1325 = vmatmul.f32.gmra.mxu1 %v4208_v44 }
 0x178   : > { %v773_v28 = vadd.f32 %v695_v54, %v534_v24  ;;  %v1087_v63 = vpop.f32.mrf.mxu0  ;;  %v4359_v24 = vld [vmem:[%s7192_s1 + $0x400] sm:$0xff] }
 0x179   : > { %1832 = vmatpush.msra.mxu0 %v4359_v24 }
 0x17a   : > { %v968_v40 = vadd.f32 %v890_v19, %v773_v28  ;;  %v4163_v28 = vld [vmem:[%s4744_s22 + $0x169] sm:$0xff] }
 0x17b   : > { %1134 = vmatmul.f32.gmra.mxu0 %v4161_v38 }
 0x17c   : > { %745 = vmatmul.f32.gmra.mxu2 %v4207_v61  ;;  %940 = vmatmul.f32.gmra.mxu3 %v4113_v0  ;;  %v5522_v2 = vadd.f32 %v1084_v45, %v968_v40  ;;  %v4162_v45 = vld [vmem:[%s4744_s22 + $0x159] sm:$0xff]  ;;  %v543_v0 = vadd.f32 %v5311_v50, %v5307_v42  ;;  %v546_v50 = vadd.f32 %v5330_v56, %v5325_v18 }
 0x17d   : > { %v4382_v42 = vld [vmem:[%s7195_s4 + $0xb8] sm:$0xff]  ;;  %v549_v18 = vadd.f32 %v5349_v29, %v5344_v27  ;;  %v4381_v27 = vld [vmem:[%s7195_s4 + $0xb0] sm:$0xff]  ;;  %v552_v29 = vadd.f32 %v5368_v8, %v5363_v6 }
 0x17e   : > { %2247 = vmatpush.msra.mxu1 %v4382_v42 }
 0x17f   : > { %v698_v30 = vpop.f32.mrf.mxu2  ;;  %v893_v48 = vpop.f32.mrf.mxu3  ;;  %1328 = vmatmul.f32.gmra.mxu1 %v4209_v62 }
 0x180   : > { %v774_v61 = vadd.f32 %v698_v30, %v537_v23  ;;  %v1090_v59 = vpop.f32.mrf.mxu0  ;;  %v4164_v30 = vld [vmem:[%s4744_s22 + $0x171] sm:$0xff]  ;;  %2248 = vmatpush.msra.mxu1 %v4381_v27 }
 0x182   : > { %v969_v9 = vadd.f32 %v893_v48, %v774_v61  ;;  %v4116_v48 = vld [vmem:[%s4744_s22 + $0x170] sm:$0xff] }
 0x183   : > { %1137 = vmatmul.f32.gmra.mxu0 %v4162_v45 }
 0x184   : > { %748 = vmatmul.f32.gmra.mxu2 %v4208_v44  ;;  %943 = vmatmul.f32.gmra.mxu3 %v4114_v51  ;;  %v5535_v3 = vadd.f32 %v1087_v63, %v969_v9  ;;  %v4115_v63 = vld [vmem:[%s4744_s22 + $0x168] sm:$0xff] }
 0x187   : > { %v701_v1 = vpop.f32.mrf.mxu2  ;;  %v896_v54 = vpop.f32.mrf.mxu3  ;;  %1331 = vmatmul.f32.gmra.mxu1 %v4210_v53 }
 0x188   : > { %v775_v44 = vadd.f32 %v701_v1, %v540_v14  ;;  %v1093_v19 = vpop.f32.mrf.mxu0  ;;  %v4117_v14 = vld [vmem:[%s4744_s22 + $0x180] sm:$0xff] }
 0x18a   : > { %v970_v38 = vadd.f32 %v896_v54, %v775_v44  ;;  %v4213_v54 = vld [vmem:[%s4744_s22 + $0x182] sm:$0xff] }
 0x18b   : > { %1140 = vmatmul.f32.gmra.mxu0 %v4163_v28 }
 0x18c   : > { %751 = vmatmul.f32.gmra.mxu2 %v4209_v62  ;;  %946 = vmatmul.f32.gmra.mxu3 %v4115_v63  ;;  %v5548_v35 = vadd.f32 %v1090_v59, %v970_v38  ;;  %v4212_v59 = vld [vmem:[%s4744_s22 + $0x172] sm:$0xff]  ;;  %v4166_v63 = vld [vmem:[%s4744_s22 + $0x189] sm:$0xff] }
 0x18d   : > { %v4118_v38 = vld [vmem:[%s4744_s22 + $0x188] sm:$0xff] }
 0x18f   : > { %v704_v40 = vpop.f32.mrf.mxu2  ;;  %v899_v36 = vpop.f32.mrf.mxu3  ;;  %1334 = vmatmul.f32.gmra.mxu1 %v4211_v13 }
 0x190   : > { %v776_v23 = vadd.f32 %v704_v40, %v543_v0  ;;  %v1096_v4 = vpop.f32.mrf.mxu0  ;;  %v4214_v40 = vld [vmem:[%s4744_s22 + $0x18a] sm:$0xff] }
 0x192   : > { %v971_v61 = vadd.f32 %v899_v36, %v776_v23 }
 0x193   : > { %1143 = vmatmul.f32.gmra.mxu0 %v4164_v30 }
 0x194   : > { %754 = vmatmul.f32.gmra.mxu2 %v4210_v53  ;;  %949 = vmatmul.f32.gmra.mxu3 %v4116_v48  ;;  %v5555_v62 = vadd.f32 %v1093_v19, %v971_v61  ;;  %v4165_v53 = vld [vmem:[%s4744_s22 + $0x181] sm:$0xff]  ;;  %v4327_v48 = vld [vmem:[%s4744_s22 + $0x32] sm:$0xff] }
 0x195   : > { %v4231_v61 = vld [vmem:[%s4744_s22 + $0x30] sm:$0xff] }
 0x197   : > { %v707_v45 = vpop.f32.mrf.mxu2  ;;  %v902_v51 = vpop.f32.mrf.mxu3  ;;  %1337 = vmatmul.f32.gmra.mxu1 %v4212_v59 }
 0x198   : > { %v777_v9 = vadd.f32 %v707_v45, %v546_v50  ;;  %v1099_v12 = vpop.f32.mrf.mxu0 }
 0x19a   : > { %v972_v24 = vadd.f32 %v902_v51, %v777_v9  ;;  %v4328_v9 = vld [vmem:[%s4744_s22 + $0x3a] sm:$0xff] }
 0x19b   : > { %1146 = vmatmul.f32.gmra.mxu0 %v4165_v53  ;;  %v4280_v53 = vld [vmem:[%s4744_s22 + $0x39] sm:$0xff] }
 0x19c   : > { %757 = vmatmul.f32.gmra.mxu2 %v4211_v13  ;;  %952 = vmatmul.f32.gmra.mxu3 %v4117_v14  ;;  %v5565_v1 = vadd.f32 %v1096_v4, %v972_v24 }
 0x19f   : > { %v710_v56 = vpop.f32.mrf.mxu2  ;;  %v905_v44 = vpop.f32.mrf.mxu3  ;;  %1340 = vmatmul.f32.gmra.mxu1 %v4213_v54  ;;  %v4380_v54 = vld [vmem:[%s7195_s4 + $0xa8] sm:$0xff] }
 0x1a0   : > { %v778_v19 = vadd.f32 %v710_v56, %v549_v18  ;;  %v1102_v28 = vpop.f32.mrf.mxu0  ;;  %2249 = vmatpush.msra.mxu1 %v4380_v54  ;;  %v5594_v56 = vpop.f32.mrf.mxu1 }
 0x1a2   : > { %v973_v0 = vadd.f32 %v905_v44, %v778_v19 }
 0x1a3   : > { %1149 = vmatmul.f32.gmra.mxu0 %v4166_v63  ;;  %v4233_v63 = vld [vmem:[%s4744_s22 + $0x48] sm:$0xff] }
 0x1a4   : > { %760 = vmatmul.f32.gmra.mxu2 %v4212_v59  ;;  %955 = vmatmul.f32.gmra.mxu3 %v4118_v38  ;;  %v5572_v13 = vadd.f32 %v1099_v12, %v973_v0  ;;  %v4279_v59 = vld [vmem:[%s4744_s22 + $0x31] sm:$0xff]  ;;  %v4281_v38 = vld [vmem:[%s4744_s22 + $0x49] sm:$0xff] }
 0x1a5   : > { %v4232_v12 = vld [vmem:[%s4744_s22 + $0x38] sm:$0xff] }
 0x1a7   : > { %v713_v36 = vpop.f32.mrf.mxu2  ;;  %v908_v23 = vpop.f32.mrf.mxu3  ;;  %1343 = vmatmul.f32.gmra.mxu1 %v4214_v40 }
 0x1a8   : > { %v779_v4 = vadd.f32 %v713_v36, %v552_v29  ;;  %v1105_v30 = vpop.f32.mrf.mxu0 }
 0x1aa   : > { %v974_v42 = vadd.f32 %v908_v23, %v779_v4  ;;  %v4330_v4 = vld [vmem:[%s4744_s22 + $0x52] sm:$0xff] }
 0x1ab   : > { %1833 = vmatmul.f32.vlgmr.msra.gmra.mxu0 %v4327_v48  ;;  %v5606_v48 = vpop.f32.mrf.mxu1 }
 0x1ac   : > { %1445 = vmatmul.f32.vlgmr.msra.gmra.mxu2 %v4231_v61  ;;  %1639 = vmatmul.f32.vlgmr.msra.gmra.mxu3 %v4279_v59  ;;  %v5583_v50 = vadd.f32 %v1102_v28, %v974_v42  ;;  %v4329_v28 = vld [vmem:[%s4744_s22 + $0x4a] sm:$0xff]  ;;  %v4379_v42 = vld [vmem:[%s7195_s4 + $0xa0] sm:$0xff] }
 0x1ad   : > { %2250 = vmatpush.msra.mxu1 %v4379_v42 }
 0x1af   : > { %v716_v45 = vpop.f32.mrf.mxu2  ;;  %v911_v51 = vpop.f32.mrf.mxu3 }
 0x1b0   : > { %v780_v6 = vadd.f32 %v716_v45, %v5154_v57  ;;  %v1108_v8 = vpop.f32.mrf.mxu0 }
 0x1b2   : > { %v975_v14 = vadd.f32 %v911_v51, %v780_v6 }
 0x1b3   : > { %1836 = vmatmul.f32.gmra.mxu0 %v4328_v9  ;;  %v4235_v9 = vld [vmem:[%s4744_s22 + $0x60] sm:$0xff] }
 0x1b4   : > { %1448 = vmatmul.f32.gmra.mxu2 %v4232_v12  ;;  %1642 = vmatmul.f32.gmra.mxu3 %v4280_v53  ;;  %v5589_v24 = vadd.f32 %v1105_v30, %v975_v14  ;;  %v4282_v30 = vld [vmem:[%s4744_s22 + $0x51] sm:$0xff]  ;;  %v4283_v12 = vld [vmem:[%s4744_s22 + $0x61] sm:$0xff]  ;;  %v5617_v14 = vpop.f32.mrf.mxu1 }
 0x1b7   : > { %v719_v18 = vpop.f32.mrf.mxu2  ;;  %v914_v57 = vpop.f32.mrf.mxu3 }
 0x1b8   : > { %v781_v44 = vadd.f32 %v719_v18, %v5167_v46  ;;  %v1111_v19 = vpop.f32.mrf.mxu0  ;;  %v4234_v46 = vld [vmem:[%s4744_s22 + $0x50] sm:$0xff] }
 0x1ba   : > { %v976_v0 = vadd.f32 %v914_v57, %v781_v44 }
 0x1bb   : > { %1839 = vmatmul.f32.gmra.mxu0 %v4329_v28  ;;  %v4236_v28 = vld [vmem:[%s4744_s22 + $0x68] sm:$0xff] }
 0x1bc   : > { %1451 = vmatmul.f32.gmra.mxu2 %v4233_v63  ;;  %1645 = vmatmul.f32.gmra.mxu3 %v4281_v38  ;;  %v5600_v40 = vadd.f32 %v1108_v8, %v976_v0  ;;  %v4331_v8 = vld [vmem:[%s4744_s22 + $0x62] sm:$0xff] }
 0x1bd   : > { %v4284_v63 = vld [vmem:[%s4744_s22 + $0x69] sm:$0xff] }
 0x1bf   : > { %v722_v27 = vpop.f32.mrf.mxu2  ;;  %v917_v29 = vpop.f32.mrf.mxu3 }
 0x1c0   : > { %v782_v36 = vadd.f32 %v722_v27, %v5182_v7  ;;  %v1114_v23 = vpop.f32.mrf.mxu0  ;;  %v4378_v27 = vld [vmem:[%s7195_s4 + $0x98] sm:$0xff] }
 0x1c1   : > { %2251 = vmatpush.msra.mxu1 %v4378_v27  ;;  %v4287_v27 = vld [vmem:[%s4744_s22 + $0x91] sm:$0xff] }
 0x1c2   : > { %v977_v61 = vadd.f32 %v917_v29, %v782_v36  ;;  %v5630_v29 = vpop.f32.mrf.mxu1 }
 0x1c3   : > { %1842 = vmatmul.f32.gmra.mxu0 %v4330_v4 }
 0x1c4   : > { %1454 = vmatmul.f32.gmra.mxu2 %v4234_v46  ;;  %1648 = vmatmul.f32.gmra.mxu3 %v4282_v30  ;;  %v5608_v59 = vadd.f32 %v1111_v19, %v977_v61  ;;  %v4333_v46 = vld [vmem:[%s4744_s22 + $0x7a] sm:$0xff] }
 0x1c5   : > { %v4237_v30 = vld [vmem:[%s4744_s22 + $0x78] sm:$0xff] }
 0x1c6   : > { %v4285_v61 = vld [vmem:[%s4744_s22 + $0x79] sm:$0xff] }
 0x1c7   : > { %v725_v7 = vpop.f32.mrf.mxu2  ;;  %v920_v45 = vpop.f32.mrf.mxu3 }
 0x1c8   : > { %v783_v51 = vadd.f32 %v725_v7, %v5194_v15  ;;  %v1117_v6 = vpop.f32.mrf.mxu0  ;;  %v4332_v15 = vld [vmem:[%s4744_s22 + $0x6a] sm:$0xff] }
 0x1ca   : > { %v978_v53 = vadd.f32 %v920_v45, %v783_v51 }
 0x1cb   : > { %1845 = vmatmul.f32.gmra.mxu0 %v4331_v8 }
 0x1cc   : > { %1457 = vmatmul.f32.gmra.mxu2 %v4235_v9  ;;  %1651 = vmatmul.f32.gmra.mxu3 %v4283_v12  ;;  %v5619_v54 = vadd.f32 %v1114_v23, %v978_v53  ;;  %v4334_v9 = vld [vmem:[%s4744_s22 + $0x82] sm:$0xff] }
 0x1cd   : > { %v4238_v12 = vld [vmem:[%s4744_s22 + $0x80] sm:$0xff] }
 0x1ce   : > { %v4286_v53 = vld [vmem:[%s4744_s22 + $0x81] sm:$0xff] }
 0x1cf   : > { %v728_v18 = vpop.f32.mrf.mxu2  ;;  %v923_v57 = vpop.f32.mrf.mxu3 }
 0x1d0   : > { %v784_v44 = vadd.f32 %v728_v18, %v5209_v21  ;;  %v1120_v19 = vpop.f32.mrf.mxu0 }
 0x1d2   : > { %v979_v38 = vadd.f32 %v923_v57, %v784_v44  ;;  %v4377_v44 = vld [vmem:[%s7195_s4 + $0x90] sm:$0xff] }
 0x1d3   : > { %1848 = vmatmul.f32.gmra.mxu0 %v4332_v15  ;;  %2252 = vmatpush.msra.mxu1 %v4377_v44 }
 0x1d4   : > { %1460 = vmatmul.f32.gmra.mxu2 %v4236_v28  ;;  %1654 = vmatmul.f32.gmra.mxu3 %v4284_v63  ;;  %v5625_v0 = vadd.f32 %v1117_v6, %v979_v38  ;;  %v5638_v6 = vpop.f32.mrf.mxu1  ;;  %v4335_v63 = vld [vmem:[%s4744_s22 + $0x92] sm:$0xff] }
 0x1d5   : > { %v4239_v38 = vld [vmem:[%s4744_s22 + $0x90] sm:$0xff] }
 0x1d7   : > { %v731_v21 = vpop.f32.mrf.mxu2  ;;  %v926_v36 = vpop.f32.mrf.mxu3 }
 0x1d8   : > { %v785_v23 = vadd.f32 %v731_v21, %v5221_v43  ;;  %v1123_v4 = vpop.f32.mrf.mxu0 }
 0x1da   : > { %v980_v42 = vadd.f32 %v926_v36, %v785_v23 }
 0x1db   : > { %1851 = vmatmul.f32.gmra.mxu0 %v4333_v46 }
 0x1dc   : > { %1463 = vmatmul.f32.gmra.mxu2 %v4237_v30  ;;  %1657 = vmatmul.f32.gmra.mxu3 %v4285_v61  ;;  %v5636_v7 = vadd.f32 %v1120_v19, %v980_v42  ;;  %v5653_v21 = vpop.f32.mrf.mxu1  ;;  %v4288_v42 = vld [vmem:[%s4744_s22 + $0x99] sm:$0xff] }
 0x1df   : > { %v734_v45 = vpop.f32.mrf.mxu2  ;;  %v929_v51 = vpop.f32.mrf.mxu3 }
 0x1e0   : > { %v786_v8 = vadd.f32 %v734_v45, %v5236_v37  ;;  %v1126_v43 = vpop.f32.mrf.mxu0 }
 0x1e2   : > { %v981_v18 = vadd.f32 %v929_v51, %v786_v8 }
 0x1e3   : > { %1854 = vmatmul.f32.gmra.mxu0 %v4334_v9 }
 0x1e4   : > { %1466 = vmatmul.f32.gmra.mxu2 %v4238_v12  ;;  %1660 = vmatmul.f32.gmra.mxu3 %v4286_v53  ;;  %v5644_v57 = vadd.f32 %v1123_v4, %v981_v18  ;;  %v5661_v51 = vpop.f32.mrf.mxu1  ;;  %v4241_v18 = vld [vmem:[%s4744_s22 + $0xa8] sm:$0xff] }
 0x1e7   : > { %v737_v19 = vpop.f32.mrf.mxu2  ;;  %v932_v37 = vpop.f32.mrf.mxu3 }
 0x1e8   : > { %v787_v15 = vadd.f32 %v737_v19, %v5248_v17  ;;  %v1129_v28 = vpop.f32.mrf.mxu0  ;;  %v4240_v17 = vld [vmem:[%s4744_s22 + $0x98] sm:$0xff] }
 0x1ea   : > { %v982_v36 = vadd.f32 %v932_v37, %v787_v15 }
 0x1eb   : > { %1857 = vmatmul.f32.gmra.mxu0 %v4335_v63 }
 0x1ec   : > { %1469 = vmatmul.f32.gmra.mxu2 %v4239_v38  ;;  %1663 = vmatmul.f32.gmra.mxu3 %v4287_v27  ;;  %v5655_v23 = vadd.f32 %v1126_v43, %v982_v36  ;;  %v4376_v43 = vld [vmem:[%s7195_s4 + $0x88] sm:$0xff]  ;;  %v5674_v37 = vpop.f32.mrf.mxu1  ;;  %v4242_v27 = vld [vmem:[%s4744_s22 + $0xb0] sm:$0xff] }
 0x1ed   : > { %2253 = vmatpush.msra.mxu1 %v4376_v43  ;;  %v4290_v36 = vld [vmem:[%s4744_s22 + $0xb1] sm:$0xff] }
 0x1ef   : > { %v740_v4 = vpop.f32.mrf.mxu2  ;;  %v935_v46 = vpop.f32.mrf.mxu3 }
 0x1f0   : > { %v788_v30 = vadd.f32 %v740_v4, %v5263_v55  ;;  %v1132_v61 = vpop.f32.mrf.mxu0  ;;  %v4375_v4 = vld [vmem:[%s7195_s4 + $0x80] sm:$0xff] }
 0x1f1   : > { %2254 = vmatpush.msra.mxu1 %v4375_v4 }
 0x1f2   : > { %v983_v45 = vadd.f32 %v935_v46, %v788_v30  ;;  %v4598_v46 = vmov 0.0  }
 0x1f3   : > { %1860 = vmatmul.f32.gmra.mxu0 %v5299_v49  ;;  %v4289_v49 = vld [vmem:[%s4744_s22 + $0xa9] sm:$0xff]  ;;  %2066 = vst [vmem:[#allocation2] sm:$0xff] %v4598_v46 }
 0x1f4   : > { %1472 = vmatmul.f32.gmra.mxu2 %v4240_v17  ;;  %1666 = vmatmul.f32.gmra.mxu3 %v4288_v42  ;;  %v5663_v8 = vadd.f32 %v1129_v28, %v983_v45  ;;  %2067 = vst [vmem:[#allocation2 + $0x8] sm:$0xff] %v4598_v46  ;;  %v5689_v30 = vpop.f32.mrf.mxu1  ;;  %v4243_v42 = vld [vmem:[%s4744_s22 + $0xc0] sm:$0xff] }
 0x1f5   : > { %2068 = vst [vmem:[#allocation2 + $0x10] sm:$0x3] %v4598_v46  ;;  %v4291_v45 = vld [vmem:[%s4744_s22 + $0xc1] sm:$0xff] }
 0x1f6   : > { %2070 = vst [vmem:[#allocation2 + $0x198] sm:$0xff] %v4598_v46 }
 0x1f7   : > { %v743_v55 = vpop.f32.mrf.mxu2  ;;  %v938_v9 = vpop.f32.mrf.mxu3  ;;  %2071 = vst [vmem:[#allocation2 + $0x1a0] sm:$0xff] %v4598_v46 }
 0x1f8   : > { %v789_v12 = vadd.f32 %v743_v55, %v5275_v52  ;;  %v1135_v53 = vpop.f32.mrf.mxu0  ;;  %2072 = vst [vmem:[#allocation2 + $0x1a8] sm:$0x3] %v4598_v46  ;;  %v2189_v55 = vld [vmem:[%s7195_s4 + $0x78] sm:$0xff] }
 0x1f9   : > { %2073 = vst [vmem:[#allocation2] sm:$0x1] %v4598_v46  ;;  %2352 = vmatpush.msrb.mxu2 %v2189_v55  ;;  %v4422_v55 = vld [vmem:[%s7195_s4 + $0x1f8] sm:$0xff] }
 0x1fa   : > { %v984_v44 = vadd.f32 %v938_v9, %v789_v12  ;;  %v4406_v9 = vld [vmem:[%s7195_s4 + $0x178] sm:$0xff]  ;;  %2074 = vst [vmem:[#allocation2 + $0x18] sm:$0x1] %v4598_v46  ;;  %2708 = vmatpush.msrb.mxu0 %v4422_v55 }
 0x1fb   : > { %1863 = vmatmul.f32.gmra.mxu0 %v5314_v39  ;;  %v2190_v12 = vld [vmem:[#allocation2 + $0x1] sm:$0xff]  ;;  %2075 = vst [vmem:[#allocation2 + $0x30] sm:$0x1] %v4598_v46  ;;  %2514 = vmatpush.msrb.mxu3 %v4406_v9  ;;  %v4552_v55 = vld [vmem:[%s4744_s22 + $0xf2] sm:$0xff] }
 0x1fc   : > { %1475 = vmatmul.f32.gmra.mxu2 %v4241_v18  ;;  %1669 = vmatmul.f32.gmra.mxu3 %v4289_v49  ;;  %v5672_v19 = vadd.f32 %v1132_v61, %v984_v44  ;;  %2076 = vst [vmem:[#allocation2 + $0x48] sm:$0x1] %v4598_v46  ;;  %v7206_v18 = vld [vmem:[#allocation3_spill] sm:$0xff] }
 0x1fd   : > { %2255 = vmatmul.f32.vlgmr.msra.gmra.mxu1 %v2190_v12  ;;  %2077 = vst [vmem:[#allocation2 + $0x60] sm:$0x1] %v4598_v46 }
 0x1fe   : > { %2078 = vst [vmem:[#allocation2 + $0x78] sm:$0x1] %v4598_v46 }
 0x1ff   : > { %v746_v15 = vpop.f32.mrf.mxu2  ;;  %v941_v28 = vpop.f32.mrf.mxu3  ;;  %2079 = vst [vmem:[#allocation2 + $0x90] sm:$0x1] %v4598_v46 }
 0x200   : > { %v790_v63 = vadd.f32 %v746_v15, %v5290_v26  ;;  %v1138_v38 = vpop.f32.mrf.mxu0  ;;  %v4244_v15 = vld [vmem:[%s4744_s22 + $0xc8] sm:$0xff]  ;;  %2080 = vst [vmem:[#allocation2 + $0xa8] sm:$0x1] %v4598_v46 }
 0x201   : > { %2081 = vst [vmem:[#allocation2 + $0xc0] sm:$0x1] %v4598_v46 }
 0x202   : > { %v985_v52 = vadd.f32 %v941_v28, %v790_v63  ;;  %v4292_v28 = vld [vmem:[%s4744_s22 + $0xc9] sm:$0xff]  ;;  %v5716_v63 = vpop.f32.mrf.mxu1  ;;  %2082 = vst [vmem:[#allocation2 + $0xd8] sm:$0x1] %v4598_v46 }
 0x203   : > { %1866 = vmatmul.f32.gmra.mxu0 %v5333_v5  ;;  %2083 = vst [vmem:[#allocation2 + $0xf0] sm:$0x1] %v4598_v46 }
 0x204   : > { %1478 = vmatmul.f32.gmra.mxu2 %v4242_v27  ;;  %1672 = vmatmul.f32.gmra.mxu3 %v4290_v36  ;;  %v5680_v39 = vadd.f32 %v1135_v53, %v985_v52  ;;  %v2191_v27 = vld [vmem:[#allocation2 + $0x9] sm:$0xff]  ;;  %2084 = vst [vmem:[#allocation2 + $0x108] sm:$0x1] %v4598_v46 }
 0x205   : > { %2258 = vmatmul.f32.gmra.mxu1 %v2191_v27  ;;  %2085 = vst [vmem:[#allocation2 + $0x120] sm:$0x1] %v4598_v46  ;;  %v4405_v27 = vld [vmem:[%s7195_s4 + $0x170] sm:$0xff] }
 0x206   : > { %2086 = vst [vmem:[#allocation2 + $0x138] sm:$0x1] %v4598_v46  ;;  %2515 = vmatpush.msrb.mxu3 %v4405_v27 }
 0x207   : > { %v749_v26 = vpop.f32.mrf.mxu2  ;;  %v944_v5 = vpop.f32.mrf.mxu3  ;;  %2087 = vst [vmem:[#allocation2 + $0x150] sm:$0x1] %v4598_v46 }
 0x208   : > { %v791_v61 = vadd.f32 %v749_v26, %v5305_v32  ;;  %v1141_v17 = vpop.f32.mrf.mxu0  ;;  %2088 = vst [vmem:[#allocation2 + $0x168] sm:$0x1] %v4598_v46 }
 0x209   : > { %2089 = vst [vmem:[#allocation2 + $0x180] sm:$0x1] %v4598_v46 }
 0x20a   : > { %v986_v43 = vadd.f32 %v944_v5, %v791_v61  ;;  %v4245_v61 = vld [vmem:[%s4744_s22 + $0xd8] sm:$0xff]  ;;  %2092 = vst [vmem:[#allocation2 + $0x29] sm:$0x1] %v4598_v46 }
 0x20b   : > { %1869 = vmatmul.f32.gmra.mxu0 %v5352_v41  ;;  %2093 = vst [vmem:[#allocation2 + $0x41] sm:$0x1] %v4598_v46 }
 0x20c   : > { %1481 = vmatmul.f32.gmra.mxu2 %v4243_v42  ;;  %1675 = vmatmul.f32.gmra.mxu3 %v4291_v45  ;;  %v5705_v32 = vadd.f32 %v1138_v38, %v986_v43  ;;  %v4293_v42 = vld [vmem:[%s4744_s22 + $0xd9] sm:$0xff]  ;;  %v5735_v45 = vpop.f32.mrf.mxu1  ;;  %2094 = vst [vmem:[#allocation2 + $0x59] sm:$0x1] %v4598_v46 }
 0x20d   : > { %2095 = vst [vmem:[#allocation2 + $0x71] sm:$0x1] %v4598_v46 }
 0x20e   : > { %2096 = vst [vmem:[#allocation2 + $0x89] sm:$0x1] %v4598_v46 }
 0x20f   : > { %v752_v53 = vpop.f32.mrf.mxu2  ;;  %v947_v41 = vpop.f32.mrf.mxu3  ;;  %2097 = vst [vmem:[#allocation2 + $0xa1] sm:$0x1] %v4598_v46 }
 0x210   : > { %v792_v49 = vadd.f32 %v752_v53, %v7206_v18  ;;  %v1144_v44 = vpop.f32.mrf.mxu0  ;;  %v7208_v53 = vld [vmem:[#allocation5_spill] sm:$0xff]  ;;  %2098 = vst [vmem:[#allocation2 + $0xb9] sm:$0x1] %v4598_v46 }
 0x211   : > { %2099 = vst [vmem:[#allocation2 + $0xd1] sm:$0x1] %v4598_v46 }
 0x212   : > { %v987_v38 = vadd.f32 %v947_v41, %v792_v49  ;;  %v4246_v49 = vld [vmem:[%s4744_s22 + $0xe0] sm:$0xff]  ;;  %2100 = vst [vmem:[#allocation2 + $0xe9] sm:$0x1] %v4598_v46 }
 0x213   : > { %1872 = vmatmul.f32.gmra.mxu0 %v5371_v25  ;;  %v7207_v25 = vld [vmem:[#allocation4_spill] sm:$0xff]  ;;  %2101 = vst [vmem:[#allocation2 + $0x101] sm:$0x1] %v4598_v46 }
 0x214   : > { %1484 = vmatmul.f32.gmra.mxu2 %v4244_v15  ;;  %1678 = vmatmul.f32.gmra.mxu3 %v4292_v28  ;;  %v5721_v36 = vadd.f32 %v1141_v17, %v987_v38  ;;  %v2188_v38 = vld [vmem:[%s7195_s4 + $0x70] sm:$0xff]  ;;  %2102 = vst [vmem:[#allocation2 + $0x119] sm:$0x1] %v4598_v46 }
 0x215   : > { %2353 = vmatpush.msrb.mxu2 %v2188_v38  ;;  %2103 = vst [vmem:[#allocation2 + $0x131] sm:$0x1] %v4598_v46  ;;  %v4296_v38 = vld [vmem:[%s4744_s22 + $0xf9] sm:$0xff] }
 0x216   : > { %2104 = vst [vmem:[#allocation2 + $0x149] sm:$0x1] %v4598_v46 }
 0x217   : > { %v755_v52 = vpop.f32.mrf.mxu2  ;;  %v950_v4 = vpop.f32.mrf.mxu3  ;;  %2105 = vst [vmem:[#allocation2 + $0x161] sm:$0x1] %v4598_v46 }
 0x218   : > { %v793_v26 = vadd.f32 %v755_v52, %v7207_v25  ;;  %v1147_v5 = vpop.f32.mrf.mxu0  ;;  %v7209_v25 = vld [vmem:[#allocation6_spill] sm:$0xff]  ;;  %2106 = vst [vmem:[#allocation2 + $0x179] sm:$0x1] %v4598_v46 }
 0x219   : > { %2107 = vst [vmem:[#allocation2 + $0x191] sm:$0x1] %v4598_v46 }
 0x21a   : > { %v988_v17 = vadd.f32 %v950_v4, %v793_v26  ;;  %2090 = vst [vmem:[#allocation2 + $0x198] sm:$0x1] %v4598_v46 }
 0x21b   : > { %1875 = vmatmul.f32.gmra.mxu0 %v5386_v11  ;;  %v4438_v11 = vld [vmem:[%s7195_s4 + $0x278] sm:$0xff]  ;;  %2091 = vst [vmem:[#allocation2 + $0x11] sm:$0x1] %v4598_v46 }
 0x21c   : > { %1487 = vmatmul.f32.gmra.mxu2 %v4245_v61  ;;  %1681 = vmatmul.f32.gmra.mxu3 %v4293_v42  ;;  %v5737_v43 = vadd.f32 %v1144_v44, %v988_v17  ;;  %v4294_v44 = vld [vmem:[%s4744_s22 + $0xe1] sm:$0xff]  ;;  %v4247_v61 = vld [vmem:[%s4744_s22 + $0xf0] sm:$0xff]  ;;  %2108 = vst [vmem:[#allocation2 + $0x1a9] sm:$0x1] %v4598_v46 }
 0x21d   : > { %2902 = vmatpush.msrb.mxu1 %v4438_v11  ;;  %v4295_v42 = vld [vmem:[%s4744_s22 + $0xf1] sm:$0xff] }
 0x21f   : > { %v758_v9 = vpop.f32.mrf.mxu2  ;;  %v953_v12 = vpop.f32.mrf.mxu3 }
 0x220   : > { %v794_v41 = vadd.f32 %v758_v9, %v7208_v53  ;;  %v1150_v18 = vpop.f32.mrf.mxu0  ;;  %v4421_v9 = vld [vmem:[%s7195_s4 + $0x1f0] sm:$0xff] }
 0x221   : > { %2709 = vmatpush.msrb.mxu0 %v4421_v9 }
 0x222   : > { %v989_v15 = vadd.f32 %v953_v12, %v794_v41  ;;  %v4437_v12 = vld [vmem:[%s7195_s4 + $0x270] sm:$0xff] }
 0x223   : > { %1878 = vmatmul.f32.gmra.mxu0 %v5401_v34  ;;  %v5767_v34 = vpop.f32.mrf.mxu1  ;;  %2903 = vmatpush.msrb.mxu1 %v4437_v12  ;;  %v4345_v12 = vld [vmem:[%s4744_s22 + $0x10a] sm:$0xff] }
 0x224   : > { %1490 = vmatmul.f32.gmra.mxu2 %v4246_v49  ;;  %1684 = vmatmul.f32.gmra.mxu3 %v4294_v44  ;;  %v5757_v28 = vadd.f32 %v1147_v5, %v989_v15  ;;  %v4248_v15 = vld [vmem:[%s4744_s22 + $0xf8] sm:$0xff] }
 0x227   : > { %v761_v52 = vpop.f32.mrf.mxu2  ;;  %v956_v4 = vpop.f32.mrf.mxu3 }
 0x228   : > { %v795_v26 = vadd.f32 %v761_v52, %v7209_v25  ;;  %v1834_v5 = vpop.f32.mrf.mxu0  ;;  %v5797_v52 = vld [vmem:[%s7193_s2] ss:$0 sm:$0xff] }
 0x229   : > { %v5803_v25 = vld [vmem:[%s7194_s3] ss:$0 sm:$0xff] }
 0x22a   : > { %v990_v17 = vadd.f32 %v956_v4, %v795_v26  ;;  %v4553_v4 = vld [vmem:[%s4744_s22 + $0xfa] sm:$0xff]  ;;  %v4404_v26 = vld [vmem:[%s7195_s4 + $0x168] sm:$0xff] }
 0x22b   : > { %1881 = vmatmul.f32.gmra.mxu0 %v4552_v55  ;;  %v5789_v49 = vpop.f32.mrf.mxu1  ;;  %2516 = vmatpush.msrb.mxu3 %v4404_v26 }
 0x22c   : > { %1493 = vmatmul.f32.gmra.mxu2 %v4247_v61  ;;  %1687 = vmatmul.f32.gmra.mxu3 %v4295_v42  ;;  %v5779_v11 = vadd.f32 %v1150_v18, %v990_v17 }
 0x22f   : > { %v1446_v53 = vpop.f32.mrf.mxu2  ;;  %v1640_v41 = vpop.f32.mrf.mxu3 }
 0x230   : > { %v1542_v18 = vadd.f32 %v1446_v53, %v5408_v58  ;;  %v1837_v44 = vpop.f32.mrf.mxu0  ;;  %v2187_v58 = vld [vmem:[%s7195_s4 + $0x68] sm:$0xff] }
 0x231   : > { %2354 = vmatpush.msrb.mxu2 %v2187_v58  ;;  %v4249_v53 = vld [vmem:[%s4744_s22 + $0x108] sm:$0xff] }
 0x232   : > { %v1736_v27 = vadd.f32 %v1640_v41, %v1542_v18  ;;  %v4297_v41 = vld [vmem:[%s4744_s22 + $0x109] sm:$0xff] }
 0x233   : > { %1884 = vmatmul.f32.gmra.mxu0 %v4553_v4  ;;  %v5817_v18 = vpop.f32.mrf.mxu1  ;;  %v4436_v4 = vld [vmem:[%s7195_s4 + $0x268] sm:$0xff] }
 0x234   : > { %v1930_v46 = vadd.f32 %v1834_v5, %v1736_v27  ;;  %1496 = vmatmul.f32.gmra.mxu2 %v4248_v15  ;;  %1690 = vmatmul.f32.gmra.mxu3 %v4296_v38 }
 0x235   : > { %2904 = vmatpush.msrb.mxu1 %v4436_v4 }
 0x236   : > { %v1966_v5 = vmul.f32 %v5797_v52, %v1930_v46 }
 0x237   : > { %v1449_v61 = vpop.f32.mrf.mxu2  ;;  %v1643_v42 = vpop.f32.mrf.mxu3 }
 0x238   : > { %v2002_v17 = vadd.f32 %v5803_v25, %v1966_v5  ;;  %v1543_v55 = vadd.f32 %v1449_v61, %v5423_v31  ;;  %v1840_v9 = vpop.f32.mrf.mxu0  ;;  %v4420_v31 = vld [vmem:[%s7195_s4 + $0x1e8] sm:$0xff] }
 0x239   : > { %2710 = vmatpush.msrb.mxu0 %v4420_v31 }
 0x23a   : > { %v2034_v15 = vmax.f32 %v2002_v17, 0.0  ;;  %v1737_v38 = vadd.f32 %v1643_v42, %v1543_v55  ;;  %v4346_v42 = vld [vmem:[%s4744_s22 + $0x112] sm:$0xff] }
 0x23b   : > { %1887 = vmatmul.f32.gmra.mxu0 %v4345_v12  ;;  %v4250_v17 = vld [vmem:[%s4744_s22 + $0x110] sm:$0xff] }
 0x23c   : > { %2110 = vst [vmem:[#allocation2 + $0x19] sm:$0xff] %v2034_v15  ;;  %v1931_v27 = vadd.f32 %v1837_v44, %v1737_v38  ;;  %1499 = vmatmul.f32.gmra.mxu2 %v4249_v53  ;;  %1693 = vmatmul.f32.gmra.mxu3 %v4297_v41  ;;  %v4298_v55 = vld [vmem:[%s4744_s22 + $0x111] sm:$0xff]  ;;  %v5831_v41 = vpop.f32.mrf.mxu1  ;;  %v4403_v38 = vld [vmem:[%s7195_s4 + $0x160] sm:$0xff] }
 0x23d   : > { %2261 = vmatmul.f32.gmra.mxu1 %v2034_v15  ;;  %2517 = vmatpush.msrb.mxu3 %v4403_v38 }
 0x23e   : > { %v1967_v46 = vmul.f32 %v5797_v52, %v1931_v27 }
 0x23f   : > { %v1452_v58 = vpop.f32.mrf.mxu2  ;;  %v1646_v26 = vpop.f32.mrf.mxu3 }
 0x240   : > { %v2003_v44 = vadd.f32 %v5803_v25, %v1967_v46  ;;  %v1544_v5 = vadd.f32 %v1452_v58, %v5437_v20  ;;  %v1843_v61 = vpop.f32.mrf.mxu0  ;;  %v2186_v20 = vld [vmem:[%s7195_s4 + $0x60] sm:$0xff] }
 0x241   : > { %2355 = vmatpush.msrb.mxu2 %v2186_v20 }
 0x242   : > { %v2035_v12 = vmax.f32 %v2003_v44, 0.0  ;;  %v1738_v53 = vadd.f32 %v1646_v26, %v1544_v5  ;;  %v4347_v26 = vld [vmem:[%s4744_s22 + $0x122] sm:$0xff] }
 0x243   : > { %1890 = vmatmul.f32.gmra.mxu0 %v4346_v42  ;;  %v4251_v44 = vld [vmem:[%s4744_s22 + $0x120] sm:$0xff] }
 0x244   : > { %2111 = vst [vmem:[#allocation2 + $0x21] sm:$0xff] %v2035_v12  ;;  %v1932_v15 = vadd.f32 %v1840_v9, %v1738_v53  ;;  %1502 = vmatmul.f32.gmra.mxu2 %v4250_v17  ;;  %1696 = vmatmul.f32.gmra.mxu3 %v4298_v55  ;;  %v4299_v5 = vld [vmem:[%s4744_s22 + $0x121] sm:$0xff]  ;;  %v5851_v53 = vpop.f32.mrf.mxu1 }
 0x245   : > { %2264 = vmatmul.f32.gmra.mxu1 %v2035_v12  ;;  %v4419_v12 = vld [vmem:[%s7195_s4 + $0x1e0] sm:$0xff] }
 0x246   : > { %v1968_v27 = vmul.f32 %v5797_v52, %v1932_v15  ;;  %2711 = vmatpush.msrb.mxu0 %v4419_v12 }
 0x247   : > { %v1455_v31 = vpop.f32.mrf.mxu2  ;;  %v1649_v4 = vpop.f32.mrf.mxu3 }
 0x248   : > { %v2004_v9 = vadd.f32 %v5803_v25, %v1968_v27  ;;  %v1545_v46 = vadd.f32 %v1455_v31, %v5450_v33  ;;  %v1846_v58 = vpop.f32.mrf.mxu0  ;;  %v4435_v33 = vld [vmem:[%s7195_s4 + $0x260] sm:$0xff] }
 0x249   : > { %2905 = vmatpush.msrb.mxu1 %v4435_v33 }
 0x24a   : > { %v2036_v42 = vmax.f32 %v2004_v9, 0.0  ;;  %v1739_v17 = vadd.f32 %v1649_v4, %v1545_v46  ;;  %v4348_v4 = vld [vmem:[%s4744_s22 + $0x12a] sm:$0xff] }
 0x24b   : > { %1893 = vmatmul.f32.gmra.mxu0 %v4347_v26  ;;  %v4252_v9 = vld [vmem:[%s4744_s22 + $0x128] sm:$0xff] }
 0x24c   : > { %2112 = vst [vmem:[#allocation2 + $0x31] sm:$0xff] %v2036_v42  ;;  %v1933_v55 = vadd.f32 %v1843_v61, %v1739_v17  ;;  %1505 = vmatmul.f32.gmra.mxu2 %v4251_v44  ;;  %1699 = vmatmul.f32.gmra.mxu3 %v4299_v5  ;;  %v4300_v46 = vld [vmem:[%s4744_s22 + $0x129] sm:$0xff] }
 0x24d   : > { %2267 = vmatmul.f32.gmra.mxu1 %v2036_v42  ;;  %v2185_v42 = vld [vmem:[%s7195_s4 + $0x58] sm:$0xff] }
 0x24e   : > { %v1969_v15 = vmul.f32 %v5797_v52, %v1933_v55  ;;  %2356 = vmatpush.msrb.mxu2 %v2185_v42 }
 0x24f   : > { %v1458_v61 = vpop.f32.mrf.mxu2  ;;  %v1652_v20 = vpop.f32.mrf.mxu3 }
 0x250   : > { %v2005_v38 = vadd.f32 %v5803_v25, %v1969_v15  ;;  %v1546_v27 = vadd.f32 %v1458_v61, %v5463_v10  ;;  %v1849_v31 = vpop.f32.mrf.mxu0  ;;  %v4402_v10 = vld [vmem:[%s7195_s4 + $0x158] sm:$0xff] }
 0x251   : > { %2518 = vmatpush.msrb.mxu3 %v4402_v10 }
 0x252   : > { %v2037_v26 = vmax.f32 %v2005_v38, 0.0  ;;  %v1740_v44 = vadd.f32 %v1652_v20, %v1546_v27  ;;  %v4349_v20 = vld [vmem:[%s4744_s22 + $0x13a] sm:$0xff] }
 0x253   : > { %1896 = vmatmul.f32.gmra.mxu0 %v4348_v4  ;;  %v4253_v38 = vld [vmem:[%s4744_s22 + $0x138] sm:$0xff] }
 0x254   : > { %2113 = vst [vmem:[#allocation2 + $0x39] sm:$0xff] %v2037_v26  ;;  %v1934_v5 = vadd.f32 %v1846_v58, %v1740_v44  ;;  %1508 = vmatmul.f32.gmra.mxu2 %v4252_v9  ;;  %1702 = vmatmul.f32.gmra.mxu3 %v4300_v46  ;;  %v5866_v58 = vpop.f32.mrf.mxu1  ;;  %v4301_v27 = vld [vmem:[%s4744_s22 + $0x139] sm:$0xff] }
 0x255   : > { %2270 = vmatmul.f32.gmra.mxu1 %v2037_v26  ;;  %v4418_v26 = vld [vmem:[%s7195_s4 + $0x1d8] sm:$0xff] }
 0x256   : > { %v1970_v17 = vmul.f32 %v5797_v52, %v1934_v5  ;;  %2712 = vmatpush.msrb.mxu0 %v4418_v26 }
 0x257   : > { %v1461_v55 = vpop.f32.mrf.mxu2  ;;  %v1655_v12 = vpop.f32.mrf.mxu3 }
 0x258   : > { %v2006_v33 = vadd.f32 %v5803_v25, %v1970_v17  ;;  %v1547_v15 = vadd.f32 %v1461_v55, %v5476_v47  ;;  %v1852_v61 = vpop.f32.mrf.mxu0  ;;  %v4434_v47 = vld [vmem:[%s7195_s4 + $0x258] sm:$0xff]  ;;  %v4350_v55 = vld [vmem:[%s4744_s22 + $0x142] sm:$0xff] }
 0x259   : > { %2906 = vmatpush.msrb.mxu1 %v4434_v47 }
 0x25a   : > { %v2038_v4 = vmax.f32 %v2006_v33, 0.0  ;;  %v1741_v9 = vadd.f32 %v1655_v12, %v1547_v15  ;;  %v4254_v12 = vld [vmem:[%s4744_s22 + $0x140] sm:$0xff] }
 0x25b   : > { %1899 = vmatmul.f32.gmra.mxu0 %v4349_v20  ;;  %v4302_v33 = vld [vmem:[%s4744_s22 + $0x141] sm:$0xff] }
 0x25c   : > { %2114 = vst [vmem:[#allocation2 + $0x49] sm:$0xff] %v2038_v4  ;;  %v1935_v46 = vadd.f32 %v1849_v31, %v1741_v9  ;;  %1511 = vmatmul.f32.gmra.mxu2 %v4253_v38  ;;  %1705 = vmatmul.f32.gmra.mxu3 %v4301_v27  ;;  %v5885_v15 = vpop.f32.mrf.mxu1 }
 0x25d   : > { %2273 = vmatmul.f32.gmra.mxu1 %v2038_v4  ;;  %v4401_v4 = vld [vmem:[%s7195_s4 + $0x150] sm:$0xff] }
 0x25e   : > { %v1971_v44 = vmul.f32 %v5797_v52, %v1935_v46  ;;  %2519 = vmatpush.msrb.mxu3 %v4401_v4 }
 0x25f   : > { %v1464_v5 = vpop.f32.mrf.mxu2  ;;  %v1658_v42 = vpop.f32.mrf.mxu3 }
 0x260   : > { %v2007_v31 = vadd.f32 %v5803_v25, %v1971_v44  ;;  %v1548_v10 = vadd.f32 %v1464_v5, %v5489_v16  ;;  %v1855_v17 = vpop.f32.mrf.mxu0  ;;  %v2184_v16 = vld [vmem:[%s7195_s4 + $0x50] sm:$0xff] }
 0x261   : > { %2357 = vmatpush.msrb.mxu2 %v2184_v16  ;;  %v4351_v5 = vld [vmem:[%s4744_s22 + $0x152] sm:$0xff] }
 0x262   : > { %v2039_v20 = vmax.f32 %v2007_v31, 0.0  ;;  %v1742_v38 = vadd.f32 %v1658_v42, %v1548_v10  ;;  %v4255_v42 = vld [vmem:[%s4744_s22 + $0x150] sm:$0xff] }
 0x263   : > { %1902 = vmatmul.f32.gmra.mxu0 %v4350_v55  ;;  %v4303_v31 = vld [vmem:[%s4744_s22 + $0x151] sm:$0xff] }
 0x264   : > { %2115 = vst [vmem:[#allocation2 + $0x51] sm:$0xff] %v2039_v20  ;;  %v1936_v27 = vadd.f32 %v1852_v61, %v1742_v38  ;;  %1514 = vmatmul.f32.gmra.mxu2 %v4254_v12  ;;  %1708 = vmatmul.f32.gmra.mxu3 %v4302_v33  ;;  %v5899_v12 = vpop.f32.mrf.mxu1  ;;  %v1355_v38 = vadd.f32 %v5594_v56, %v5509_v22  ;;  %v2183_v22 = vld [vmem:[%s7195_s4 + $0x48] sm:$0xff] }
 0x265   : > { %2276 = vmatmul.f32.gmra.mxu1 %v2039_v20  ;;  %v4433_v20 = vld [vmem:[%s7195_s4 + $0x250] sm:$0xff]  ;;  %v4400_v56 = vld [vmem:[%s7195_s4 + $0x148] sm:$0xff]  ;;  %2358 = vmatpush.msrb.mxu2 %v2183_v22  ;;  %v1357_v22 = vadd.f32 %v5617_v14, %v5535_v3 }
 0x266   : > { %v1972_v9 = vmul.f32 %v5797_v52, %v1936_v27  ;;  %2907 = vmatpush.msrb.mxu1 %v4433_v20  ;;  %2520 = vmatpush.msrb.mxu3 %v4400_v56  ;;  %v4397_v3 = vld [vmem:[%s7195_s4 + $0x130] sm:$0xff] }
 0x267   : > { %v1467_v46 = vpop.f32.mrf.mxu2  ;;  %v1661_v26 = vpop.f32.mrf.mxu3 }
 0x268   : > { %v2008_v61 = vadd.f32 %v5803_v25, %v1972_v9  ;;  %v1549_v47 = vadd.f32 %v1467_v46, %v5502_v60  ;;  %v1858_v44 = vpop.f32.mrf.mxu0  ;;  %v4417_v60 = vld [vmem:[%s7195_s4 + $0x1d0] sm:$0xff] }
 0x269   : > { %2713 = vmatpush.msrb.mxu0 %v4417_v60 }
 0x26a   : > { %v2040_v10 = vmax.f32 %v2008_v61, 0.0  ;;  %v1743_v55 = vadd.f32 %v1661_v26, %v1549_v47  ;;  %v4352_v26 = vld [vmem:[%s4744_s22 + $0x15a] sm:$0xff] }
 0x26b   : > { %1905 = vmatmul.f32.gmra.mxu0 %v4351_v5  ;;  %v4256_v61 = vld [vmem:[%s4744_s22 + $0x158] sm:$0xff] }
 0x26c   : > { %2116 = vst [vmem:[#allocation2 + $0x61] sm:$0xff] %v2040_v10  ;;  %v1937_v33 = vadd.f32 %v1855_v17, %v1743_v55  ;;  %1517 = vmatmul.f32.gmra.mxu2 %v4255_v42  ;;  %1711 = vmatmul.f32.gmra.mxu3 %v4303_v31  ;;  %v4304_v47 = vld [vmem:[%s4744_s22 + $0x159] sm:$0xff]  ;;  %v5922_v55 = vpop.f32.mrf.mxu1 }
 0x26d   : > { %2279 = vmatmul.f32.gmra.mxu1 %v2040_v10  ;;  %v1356_v10 = vadd.f32 %v5606_v48, %v5522_v2  ;;  %v2182_v48 = vld [vmem:[%s7195_s4 + $0x40] sm:$0xff] }
 0x26e   : > { %v1973_v27 = vmul.f32 %v5797_v52, %v1937_v33  ;;  %2359 = vmatpush.msrb.mxu2 %v2182_v48 }
 0x26f   : > { %v1470_v17 = vpop.f32.mrf.mxu2  ;;  %v1664_v16 = vpop.f32.mrf.mxu3 }
 0x270   : > { %v2009_v4 = vadd.f32 %v5803_v25, %v1973_v27  ;;  %v1550_v9 = vadd.f32 %v1470_v17, %v1355_v38  ;;  %v1861_v46 = vpop.f32.mrf.mxu0  ;;  %v4353_v17 = vld [vmem:[%s4744_s22 + $0x16a] sm:$0xff] }
 0x272   : > { %v2041_v5 = vmax.f32 %v2009_v4, 0.0  ;;  %v1744_v42 = vadd.f32 %v1664_v16, %v1550_v9  ;;  %v4257_v16 = vld [vmem:[%s4744_s22 + $0x168] sm:$0xff] }
 0x273   : > { %1908 = vmatmul.f32.gmra.mxu0 %v4352_v26  ;;  %v4305_v4 = vld [vmem:[%s4744_s22 + $0x169] sm:$0xff] }
 0x274   : > { %2117 = vst [vmem:[#allocation2 + $0x69] sm:$0xff] %v2041_v5  ;;  %v1938_v31 = vadd.f32 %v1858_v44, %v1744_v42  ;;  %1520 = vmatmul.f32.gmra.mxu2 %v4256_v61  ;;  %1714 = vmatmul.f32.gmra.mxu3 %v4304_v47  ;;  %v4416_v9 = vld [vmem:[%s7195_s4 + $0x1c8] sm:$0xff]  ;;  %v4399_v61 = vld [vmem:[%s7195_s4 + $0x140] sm:$0xff]  ;;  %v5962_v14 = vpop.f32.mrf.mxu1 }
 0x275   : > { %2282 = vmatmul.f32.gmra.mxu1 %v2041_v5  ;;  %2714 = vmatpush.msrb.mxu0 %v4416_v9  ;;  %v4432_v5 = vld [vmem:[%s7195_s4 + $0x248] sm:$0xff]  ;;  %v4415_v42 = vld [vmem:[%s7195_s4 + $0x1c0] sm:$0xff]  ;;  %v4306_v9 = vld [vmem:[%s4744_s22 + $0x171] sm:$0xff] }
 0x276   : > { %v1974_v44 = vmul.f32 %v5797_v52, %v1938_v31  ;;  %v2181_v31 = vld [vmem:[%s7195_s4 + $0x38] sm:$0xff]  ;;  %2908 = vmatpush.msrb.mxu1 %v4432_v5  ;;  %2521 = vmatpush.msrb.mxu3 %v4399_v61  ;;  %v4413_v61 = vld [vmem:[%s7195_s4 + $0x1b0] sm:$0xff]  ;;  %v2178_v5 = vld [vmem:[%s7195_s4 + $0x20] sm:$0xff] }
 0x277   : > { %v1473_v33 = vpop.f32.mrf.mxu2  ;;  %v1667_v60 = vpop.f32.mrf.mxu3  ;;  %2715 = vmatpush.msrb.mxu0 %v4415_v42  ;;  %2360 = vmatpush.msrb.mxu2 %v2181_v31  ;;  %v4412_v31 = vld [vmem:[%s7195_s4 + $0x1a8] sm:$0xff] }
 0x278   : > { %v2010_v20 = vadd.f32 %v5803_v25, %v1974_v44  ;;  %v1551_v38 = vadd.f32 %v1473_v33, %v1356_v10  ;;  %v1864_v27 = vpop.f32.mrf.mxu0  ;;  %v4414_v10 = vld [vmem:[%s7195_s4 + $0x1b8] sm:$0xff] }
 0x279   : > { %2716 = vmatpush.msrb.mxu0 %v4414_v10  ;;  %v4411_v10 = vld [vmem:[%s7195_s4 + $0x1a0] sm:$0xff] }
 0x27a   : > { %v2042_v26 = vmax.f32 %v2010_v20, 0.0  ;;  %v1745_v2 = vadd.f32 %v1667_v60, %v1551_v38  ;;  %v2180_v60 = vld [vmem:[%s7195_s4 + $0x30] sm:$0xff] }
 0x27b   : > { %1911 = vmatmul.f32.gmra.mxu0 %v4353_v17  ;;  %2361 = vmatpush.msrb.mxu2 %v2180_v60  ;;  %v4394_v60 = vld [vmem:[%s7195_s4 + $0x118] sm:$0xff] }
 0x27c   : > { %2118 = vst [vmem:[#allocation2 + $0x79] sm:$0xff] %v2042_v26  ;;  %v1939_v47 = vadd.f32 %v1861_v46, %v1745_v2  ;;  %1523 = vmatmul.f32.gmra.mxu2 %v4257_v16  ;;  %1717 = vmatmul.f32.gmra.mxu3 %v4305_v4  ;;  %v4398_v46 = vld [vmem:[%s7195_s4 + $0x138] sm:$0xff]  ;;  %v4258_v4 = vld [vmem:[%s4744_s22 + $0x170] sm:$0xff] }
 0x27d   : > { %2285 = vmatmul.f32.gmra.mxu1 %v2042_v26  ;;  %v4354_v16 = vld [vmem:[%s4744_s22 + $0x172] sm:$0xff]  ;;  %2522 = vmatpush.msrb.mxu3 %v4398_v46  ;;  %v2179_v26 = vld [vmem:[%s7195_s4 + $0x28] sm:$0xff]  ;;  %v4395_v46 = vld [vmem:[%s7195_s4 + $0x120] sm:$0xff] }
 0x27e   : > { %v1975_v56 = vmul.f32 %v5797_v52, %v1939_v47  ;;  %2362 = vmatpush.msrb.mxu2 %v2179_v26  ;;  %v4396_v47 = vld [vmem:[%s7195_s4 + $0x128] sm:$0xff]  ;;  %2717 = vmatpush.msrb.mxu0 %v4413_v61  ;;  %v4393_v61 = vld [vmem:[%s7195_s4 + $0x110] sm:$0xff] }
 0x27f   : > { %v1476_v44 = vpop.f32.mrf.mxu2  ;;  %v1670_v33 = vpop.f32.mrf.mxu3  ;;  %2523 = vmatpush.msrb.mxu3 %v4397_v3 }
 0x280   : > { %v2011_v20 = vadd.f32 %v5803_v25, %v1975_v56  ;;  %v1552_v38 = vadd.f32 %v1476_v44, %v1357_v22  ;;  %v1867_v17 = vpop.f32.mrf.mxu0  ;;  %v2177_v22 = vld [vmem:[%s7195_s4 + $0x18] sm:$0xff]  ;;  %2363 = vmatpush.msrb.mxu2 %v2178_v5  ;;  %2718 = vmatpush.msrb.mxu0 %v4412_v31  ;;  %v4431_v5 = vld [vmem:[%s7195_s4 + $0x240] sm:$0xff]  ;;  %v2175_v31 = vld [vmem:[%s7195_s4 + $0x8] sm:$0xff] }
 0x281   : > { %2524 = vmatpush.msrb.mxu3 %v4396_v47  ;;  %2909 = vmatpush.msrb.mxu1 %v4431_v5 }
 0x282   : > { %v2043_v2 = vmax.f32 %v2011_v20, 0.0  ;;  %v1746_v48 = vadd.f32 %v1670_v33, %v1552_v38  ;;  %v4355_v38 = vld [vmem:[%s4744_s22 + $0x182] sm:$0xff]  ;;  %2364 = vmatpush.msrb.mxu2 %v2177_v22  ;;  %2719 = vmatpush.msrb.mxu0 %v4411_v10 }
 0x283   : > { %1914 = vmatmul.f32.gmra.mxu0 %v4354_v16  ;;  %2525 = vmatpush.msrb.mxu3 %v4395_v46  ;;  %v4259_v16 = vld [vmem:[%s4744_s22 + $0x180] sm:$0xff]  ;;  %v1359_v46 = vadd.f32 %v5638_v6, %v5555_v62 }
 0x284   : > { %2119 = vst [vmem:[#allocation2 + $0x81] sm:$0xff] %v2043_v2  ;;  %v1940_v42 = vadd.f32 %v1864_v27, %v1746_v48  ;;  %1526 = vmatmul.f32.gmra.mxu2 %v4258_v4  ;;  %1720 = vmatmul.f32.gmra.mxu3 %v4306_v9  ;;  %v1358_v27 = vadd.f32 %v5630_v29, %v5548_v35  ;;  %v2176_v35 = vld [vmem:[%s7195_s4 + $0x10] sm:$0xff]  ;;  %v4307_v4 = vld [vmem:[%s4744_s22 + $0x181] sm:$0xff]  ;;  %v6005_v9 = vpop.f32.mrf.mxu1  ;;  %v4410_v48 = vld [vmem:[%s7195_s4 + $0x198] sm:$0xff] }
 0x285   : > { %2288 = vmatmul.f32.gmra.mxu1 %v2043_v2  ;;  %2526 = vmatpush.msrb.mxu3 %v4394_v60  ;;  %v4391_v62 = vld [vmem:[%s7195_s4 + $0x100] sm:$0xff] }
 0x286   : > { %v1976_v56 = vmul.f32 %v5797_v52, %v1940_v42  ;;  %2365 = vmatpush.msrb.mxu2 %v2176_v35  ;;  %v4409_v42 = vld [vmem:[%s7195_s4 + $0x190] sm:$0xff]  ;;  %2720 = vmatpush.msrb.mxu0 %v4410_v48  ;;  %v1360_v48 = vadd.f32 %v5653_v21, %v5565_v1  ;;  %v4430_v1 = vld [vmem:[%s7195_s4 + $0x238] sm:$0xff]  ;;  %v1361_v21 = vadd.f32 %v5661_v51, %v5572_v13 }
 0x287   : > { %v1479_v44 = vpop.f32.mrf.mxu2  ;;  %v1673_v33 = vpop.f32.mrf.mxu3  ;;  %2527 = vmatpush.msrb.mxu3 %v4393_v61  ;;  %v4356_v35 = vld [vmem:[%s4744_s22 + $0x18a] sm:$0xff]  ;;  %2910 = vmatpush.msrb.mxu1 %v4430_v1  ;;  %v1362_v13 = vadd.f32 %v5674_v37, %v5583_v50  ;;  %v1363_v37 = vadd.f32 %v5689_v30, %v5589_v24  ;;  %v1364_v24 = vadd.f32 %v5716_v63, %v5600_v40 }
 0x288   : > { %v2012_v29 = vadd.f32 %v5803_v25, %v1976_v56  ;;  %v1553_v3 = vadd.f32 %v1479_v44, %v1358_v27  ;;  %v1870_v20 = vpop.f32.mrf.mxu0  ;;  %v4408_v27 = vld [vmem:[%s7195_s4 + $0x188] sm:$0xff]  ;;  %v2174_v56 = vld [vmem:[%s7195_s4] sm:$0xff]  ;;  %2721 = vmatpush.msrb.mxu0 %v4409_v42  ;;  %2366 = vmatpush.msrb.mxu2 %v2175_v31  ;;  %v4429_v50 = vld [vmem:[%s7195_s4 + $0x230] sm:$0xff]  ;;  %v1365_v63 = vadd.f32 %v5735_v45, %v5608_v59 }
 0x289   : > { %2911 = vmatpush.msrb.mxu1 %v4429_v50  ;;  %v4428_v40 = vld [vmem:[%s7195_s4 + $0x228] sm:$0xff]  ;;  %v1366_v59 = vadd.f32 %v5767_v34, %v5619_v54  ;;  %v4427_v54 = vld [vmem:[%s7195_s4 + $0x220] sm:$0xff]  ;;  %v1367_v34 = vadd.f32 %v5789_v49, %v5625_v0  ;;  %v1368_v0 = vadd.f32 %v5817_v18, %v5636_v7  ;;  %v4426_v7 = vld [vmem:[%s7195_s4 + $0x218] sm:$0xff]  ;;  %v1369_v18 = vadd.f32 %v5831_v41, %v5644_v57 }
 0x28a   : > { %v2044_v26 = vmax.f32 %v2012_v29, 0.0  ;;  %v1747_v2 = vadd.f32 %v1673_v33, %v1553_v3  ;;  %v4260_v29 = vld [vmem:[%s4744_s22 + $0x188] sm:$0xff]  ;;  %2722 = vmatpush.msrb.mxu0 %v4408_v27  ;;  %2367 = vmatpush.msrb.mxu2 %v2174_v56  ;;  %v4309_v27 = vld [vmem:[%s4744_s22 + $0x199] sm:$0xff]  ;;  %v1370_v57 = vadd.f32 %v5851_v53, %v5655_v23 }
 0x28b   : > { %1917 = vmatmul.f32.gmra.mxu0 %v4355_v38  ;;  %v4308_v3 = vld [vmem:[%s4744_s22 + $0x189] sm:$0xff]  ;;  %2912 = vmatpush.msrb.mxu1 %v4428_v40  ;;  %v2667_v53 = vld [vmem:[#allocation2 + $0x78] sm:$0xff] }
 0x28c   : > { %2120 = vst [vmem:[#allocation2 + $0x91] sm:$0xff] %v2044_v26  ;;  %v1941_v47 = vadd.f32 %v1867_v17, %v1747_v2  ;;  %1529 = vmatmul.f32.gmra.mxu2 %v4259_v16  ;;  %1723 = vmatmul.f32.gmra.mxu3 %v4307_v4  ;;  %v4392_v17 = vld [vmem:[%s7195_s4 + $0x108] sm:$0xff]  ;;  %v4407_v4 = vld [vmem:[%s7195_s4 + $0x180] sm:$0xff] }
 0x28d   : > { %2291 = vmatmul.f32.gmra.mxu1 %v2044_v26  ;;  %2528 = vmatpush.msrb.mxu3 %v4392_v17  ;;  %v6044_v26 = vpop.f32.mrf.mxu1 }
 0x28e   : > { %v1977_v22 = vmul.f32 %v5797_v52, %v1941_v47  ;;  %2723 = vmatpush.msrb.mxu0 %v4407_v4  ;;  %2913 = vmatpush.msrb.mxu1 %v4427_v54  ;;  %v2666_v54 = vld [vmem:[#allocation2 + $0x68] sm:$0xff] }
 0x28f   : > { %v1482_v10 = vpop.f32.mrf.mxu2  ;;  %v1676_v44 = vpop.f32.mrf.mxu3  ;;  %2529 = vmatpush.msrb.mxu3 %v4391_v62 }
 0x290   : > { %v2013_v6 = vadd.f32 %v5803_v25, %v1977_v22  ;;  %v1554_v33 = vadd.f32 %v1482_v10, %v1359_v46  ;;  %v1873_v60 = vpop.f32.mrf.mxu0  ;;  %v4357_v46 = vld [vmem:[%s4744_s22 + $0x19a] sm:$0xff]  ;;  %2914 = vmatpush.msrb.mxu1 %v4426_v7  ;;  %v2474_v7 = vld [vmem:[#allocation2 + $0x6a] sm:$0xff] }
 0x291   : > { %v4261_v22 = vld [vmem:[%s4744_s22 + $0x198] sm:$0xff] }
 0x292   : > { %v2045_v38 = vmax.f32 %v2013_v6, 0.0  ;;  %v1748_v16 = vadd.f32 %v1676_v44, %v1554_v33 }
 0x293   : > { %1920 = vmatmul.f32.gmra.mxu0 %v4356_v35 }
 0x294   : > { %2121 = vst [vmem:[#allocation2 + $0x99] sm:$0xff] %v2045_v38  ;;  %v1942_v2 = vadd.f32 %v1870_v20, %v1748_v16  ;;  %1532 = vmatmul.f32.gmra.mxu2 %v4260_v29  ;;  %1726 = vmatmul.f32.gmra.mxu3 %v4308_v3  ;;  %v4358_v3 = vld [vmem:[%s4744_s22 + $0x1a2] sm:$0xff] }
 0x295   : > { %2294 = vmatmul.f32.gmra.mxu1 %v2045_v38  ;;  %v6058_v44 = vpop.f32.mrf.mxu1  ;;  %v4262_v38 = vld [vmem:[%s4744_s22 + $0x1a0] sm:$0xff] }
 0x296   : > { %v1978_v61 = vmul.f32 %v5797_v52, %v1942_v2  ;;  %v4310_v16 = vld [vmem:[%s4744_s22 + $0x1a1] sm:$0xff] }
 0x297   : > { %v1485_v47 = vpop.f32.mrf.mxu2  ;;  %v1679_v5 = vpop.f32.mrf.mxu3 }
 0x298   : > { %v2014_v42 = vadd.f32 %v5803_v25, %v1978_v61  ;;  %v1555_v31 = vadd.f32 %v1485_v47, %v1360_v48  ;;  %v1876_v17 = vpop.f32.mrf.mxu0 }
 0x29a   : > { %v2046_v56 = vmax.f32 %v2014_v42, 0.0  ;;  %v1749_v20 = vadd.f32 %v1679_v5, %v1555_v31 }
 0x29b   : > { %1923 = vmatmul.f32.gmra.mxu0 %v4357_v46 }
 0x29c   : > { %2122 = vst [vmem:[#allocation2 + $0xa9] sm:$0xff] %v2046_v56  ;;  %v1943_v10 = vadd.f32 %v1873_v60, %v1749_v20  ;;  %1535 = vmatmul.f32.gmra.mxu2 %v4261_v22  ;;  %1729 = vmatmul.f32.gmra.mxu3 %v4309_v27  ;;  %v2142_v22 = vld [vmem:[#allocation2] sm:$0xff]  ;;  %v2659_v20 = vld [vmem:[#allocation2 + $0x18] sm:$0xff] }
 0x29d   : > { %2297 = vmatmul.f32.gmra.mxu1 %v2046_v56  ;;  %v6068_v61 = vpop.f32.mrf.mxu1  ;;  %v2465_v27 = vld [vmem:[#allocation2 + $0x2] sm:$0xff] }
 0x29e   : > { %v1979_v62 = vmul.f32 %v5797_v52, %v1943_v10 }
 0x29f   : > { %v1488_v6 = vpop.f32.mrf.mxu2  ;;  %v1682_v33 = vpop.f32.mrf.mxu3 }
 0x2a0   : > { %v2015_v60 = vadd.f32 %v5803_v25, %v1979_v62  ;;  %v1556_v35 = vadd.f32 %v1488_v6, %v1361_v21  ;;  %v1879_v29 = vpop.f32.mrf.mxu0 }
 0x2a2   : > { %v2047_v4 = vmax.f32 %v2015_v60, 0.0  ;;  %v1750_v2 = vadd.f32 %v1682_v33, %v1556_v35 }
 0x2a3   : > { %1926 = vmatmul.f32.gmra.mxu0 %v4358_v3 }
 0x2a4   : > { %2123 = vst [vmem:[#allocation2 + $0xb1] sm:$0xff] %v2047_v4  ;;  %v1944_v48 = vadd.f32 %v1876_v17, %v1750_v2  ;;  %1538 = vmatmul.f32.gmra.mxu2 %v4262_v38  ;;  %1732 = vmatmul.f32.gmra.mxu3 %v4310_v16  ;;  %v2660_v16 = vld [vmem:[#allocation2 + $0x20] sm:$0xff]  ;;  %v4554_v2 = vld [vmem:[#allocation2 + $0x8] sm:$0xff] }
 0x2a5   : > { %2300 = vmatmul.f32.gmra.mxu1 %v2047_v4  ;;  %v6078_v35 = vpop.f32.mrf.mxu1 }
 0x2a6   : > { %v1980_v51 = vmul.f32 %v5797_v52, %v1944_v48 }
 0x2a7   : > { %v1491_v47 = vpop.f32.mrf.mxu2  ;;  %v1685_v5 = vpop.f32.mrf.mxu3 }
 0x2a8   : > { %v2016_v42 = vadd.f32 %v5803_v25, %v1980_v51  ;;  %v1557_v31 = vadd.f32 %v1491_v47, %v1362_v13  ;;  %v1882_v46 = vpop.f32.mrf.mxu0 }
 0x2aa   : > { %v2048_v56 = vmax.f32 %v2016_v42, 0.0  ;;  %v1751_v17 = vadd.f32 %v1685_v5, %v1557_v31 }
 0x2ab   : > { %2724 = vmatmul.f32.vlgmr.msrb.gmra.mxu0 %v2659_v20 }
 0x2ac   : > { %2124 = vst [vmem:[#allocation2 + $0xc1] sm:$0xff] %v2048_v56  ;;  %v1945_v10 = vadd.f32 %v1879_v29, %v1751_v17  ;;  %2368 = vmatmul.f32.vlgmr.msrb.gmra.mxu2 %v2142_v22  ;;  %2530 = vmatmul.f32.vlgmr.msrb.gmra.mxu3 %v2465_v27  ;;  %v2466_v29 = vld [vmem:[#allocation2 + $0xa] sm:$0xff] }
 0x2ad   : > { %2303 = vmatmul.f32.gmra.mxu1 %v2048_v56  ;;  %v2661_v22 = vld [vmem:[#allocation2 + $0x30] sm:$0xff] }
 0x2ae   : > { %v1981_v1 = vmul.f32 %v5797_v52, %v1945_v10 }
 0x2af   : > { %v1494_v21 = vpop.f32.mrf.mxu2  ;;  %v1688_v62 = vpop.f32.mrf.mxu3 }
 0x2b0   : > { %v2017_v6 = vadd.f32 %v5803_v25, %v1981_v1  ;;  %v1558_v33 = vadd.f32 %v1494_v21, %v1363_v37  ;;  %v1885_v60 = vpop.f32.mrf.mxu0 }
 0x2b2   : > { %v2049_v3 = vmax.f32 %v2017_v6, 0.0  ;;  %v1752_v38 = vadd.f32 %v1688_v62, %v1558_v33  ;;  %v2662_v6 = vld [vmem:[#allocation2 + $0x38] sm:$0xff] }
 0x2b3   : > { %2727 = vmatmul.f32.gmra.mxu0 %v2660_v16 }
 0x2b4   : > { %2125 = vst [vmem:[#allocation2 + $0xc9] sm:$0xff] %v2049_v3  ;;  %v1946_v4 = vadd.f32 %v1882_v46, %v1752_v38  ;;  %2371 = vmatmul.f32.gmra.mxu2 %v4554_v2  ;;  %2533 = vmatmul.f32.gmra.mxu3 %v2466_v29  ;;  %v2467_v46 = vld [vmem:[#allocation2 + $0x1a] sm:$0xff] }
 0x2b5   : > { %2306 = vmatmul.f32.gmra.mxu1 %v2049_v3 }
 0x2b6   : > { %v1982_v30 = vmul.f32 %v5797_v52, %v1946_v4 }
 0x2b7   : > { %v1497_v48 = vpop.f32.mrf.mxu2  ;;  %v1691_v13 = vpop.f32.mrf.mxu3 }
 0x2b8   : > { %v2018_v51 = vadd.f32 %v5803_v25, %v1982_v30  ;;  %v1559_v47 = vadd.f32 %v1497_v48, %v1364_v24  ;;  %v1888_v5 = vpop.f32.mrf.mxu0 }
 0x2ba   : > { %v2050_v42 = vmax.f32 %v2018_v51, 0.0  ;;  %v1753_v31 = vadd.f32 %v1691_v13, %v1559_v47  ;;  %v6084_v27 = vpop.f32.mrf.mxu1  ;;  %v2663_v13 = vld [vmem:[#allocation2 + $0x48] sm:$0xff]  ;;  %v2469_v47 = vld [vmem:[#allocation2 + $0x32] sm:$0xff] }
 0x2bb   : > { %2730 = vmatmul.f32.gmra.mxu0 %v2661_v22 }
 0x2bc   : > { %2126 = vst [vmem:[#allocation2 + $0xd9] sm:$0xff] %v2050_v42  ;;  %v1947_v56 = vadd.f32 %v1885_v60, %v1753_v31  ;;  %2374 = vmatmul.f32.gmra.mxu2 %v2659_v20  ;;  %2536 = vmatmul.f32.gmra.mxu3 %v2467_v46  ;;  %v2468_v60 = vld [vmem:[#allocation2 + $0x22] sm:$0xff] }
 0x2bd   : > { %2309 = vmatmul.f32.gmra.mxu1 %v2050_v42 }
 0x2be   : > { %v1983_v17 = vmul.f32 %v5797_v52, %v1947_v56 }
 0x2bf   : > { %v1500_v10 = vpop.f32.mrf.mxu2  ;;  %v1694_v50 = vpop.f32.mrf.mxu3 }
 0x2c0   : > { %v2019_v37 = vadd.f32 %v5803_v25, %v1983_v17  ;;  %v1560_v1 = vadd.f32 %v1500_v10, %v1365_v63  ;;  %v1891_v21 = vpop.f32.mrf.mxu0  ;;  %v2664_v17 = vld [vmem:[#allocation2 + $0x50] sm:$0xff] }
 0x2c2   : > { %v2051_v62 = vmax.f32 %v2019_v37, 0.0  ;;  %v1754_v20 = vadd.f32 %v1694_v50, %v1560_v1  ;;  %v6093_v33 = vpop.f32.mrf.mxu1  ;;  %v2470_v50 = vld [vmem:[#allocation2 + $0x3a] sm:$0xff] }
 0x2c3   : > { %2733 = vmatmul.f32.gmra.mxu0 %v2662_v6 }
 0x2c4   : > { %2127 = vst [vmem:[#allocation2 + $0xe1] sm:$0xff] %v2051_v62  ;;  %v1948_v29 = vadd.f32 %v1888_v5, %v1754_v20  ;;  %2377 = vmatmul.f32.gmra.mxu2 %v2660_v16  ;;  %2539 = vmatmul.f32.gmra.mxu3 %v2468_v60 }
 0x2c5   : > { %2312 = vmatmul.f32.gmra.mxu1 %v2051_v62 }
 0x2c6   : > { %v1984_v45 = vmul.f32 %v5797_v52, %v1948_v29 }
 0x2c7   : > { %v1503_v3 = vpop.f32.mrf.mxu2  ;;  %v1697_v38 = vpop.f32.mrf.mxu3 }
 0x2c8   : > { %v2020_v4 = vadd.f32 %v5803_v25, %v1984_v45  ;;  %v1561_v2 = vadd.f32 %v1503_v3, %v1366_v59  ;;  %v1894_v24 = vpop.f32.mrf.mxu0  ;;  %v2665_v45 = vld [vmem:[#allocation2 + $0x60] sm:$0xff] }
 0x2ca   : > { %v2052_v30 = vmax.f32 %v2020_v4, 0.0  ;;  %v1755_v48 = vadd.f32 %v1697_v38, %v1561_v2  ;;  %v6099_v51 = vpop.f32.mrf.mxu1  ;;  %v2471_v38 = vld [vmem:[#allocation2 + $0x4a] sm:$0xff] }
 0x2cb   : > { %2736 = vmatmul.f32.gmra.mxu0 %v2663_v13 }
 0x2cc   : > { %2128 = vst [vmem:[#allocation2 + $0xf1] sm:$0xff] %v2052_v30  ;;  %v1949_v16 = vadd.f32 %v1891_v21, %v1755_v48  ;;  %2380 = vmatmul.f32.gmra.mxu2 %v2661_v22  ;;  %2542 = vmatmul.f32.gmra.mxu3 %v2469_v47 }
 0x2cd   : > { %2315 = vmatmul.f32.gmra.mxu1 %v2052_v30 }
 0x2ce   : > { %v1985_v5 = vmul.f32 %v5797_v52, %v1949_v16 }
 0x2cf   : > { %v1506_v42 = vpop.f32.mrf.mxu2  ;;  %v1700_v31 = vpop.f32.mrf.mxu3 }
 0x2d0   : > { %v2021_v46 = vadd.f32 %v5803_v25, %v1985_v5  ;;  %v1562_v56 = vadd.f32 %v1506_v42, %v1367_v34  ;;  %v1897_v40 = vpop.f32.mrf.mxu0  ;;  %v2472_v5 = vld [vmem:[#allocation2 + $0x52] sm:$0xff] }
 0x2d2   : > { %v2053_v63 = vmax.f32 %v2021_v46, 0.0  ;;  %v1756_v22 = vadd.f32 %v1700_v31, %v1562_v56  ;;  %v6108_v10 = vpop.f32.mrf.mxu1  ;;  %v6136_v46 = vld [vmem:[%s7194_s3] ss:$0 sm:$0xff] }
 0x2d3   : > { %2739 = vmatmul.f32.gmra.mxu0 %v2664_v17 }
 0x2d4   : > { %2129 = vst [vmem:[#allocation2 + $0xf9] sm:$0xff] %v2053_v63  ;;  %v1950_v37 = vadd.f32 %v1894_v24, %v1756_v22  ;;  %2383 = vmatmul.f32.gmra.mxu2 %v2662_v6  ;;  %2545 = vmatmul.f32.gmra.mxu3 %v2470_v50  ;;  %v2473_v50 = vld [vmem:[#allocation2 + $0x62] sm:$0xff] }
 0x2d5   : > { %2318 = vmatmul.f32.gmra.mxu1 %v2053_v63 }
 0x2d6   : > { %v1986_v49 = vmul.f32 %v5797_v52, %v1950_v37 }
 0x2d7   : > { %v1509_v1 = vpop.f32.mrf.mxu2  ;;  %v1703_v21 = vpop.f32.mrf.mxu3 }
 0x2d8   : > { %v2022_v62 = vadd.f32 %v5803_v25, %v1986_v49  ;;  %v1563_v20 = vadd.f32 %v1509_v1, %v1368_v0  ;;  %v1900_v60 = vpop.f32.mrf.mxu0  ;;  %v4425_v0 = vld [vmem:[%s7195_s4 + $0x210] sm:$0xff]  ;;  %v1371_v49 = vadd.f32 %v5866_v58, %v5663_v8  ;;  %v1372_v8 = vadd.f32 %v5885_v15, %v5672_v19  ;;  %v4424_v19 = vld [vmem:[%s7195_s4 + $0x208] sm:$0xff] }
 0x2d9   : > { %2915 = vmatpush.msrb.mxu1 %v4425_v0  ;;  %v1373_v15 = vadd.f32 %v5899_v12, %v5680_v39  ;;  %v1374_v39 = vadd.f32 %v5922_v55, %v5705_v32  ;;  %v4423_v32 = vld [vmem:[%s7195_s4 + $0x200] sm:$0xff]  ;;  %v1375_v55 = vadd.f32 %v5962_v14, %v5721_v36  ;;  %v4454_v36 = vld [vmem:[%s7195_s4 + $0x2f8] sm:$0xff] }
 0x2da   : > { %v2054_v29 = vmax.f32 %v2022_v62, 0.0  ;;  %v1757_v59 = vadd.f32 %v1703_v21, %v1563_v20  ;;  %v6114_v3 = vpop.f32.mrf.mxu1  ;;  %v4470_v14 = vld [vmem:[%s7195_s4 + $0x378] sm:$0xff]  ;;  %3096 = vmatpush.msra.mxu2 %v4454_v36 }
 0x2db   : > { %2742 = vmatmul.f32.gmra.mxu0 %v2665_v45  ;;  %2916 = vmatpush.msrb.mxu1 %v4424_v19  ;;  %v1376_v19 = vadd.f32 %v6005_v9, %v5737_v43  ;;  %v4453_v43 = vld [vmem:[%s7195_s4 + $0x2f0] sm:$0xff] }
 0x2dc   : > { %2130 = vst [vmem:[#allocation2 + $0x109] sm:$0xff] %v2054_v29  ;;  %v1951_v6 = vadd.f32 %v1897_v40, %v1757_v59  ;;  %2386 = vmatmul.f32.gmra.mxu2 %v2663_v13  ;;  %2548 = vmatmul.f32.gmra.mxu3 %v2471_v38  ;;  %v2668_v38 = vld [vmem:[#allocation2 + $0x80] sm:$0xff]  ;;  %v4469_v9 = vld [vmem:[%s7195_s4 + $0x370] sm:$0xff] }
 0x2dd   : > { %2321 = vmatmul.f32.gmra.mxu1 %v2054_v29  ;;  %3291 = vmatpush.msra.mxu3 %v4470_v14  ;;  %v2853_v14 = vld [vmem:[#allocation2 + $0x19] sm:$0xff] }
 0x2de   : > { %v1987_v4 = vmul.f32 %v5797_v52, %v1951_v6  ;;  %v6130_v52 = vld [vmem:[%s7193_s2] ss:$0 sm:$0xff]  ;;  %2917 = vmatpush.msrb.mxu1 %v4423_v32  ;;  %3097 = vmatpush.msra.mxu2 %v4453_v43  ;;  %v2480_v32 = vld [vmem:[#allocation2 + $0xb2] sm:$0xff] }
 0x2df   : > { %v1512_v2 = vpop.f32.mrf.mxu2  ;;  %v1706_v24 = vpop.f32.mrf.mxu3  ;;  %3292 = vmatpush.msra.mxu3 %v4469_v9 }
 0x2e0   : > { %v2023_v30 = vadd.f32 %v5803_v25, %v1987_v4  ;;  %v1564_v48 = vadd.f32 %v1512_v2, %v1369_v18  ;;  %v1903_v47 = vpop.f32.mrf.mxu0 }
 0x2e2   : > { %v2055_v16 = vmax.f32 %v2023_v30, 0.0  ;;  %v1758_v13 = vadd.f32 %v1706_v24, %v1564_v48  ;;  %v6123_v34 = vpop.f32.mrf.mxu1 }
 0x2e3   : > { %2745 = vmatmul.f32.gmra.mxu0 %v2666_v54 }
 0x2e4   : > { %2131 = vst [vmem:[#allocation2 + $0x111] sm:$0xff] %v2055_v16  ;;  %v1952_v42 = vadd.f32 %v1900_v60, %v1758_v13  ;;  %2389 = vmatmul.f32.gmra.mxu2 %v2664_v17  ;;  %2551 = vmatmul.f32.gmra.mxu3 %v2472_v5  ;;  %v2669_v13 = vld [vmem:[#allocation2 + $0x90] sm:$0xff] }
 0x2e5   : > { %2324 = vmatmul.f32.gmra.mxu1 %v2055_v16 }
 0x2e6   : > { %v1988_v25 = vmul.f32 %v6130_v52, %v1952_v42  ;;  %v2475_v42 = vld [vmem:[#allocation2 + $0x7a] sm:$0xff] }
 0x2e7   : > { %v1515_v41 = vpop.f32.mrf.mxu2  ;;  %v1709_v31 = vpop.f32.mrf.mxu3 }
 0x2e8   : > { %v2024_v56 = vadd.f32 %v6136_v46, %v1988_v25  ;;  %v1565_v40 = vadd.f32 %v1515_v41, %v1370_v57  ;;  %v1906_v63 = vpop.f32.mrf.mxu0 }
 0x2ea   : > { %v2056_v22 = vmax.f32 %v2024_v56, 0.0  ;;  %v1759_v23 = vadd.f32 %v1709_v31, %v1565_v40  ;;  %v6139_v17 = vpop.f32.mrf.mxu1 }
 0x2eb   : > { %2748 = vmatmul.f32.gmra.mxu0 %v2667_v53 }
 0x2ec   : > { %2132 = vst [vmem:[#allocation2 + $0x121] sm:$0xff] %v2056_v22  ;;  %v1953_v37 = vadd.f32 %v1903_v47, %v1759_v23  ;;  %2392 = vmatmul.f32.gmra.mxu2 %v2665_v45  ;;  %2554 = vmatmul.f32.gmra.mxu3 %v2473_v50  ;;  %v2670_v23 = vld [vmem:[#allocation2 + $0x98] sm:$0xff]  ;;  %v2476_v50 = vld [vmem:[#allocation2 + $0x82] sm:$0xff] }
 0x2ed   : > { %2327 = vmatmul.f32.gmra.mxu1 %v2056_v22 }
 0x2ee   : > { %v1989_v1 = vmul.f32 %v6130_v52, %v1953_v37 }
 0x2ef   : > { %v1518_v21 = vpop.f32.mrf.mxu2  ;;  %v1712_v62 = vpop.f32.mrf.mxu3 }
 0x2f0   : > { %v2025_v20 = vadd.f32 %v6136_v46, %v1989_v1  ;;  %v1566_v60 = vadd.f32 %v1518_v21, %v1371_v49  ;;  %v1909_v29 = vpop.f32.mrf.mxu0 }
 0x2f2   : > { %v2057_v59 = vmax.f32 %v2025_v20, 0.0  ;;  %v1760_v45 = vadd.f32 %v1712_v62, %v1566_v60  ;;  %v6148_v6 = vpop.f32.mrf.mxu1 }
 0x2f3   : > { %2751 = vmatmul.f32.gmra.mxu0 %v2668_v38 }
 0x2f4   : > { %2133 = vst [vmem:[#allocation2 + $0x129] sm:$0xff] %v2057_v59  ;;  %v1954_v18 = vadd.f32 %v1906_v63, %v1760_v45  ;;  %2395 = vmatmul.f32.gmra.mxu2 %v2666_v54  ;;  %2557 = vmatmul.f32.gmra.mxu3 %v2474_v7  ;;  %v2477_v45 = vld [vmem:[#allocation2 + $0x92] sm:$0xff] }
 0x2f5   : > { %2330 = vmatmul.f32.gmra.mxu1 %v2057_v59 }
 0x2f6   : > { %v1990_v58 = vmul.f32 %v6130_v52, %v1954_v18 }
 0x2f7   : > { %v1521_v4 = vpop.f32.mrf.mxu2  ;;  %v1715_v2 = vpop.f32.mrf.mxu3 }
 0x2f8   : > { %v2026_v24 = vadd.f32 %v6136_v46, %v1990_v58  ;;  %v1567_v30 = vadd.f32 %v1521_v4, %v1372_v8  ;;  %v1912_v48 = vpop.f32.mrf.mxu0 }
 0x2fa   : > { %v2058_v47 = vmax.f32 %v2026_v24, 0.0  ;;  %v1761_v16 = vadd.f32 %v1715_v2, %v1567_v30  ;;  %v6154_v5 = vpop.f32.mrf.mxu1 }
 0x2fb   : > { %2754 = vmatmul.f32.gmra.mxu0 %v2669_v13 }
 0x2fc   : > { %2134 = vst [vmem:[#allocation2 + $0x139] sm:$0xff] %v2058_v47  ;;  %v1955_v54 = vadd.f32 %v1909_v29, %v1761_v16  ;;  %2398 = vmatmul.f32.gmra.mxu2 %v2667_v53  ;;  %2560 = vmatmul.f32.gmra.mxu3 %v2475_v42  ;;  %v2671_v29 = vld [vmem:[#allocation2 + $0xa8] sm:$0xff]  ;;  %v2478_v16 = vld [vmem:[#allocation2 + $0x9a] sm:$0xff] }
 0x2fd   : > { %2333 = vmatmul.f32.gmra.mxu1 %v2058_v47  ;;  %v4486_v42 = vld [vmem:[%s7195_s4 + $0x3f8] sm:$0xff] }
 0x2fe   : > { %v1991_v57 = vmul.f32 %v6130_v52, %v1955_v54  ;;  %v4502_v54 = vld [vmem:[%s7195_s4 + $0x478] sm:$0xff]  ;;  %3485 = vmatpush.msra.mxu0 %v4486_v42 }
 0x2ff   : > { %v1524_v25 = vpop.f32.mrf.mxu2  ;;  %v1718_v41 = vpop.f32.mrf.mxu3  ;;  %3679 = vmatpush.msra.mxu1 %v4502_v54 }
 0x300   : > { %v2027_v31 = vadd.f32 %v6136_v46, %v1991_v57  ;;  %v1568_v56 = vadd.f32 %v1524_v25, %v1373_v15  ;;  %v1915_v40 = vpop.f32.mrf.mxu0 }
 0x302   : > { %v2059_v63 = vmax.f32 %v2027_v31, 0.0  ;;  %v1762_v22 = vadd.f32 %v1718_v41, %v1568_v56  ;;  %v6163_v53 = vpop.f32.mrf.mxu1 }
 0x303   : > { %2757 = vmatmul.f32.gmra.mxu0 %v2670_v23 }
 0x304   : > { %2135 = vst [vmem:[#allocation2 + $0x141] sm:$0xff] %v2059_v63  ;;  %v1956_v37 = vadd.f32 %v1912_v48, %v1762_v22  ;;  %2401 = vmatmul.f32.gmra.mxu2 %v2668_v38  ;;  %2563 = vmatmul.f32.gmra.mxu3 %v2476_v50  ;;  %v2672_v48 = vld [vmem:[#allocation2 + $0xb0] sm:$0xff]  ;;  %v2673_v22 = vld [vmem:[#allocation2 + $0xc0] sm:$0xff] }
 0x305   : > { %2336 = vmatmul.f32.gmra.mxu1 %v2059_v63  ;;  %v2479_v50 = vld [vmem:[#allocation2 + $0xaa] sm:$0xff] }
 0x306   : > { %v1992_v12 = vmul.f32 %v6130_v52, %v1956_v37 }
 0x307   : > { %v1527_v0 = vpop.f32.mrf.mxu2  ;;  %v1721_v49 = vpop.f32.mrf.mxu3 }
 0x308   : > { %v2028_v1 = vadd.f32 %v6136_v46, %v1992_v12  ;;  %v1569_v21 = vadd.f32 %v1527_v0, %v1374_v39  ;;  %v1918_v62 = vpop.f32.mrf.mxu0  ;;  %v1377_v39 = vadd.f32 %v6044_v26, %v5757_v28  ;;  %v4501_v26 = vld [vmem:[%s7195_s4 + $0x470] sm:$0xff] }
 0x309   : > { %3680 = vmatpush.msra.mxu1 %v4501_v26 }
 0x30a   : > { %v2060_v20 = vmax.f32 %v2028_v1, 0.0  ;;  %v1763_v60 = vadd.f32 %v1721_v49, %v1569_v21  ;;  %v6169_v59 = vpop.f32.mrf.mxu1 }
 0x30b   : > { %2760 = vmatmul.f32.gmra.mxu0 %v2671_v29 }
 0x30c   : > { %2136 = vst [vmem:[#allocation2 + $0x151] sm:$0xff] %v2060_v20  ;;  %v1957_v38 = vadd.f32 %v1915_v40, %v1763_v60  ;;  %2404 = vmatmul.f32.gmra.mxu2 %v2669_v13  ;;  %2566 = vmatmul.f32.gmra.mxu3 %v2477_v45  ;;  %v2674_v45 = vld [vmem:[#allocation2 + $0xc8] sm:$0xff] }
 0x30d   : > { %2339 = vmatmul.f32.gmra.mxu1 %v2060_v20 }
 0x30e   : > { %v1993_v7 = vmul.f32 %v6130_v52, %v1957_v38 }
 0x30f   : > { %v1530_v18 = vpop.f32.mrf.mxu2  ;;  %v1724_v8 = vpop.f32.mrf.mxu3 }
 0x310   : > { %v2029_v58 = vadd.f32 %v6136_v46, %v1993_v7  ;;  %v1570_v4 = vadd.f32 %v1530_v18, %v1375_v55  ;;  %v1921_v2 = vpop.f32.mrf.mxu0  ;;  %v1378_v55 = vadd.f32 %v6058_v44, %v5779_v11  ;;  %v4468_v11 = vld [vmem:[%s7195_s4 + $0x368] sm:$0xff] }
 0x311   : > { %v2481_v44 = vld [vmem:[#allocation2 + $0xc2] sm:$0xff]  ;;  %3293 = vmatpush.msra.mxu3 %v4468_v11  ;;  %v4450_v11 = vld [vmem:[%s7195_s4 + $0x2d8] sm:$0xff] }
 0x312   : > { %v2061_v24 = vmax.f32 %v2029_v58, 0.0  ;;  %v1764_v30 = vadd.f32 %v1724_v8, %v1570_v4  ;;  %v6178_v47 = vpop.f32.mrf.mxu1 }
 0x313   : > { %2763 = vmatmul.f32.gmra.mxu0 %v2672_v48 }
 0x314   : > { %2137 = vst [vmem:[#allocation2 + $0x159] sm:$0xff] %v2061_v24  ;;  %v1958_v13 = vadd.f32 %v1918_v62, %v1764_v30  ;;  %2407 = vmatmul.f32.gmra.mxu2 %v2670_v23  ;;  %2569 = vmatmul.f32.gmra.mxu3 %v2478_v16 }
 0x315   : > { %2342 = vmatmul.f32.gmra.mxu1 %v2061_v24 }
 0x316   : > { %v1994_v15 = vmul.f32 %v6130_v52, %v1958_v13  ;;  %v4452_v13 = vld [vmem:[%s7195_s4 + $0x2e8] sm:$0xff] }
 0x317   : > { %v1533_v57 = vpop.f32.mrf.mxu2  ;;  %v1727_v25 = vpop.f32.mrf.mxu3  ;;  %3098 = vmatpush.msra.mxu2 %v4452_v13 }
 0x318   : > { %v2030_v41 = vadd.f32 %v6136_v46, %v1994_v15  ;;  %v1571_v31 = vadd.f32 %v1533_v57, %v1376_v19  ;;  %v1924_v56 = vpop.f32.mrf.mxu0 }
 0x31a   : > { %v2062_v40 = vmax.f32 %v2030_v41, 0.0  ;;  %v1765_v63 = vadd.f32 %v1727_v25, %v1571_v31  ;;  %v6196_v23 = vpop.f32.mrf.mxu1 }
 0x31b   : > { %2766 = vmatmul.f32.gmra.mxu0 %v2673_v22 }
 0x31c   : > { %2138 = vst [vmem:[#allocation2 + $0x169] sm:$0xff] %v2062_v40  ;;  %v1959_v37 = vadd.f32 %v1921_v2, %v1765_v63  ;;  %2410 = vmatmul.f32.gmra.mxu2 %v2671_v29  ;;  %2572 = vmatmul.f32.gmra.mxu3 %v2479_v50  ;;  %v4485_v29 = vld [vmem:[%s7195_s4 + $0x3f0] sm:$0xff]  ;;  %v4484_v63 = vld [vmem:[%s7195_s4 + $0x3e8] sm:$0xff] }
 0x31d   : > { %2345 = vmatmul.f32.gmra.mxu1 %v2062_v40  ;;  %3486 = vmatpush.msra.mxu0 %v4485_v29 }
 0x31e   : > { %v1995_v12 = vmul.f32 %v6130_v52, %v1959_v37 }
 0x31f   : > { %v1536_v0 = vpop.f32.mrf.mxu2  ;;  %v1730_v49 = vpop.f32.mrf.mxu3  ;;  %3487 = vmatpush.msra.mxu0 %v4484_v63  ;;  %v6289_v63 = vld [vmem:[#allocation2 + $0x51] sm:$0xff] }
 0x320   : > { %v2031_v1 = vadd.f32 %v6136_v46, %v1995_v12  ;;  %v1572_v21 = vadd.f32 %v1536_v0, %v1377_v39  ;;  %v1927_v62 = vpop.f32.mrf.mxu0  ;;  %v2677_v12 = vld [vmem:[#allocation2 + $0xf0] sm:$0xff] }
 0x322   : > { %v2063_v20 = vmax.f32 %v2031_v1, 0.0  ;;  %v1766_v60 = vadd.f32 %v1730_v49, %v1572_v21  ;;  %v6208_v38 = vpop.f32.mrf.mxu1  ;;  %v4451_v49 = vld [vmem:[%s7195_s4 + $0x2e0] sm:$0xff] }
 0x323   : > { %2769 = vmatmul.f32.gmra.mxu0 %v2674_v45  ;;  %v4467_v1 = vld [vmem:[%s7195_s4 + $0x360] sm:$0xff]  ;;  %3099 = vmatpush.msra.mxu2 %v4451_v49  ;;  %v4465_v49 = vld [vmem:[%s7195_s4 + $0x350] sm:$0xff] }
 0x324   : > { %2139 = vst [vmem:[#allocation2 + $0x171] sm:$0xff] %v2063_v20  ;;  %v1960_v28 = vadd.f32 %v1924_v56, %v1766_v60  ;;  %2413 = vmatmul.f32.gmra.mxu2 %v2672_v48  ;;  %2575 = vmatmul.f32.gmra.mxu3 %v2480_v32  ;;  %v2675_v48 = vld [vmem:[#allocation2 + $0xd8] sm:$0xff]  ;;  %v2676_v56 = vld [vmem:[#allocation2 + $0xe0] sm:$0xff] }
 0x325   : > { %2348 = vmatmul.f32.gmra.mxu1 %v2063_v20  ;;  %v2483_v21 = vld [vmem:[#allocation2 + $0xda] sm:$0xff]  ;;  %3294 = vmatpush.msra.mxu3 %v4467_v1  ;;  %v2487_v1 = vld [vmem:[#allocation2 + $0x10a] sm:$0xff] }
 0x326   : > { %v1996_v7 = vmul.f32 %v6130_v52, %v1960_v28  ;;  %v2678_v28 = vld [vmem:[#allocation2 + $0xf8] sm:$0xff]  ;;  %3100 = vmatpush.msra.mxu2 %v4450_v11 }
 0x327   : > { %v1539_v18 = vpop.f32.mrf.mxu2  ;;  %v1733_v8 = vpop.f32.mrf.mxu3 }
 0x328   : > { %v2032_v58 = vadd.f32 %v6136_v46, %v1996_v7  ;;  %v1573_v4 = vadd.f32 %v1539_v18, %v1378_v55  ;;  %v2725_v2 = vpop.f32.mrf.mxu0  ;;  %v4483_v55 = vld [vmem:[%s7195_s4 + $0x3e0] sm:$0xff] }
 0x329   : > { %v2484_v7 = vld [vmem:[#allocation2 + $0xe2] sm:$0xff]  ;;  %v6261_v18 = vld [vmem:[#allocation2 + $0x39] sm:$0xff]  ;;  %3488 = vmatpush.msra.mxu0 %v4483_v55 }
 0x32a   : > { %v2064_v24 = vmax.f32 %v2032_v58, 0.0  ;;  %v1767_v30 = vadd.f32 %v1733_v8, %v1573_v4  ;;  %v6220_v16 = vpop.f32.mrf.mxu1  ;;  %v4499_v8 = vld [vmem:[%s7195_s4 + $0x460] sm:$0xff] }
 0x32b   : > { %2772 = vmatmul.f32.gmra.mxu0 %v2675_v48 }
 0x32c   : > { %2140 = vst [vmem:[#allocation2 + $0x181] sm:$0xff] %v2064_v24  ;;  %v1961_v36 = vadd.f32 %v1927_v62, %v1767_v30  ;;  %2416 = vmatmul.f32.gmra.mxu2 %v2673_v22  ;;  %2578 = vmatmul.f32.gmra.mxu3 %v2481_v44  ;;  %v2482_v22 = vld [vmem:[#allocation2 + $0xca] sm:$0xff]  ;;  %v4466_v44 = vld [vmem:[%s7195_s4 + $0x358] sm:$0xff] }
 0x32d   : > { %2918 = vmatmul.f32.vlgmr.msrb.gmra.mxu1 %v2853_v14  ;;  %v6250_v62 = vld [vmem:[#allocation2 + $0x31] sm:$0xff]  ;;  %v6278_v14 = vld [vmem:[#allocation2 + $0x49] sm:$0xff]  ;;  %3295 = vmatpush.msra.mxu3 %v4466_v44 }
 0x32e   : > { %v1997_v42 = vmul.f32 %v6130_v52, %v1961_v36  ;;  %v2854_v52 = vld [vmem:[#allocation2 + $0x21] sm:$0xff]  ;;  %v2485_v36 = vld [vmem:[#allocation2 + $0xf2] sm:$0xff] }
 0x32f   : > { %v2369_v54 = vpop.f32.mrf.mxu2  ;;  %v2531_v19 = vpop.f32.mrf.mxu3  ;;  %3296 = vmatpush.msra.mxu3 %v4465_v49  ;;  %v2683_v44 = vld [vmem:[#allocation2 + $0x138] sm:$0xff] }
 0x330   : > { %v2033_v15 = vadd.f32 %v6136_v46, %v1997_v42  ;;  %v2370_v57 = vadd.f32 %v2369_v54, %v6068_v61  ;;  %v2728_v25 = vpop.f32.mrf.mxu0  ;;  %v4500_v61 = vld [vmem:[%s7195_s4 + $0x468] sm:$0xff] }
 0x331   : > { %3681 = vmatpush.msra.mxu1 %v4500_v61 }
 0x332   : > { %v2065_v41 = vmax.f32 %v2033_v15, 0.0  ;;  %v2627_v31 = vadd.f32 %v2531_v19, %v2370_v57  ;;  %v6231_v40 = vpop.f32.mrf.mxu1 }
 0x333   : > { %2775 = vmatmul.f32.gmra.mxu0 %v2676_v56  ;;  %3682 = vmatpush.msra.mxu1 %v4499_v8  ;;  %v2488_v8 = vld [vmem:[#allocation2 + $0x112] sm:$0xff] }
 0x334   : > { %2141 = vst [vmem:[#allocation2 + $0x189] sm:$0xff] %v2065_v41  ;;  %2419 = vmatmul.f32.gmra.mxu2 %v2674_v45  ;;  %2581 = vmatmul.f32.gmra.mxu3 %v2482_v22  ;;  %v6239_v46 = vadd.f32 %v2725_v2, %v2627_v31  ;;  %v4482_v31 = vld [vmem:[%s7195_s4 + $0x3d8] sm:$0xff] }
 0x335   : > { %2921 = vmatmul.f32.gmra.mxu1 %v2854_v52  ;;  %v4498_v22 = vld [vmem:[%s7195_s4 + $0x458] sm:$0xff]  ;;  %3489 = vmatpush.msra.mxu0 %v4482_v31 }
 0x336   : > { %3683 = vmatpush.msra.mxu1 %v4498_v22 }
 0x337   : > { %v2372_v43 = vpop.f32.mrf.mxu2  ;;  %v2534_v9 = vpop.f32.mrf.mxu3 }
 0x338   : > { %v2373_v50 = vadd.f32 %v2372_v43, %v6078_v35  ;;  %v2731_v37 = vpop.f32.mrf.mxu0 }
 0x33a   : > { %v2628_v39 = vadd.f32 %v2534_v9, %v2373_v50  ;;  %v6242_v0 = vpop.f32.mrf.mxu1 }
 0x33b   : > { %2778 = vmatmul.f32.gmra.mxu0 %v2677_v12 }
 0x33c   : > { %2422 = vmatmul.f32.gmra.mxu2 %v2675_v48  ;;  %2584 = vmatmul.f32.gmra.mxu3 %v2483_v21  ;;  %v6252_v35 = vadd.f32 %v2728_v25, %v2628_v39  ;;  %v2679_v48 = vld [vmem:[#allocation2 + $0x108] sm:$0xff]  ;;  %v2680_v25 = vld [vmem:[#allocation2 + $0x110] sm:$0xff] }
 0x33d   : > { %2924 = vmatmul.f32.gmra.mxu1 %v6250_v62  ;;  %v6306_v21 = vld [vmem:[#allocation2 + $0x61] sm:$0xff] }
 0x33f   : > { %v2375_v20 = vpop.f32.mrf.mxu2  ;;  %v2537_v60 = vpop.f32.mrf.mxu3 }
 0x340   : > { %v2376_v45 = vadd.f32 %v2375_v20, %v6084_v27  ;;  %v2734_v29 = vpop.f32.mrf.mxu0 }
 0x342   : > { %v2629_v32 = vadd.f32 %v2537_v60, %v2376_v45  ;;  %v6256_v26 = vpop.f32.mrf.mxu1 }
 0x343   : > { %2781 = vmatmul.f32.gmra.mxu0 %v2678_v28 }
 0x344   : > { %2425 = vmatmul.f32.gmra.mxu2 %v2676_v56  ;;  %2587 = vmatmul.f32.gmra.mxu3 %v2484_v7  ;;  %v6266_v27 = vadd.f32 %v2731_v37, %v2629_v32  ;;  %v2486_v56 = vld [vmem:[#allocation2 + $0xfa] sm:$0xff]  ;;  %v4481_v7 = vld [vmem:[%s7195_s4 + $0x3d0] sm:$0xff] }
 0x345   : > { %2927 = vmatmul.f32.gmra.mxu1 %v6261_v18  ;;  %v2681_v37 = vld [vmem:[#allocation2 + $0x120] sm:$0xff]  ;;  %3490 = vmatpush.msra.mxu0 %v4481_v7 }
 0x346   : > { %v2491_v7 = vld [vmem:[#allocation2 + $0x13a] sm:$0xff] }
 0x347   : > { %v2378_v58 = vpop.f32.mrf.mxu2  ;;  %v2540_v4 = vpop.f32.mrf.mxu3 }
 0x348   : > { %v2379_v2 = vadd.f32 %v2378_v58, %v6093_v33  ;;  %v2737_v24 = vpop.f32.mrf.mxu0  ;;  %v6317_v58 = vld [vmem:[#allocation2 + $0x69] sm:$0xff] }
 0x34a   : > { %v2630_v30 = vadd.f32 %v2540_v4, %v2379_v2  ;;  %v6270_v13 = vpop.f32.mrf.mxu1  ;;  %v4497_v4 = vld [vmem:[%s7195_s4 + $0x450] sm:$0xff] }
 0x34b   : > { %2784 = vmatmul.f32.gmra.mxu0 %v2679_v48  ;;  %3684 = vmatpush.msra.mxu1 %v4497_v4  ;;  %v4446_v4 = vld [vmem:[%s7195_s4 + $0x2b8] sm:$0xff] }
 0x34c   : > { %2428 = vmatmul.f32.gmra.mxu2 %v2677_v12  ;;  %2590 = vmatmul.f32.gmra.mxu3 %v2485_v36  ;;  %v6280_v33 = vadd.f32 %v2734_v29, %v2630_v30  ;;  %v4449_v12 = vld [vmem:[%s7195_s4 + $0x2d0] sm:$0xff] }
 0x34d   : > { %2930 = vmatmul.f32.gmra.mxu1 %v6278_v14  ;;  %3101 = vmatpush.msra.mxu2 %v4449_v12 }
 0x34f   : > { %v2381_v42 = vpop.f32.mrf.mxu2  ;;  %v2543_v54 = vpop.f32.mrf.mxu3 }
 0x350   : > { %v2382_v19 = vadd.f32 %v2381_v42, %v6099_v51  ;;  %v2740_v15 = vpop.f32.mrf.mxu0  ;;  %v4448_v42 = vld [vmem:[%s7195_s4 + $0x2c8] sm:$0xff] }
 0x351   : > { %3102 = vmatpush.msra.mxu2 %v4448_v42 }
 0x352   : > { %v2631_v57 = vadd.f32 %v2543_v54, %v2382_v19  ;;  %v6284_v41 = vpop.f32.mrf.mxu1  ;;  %v4464_v54 = vld [vmem:[%s7195_s4 + $0x348] sm:$0xff] }
 0x353   : > { %2787 = vmatmul.f32.gmra.mxu0 %v2680_v25  ;;  %v2489_v19 = vld [vmem:[#allocation2 + $0x122] sm:$0xff]  ;;  %3297 = vmatpush.msra.mxu3 %v4464_v54 }
 0x354   : > { %2431 = vmatmul.f32.gmra.mxu2 %v2678_v28  ;;  %2593 = vmatmul.f32.gmra.mxu3 %v2486_v56  ;;  %v6294_v51 = vadd.f32 %v2737_v24, %v2631_v57  ;;  %v2682_v28 = vld [vmem:[#allocation2 + $0x128] sm:$0xff] }
 0x355   : > { %2933 = vmatmul.f32.gmra.mxu1 %v6289_v63 }
 0x357   : > { %v2384_v52 = vpop.f32.mrf.mxu2  ;;  %v2546_v61 = vpop.f32.mrf.mxu3 }
 0x358   : > { %v2385_v43 = vadd.f32 %v2384_v52, %v6108_v10  ;;  %v2743_v9 = vpop.f32.mrf.mxu0  ;;  %v2684_v52 = vld [vmem:[#allocation2 + $0x140] sm:$0xff] }
 0x35a   : > { %v2632_v50 = vadd.f32 %v2546_v61, %v2385_v43  ;;  %v6298_v39 = vpop.f32.mrf.mxu1  ;;  %v4480_v43 = vld [vmem:[%s7195_s4 + $0x3c8] sm:$0xff] }
 0x35b   : > { %2790 = vmatmul.f32.gmra.mxu0 %v2681_v37 }
 0x35c   : > { %2434 = vmatmul.f32.gmra.mxu2 %v2679_v48  ;;  %2596 = vmatmul.f32.gmra.mxu3 %v2487_v1  ;;  %v6308_v10 = vadd.f32 %v2740_v15, %v2632_v50  ;;  %v6334_v15 = vld [vmem:[#allocation2 + $0x79] sm:$0xff]  ;;  %v6345_v50 = vld [vmem:[#allocation2 + $0x81] sm:$0xff] }
 0x35d   : > { %2936 = vmatmul.f32.gmra.mxu1 %v6306_v21  ;;  %3491 = vmatpush.msra.mxu0 %v4480_v43  ;;  %v6400_v43 = vld [vmem:[#allocation2 + $0x99] sm:$0xff] }
 0x35f   : > { %v2387_v20 = vpop.f32.mrf.mxu2  ;;  %v2549_v60 = vpop.f32.mrf.mxu3 }
 0x360   : > { %v2388_v45 = vadd.f32 %v2387_v20, %v6114_v3  ;;  %v2746_v29 = vpop.f32.mrf.mxu0 }
 0x362   : > { %v2633_v32 = vadd.f32 %v2549_v60, %v2388_v45  ;;  %v6312_v55 = vpop.f32.mrf.mxu1  ;;  %v6354_v45 = vld [vmem:[#allocation2 + $0x150] sm:$0xff] }
 0x363   : > { %2793 = vmatmul.f32.gmra.mxu0 %v2682_v28 }
 0x364   : > { %2437 = vmatmul.f32.gmra.mxu2 %v2680_v25  ;;  %2599 = vmatmul.f32.gmra.mxu3 %v2488_v8  ;;  %v6322_v3 = vadd.f32 %v2743_v9, %v2633_v32  ;;  %v2490_v9 = vld [vmem:[#allocation2 + $0x12a] sm:$0xff]  ;;  %v4447_v32 = vld [vmem:[%s7195_s4 + $0x2c0] sm:$0xff] }
 0x365   : > { %2939 = vmatmul.f32.gmra.mxu1 %v6317_v58  ;;  %3103 = vmatpush.msra.mxu2 %v4447_v32  ;;  %v6368_v8 = vld [vmem:[#allocation2 + $0x91] sm:$0xff]  ;;  %v4475_v32 = vld [vmem:[%s7195_s4 + $0x3a0] sm:$0xff] }
 0x367   : > { %v2390_v2 = vpop.f32.mrf.mxu2  ;;  %v2552_v24 = vpop.f32.mrf.mxu3  ;;  %3104 = vmatpush.msra.mxu2 %v4446_v4  ;;  %v4458_v4 = vld [vmem:[%s7195_s4 + $0x318] sm:$0xff] }
 0x368   : > { %v2391_v30 = vadd.f32 %v2390_v2, %v6123_v34  ;;  %v2749_v48 = vpop.f32.mrf.mxu0  ;;  %v4462_v2 = vld [vmem:[%s7195_s4 + $0x338] sm:$0xff] }
 0x36a   : > { %v2634_v11 = vadd.f32 %v2552_v24, %v2391_v30  ;;  %v6326_v36 = vpop.f32.mrf.mxu1  ;;  %v4478_v30 = vld [vmem:[%s7195_s4 + $0x3b8] sm:$0xff] }
 0x36b   : > { %2796 = vmatmul.f32.gmra.mxu0 %v2683_v44 }
 0x36c   : > { %2440 = vmatmul.f32.gmra.mxu2 %v2681_v37  ;;  %2602 = vmatmul.f32.gmra.mxu3 %v2489_v19  ;;  %v6336_v34 = vadd.f32 %v2746_v29, %v2634_v11  ;;  %v4496_v37 = vld [vmem:[%s7195_s4 + $0x448] sm:$0xff]  ;;  %v6383_v19 = vld [vmem:[#allocation2 + $0x158] sm:$0xff] }
 0x36d   : > { %2942 = vmatmul.f32.gmra.mxu1 %v6334_v15 }
 0x36e   : > { %3685 = vmatpush.msra.mxu1 %v4496_v37 }
 0x36f   : > { %v2393_v57 = vpop.f32.mrf.mxu2  ;;  %v2555_v25 = vpop.f32.mrf.mxu3 }
 0x370   : > { %v2394_v31 = vadd.f32 %v2393_v57, %v6139_v17  ;;  %v2752_v56 = vpop.f32.mrf.mxu0 }
 0x372   : > { %v2635_v22 = vadd.f32 %v2555_v25, %v2394_v31  ;;  %v6340_v61 = vpop.f32.mrf.mxu1  ;;  %v4445_v25 = vld [vmem:[%s7195_s4 + $0x2b0] sm:$0xff] }
 0x373   : > { %2799 = vmatmul.f32.gmra.mxu0 %v2684_v52  ;;  %v4461_v31 = vld [vmem:[%s7195_s4 + $0x330] sm:$0xff]  ;;  %3105 = vmatpush.msra.mxu2 %v4445_v25 }
 0x374   : > { %2443 = vmatmul.f32.gmra.mxu2 %v2682_v28  ;;  %2605 = vmatmul.f32.gmra.mxu3 %v2490_v9  ;;  %v6350_v17 = vadd.f32 %v2749_v48, %v2635_v22  ;;  %v4463_v28 = vld [vmem:[%s7195_s4 + $0x340] sm:$0xff]  ;;  %v4444_v22 = vld [vmem:[%s7195_s4 + $0x2a8] sm:$0xff] }
 0x375   : > { %2945 = vmatmul.f32.gmra.mxu1 %v6345_v50  ;;  %3298 = vmatpush.msra.mxu3 %v4463_v28  ;;  %v4460_v9 = vld [vmem:[%s7195_s4 + $0x328] sm:$0xff]  ;;  %v4442_v28 = vld [vmem:[%s7195_s4 + $0x298] sm:$0xff] }
 0x376   : > { %3106 = vmatpush.msra.mxu2 %v4444_v22  ;;  %v6442_v25 = vld [vmem:[#allocation2 + $0xa9] sm:$0xff] }
 0x377   : > { %v2396_v12 = vpop.f32.mrf.mxu2  ;;  %v2558_v49 = vpop.f32.mrf.mxu3  ;;  %3299 = vmatpush.msra.mxu3 %v4462_v2  ;;  %v4472_v22 = vld [vmem:[%s7195_s4 + $0x388] sm:$0xff] }
 0x378   : > { %v2397_v1 = vadd.f32 %v2396_v12, %v6148_v6  ;;  %v2755_v20 = vpop.f32.mrf.mxu0  ;;  %v4479_v6 = vld [vmem:[%s7195_s4 + $0x3c0] sm:$0xff]  ;;  %v4476_v12 = vld [vmem:[%s7195_s4 + $0x3a8] sm:$0xff] }
 0x379   : > { %3492 = vmatpush.msra.mxu0 %v4479_v6  ;;  %3300 = vmatpush.msra.mxu3 %v4461_v31  ;;  %v4473_v31 = vld [vmem:[%s7195_s4 + $0x390] sm:$0xff] }
 0x37a   : > { %v2636_v60 = vadd.f32 %v2558_v49, %v2397_v1  ;;  %v6356_v29 = vpop.f32.mrf.mxu1  ;;  %v4495_v49 = vld [vmem:[%s7195_s4 + $0x440] sm:$0xff] }
 0x37b   : > { %2802 = vmatmul.f32.gmra.mxu0 %v6354_v45  ;;  %v4459_v1 = vld [vmem:[%s7195_s4 + $0x320] sm:$0xff]  ;;  %3301 = vmatpush.msra.mxu3 %v4460_v9 }
 0x37c   : > { %2446 = vmatmul.f32.gmra.mxu2 %v2683_v44  ;;  %2608 = vmatmul.f32.gmra.mxu3 %v2491_v7  ;;  %v6376_v24 = vadd.f32 %v2752_v56, %v2636_v60  ;;  %v2492_v56 = vld [vmem:[#allocation2 + $0x142] sm:$0xff] }
 0x37d   : > { %2948 = vmatmul.f32.gmra.mxu1 %v6368_v8  ;;  %3493 = vmatpush.msra.mxu0 %v4478_v30  ;;  %v2687_v30 = vld [vmem:[#allocation2 + $0x168] sm:$0xff] }
 0x37e   : > { %3686 = vmatpush.msra.mxu1 %v4495_v49  ;;  %3302 = vmatpush.msra.mxu3 %v4459_v1 }
 0x37f   : > { %v2399_v48 = vpop.f32.mrf.mxu2  ;;  %v2561_v11 = vpop.f32.mrf.mxu3 }
 0x380   : > { %v2400_v44 = vadd.f32 %v2399_v48, %v6154_v5  ;;  %v2758_v42 = vpop.f32.mrf.mxu0  ;;  %v4477_v5 = vld [vmem:[%s7195_s4 + $0x3b0] sm:$0xff]  ;;  %3303 = vmatpush.msra.mxu3 %v4458_v4  ;;  %v4494_v4 = vld [vmem:[%s7195_s4 + $0x438] sm:$0xff] }
 0x381   : > { %3494 = vmatpush.msra.mxu0 %v4477_v5  ;;  %v4440_v5 = vld [vmem:[%s7195_s4 + $0x288] sm:$0xff]  ;;  %3687 = vmatpush.msra.mxu1 %v4494_v4 }
 0x382   : > { %v2637_v54 = vadd.f32 %v2561_v11, %v2400_v44  ;;  %v6385_v57 = vpop.f32.mrf.mxu1  ;;  %v4474_v11 = vld [vmem:[%s7195_s4 + $0x398] sm:$0xff] }
 0x383   : > { %2805 = vmatmul.f32.gmra.mxu0 %v6383_v19  ;;  %v2493_v44 = vld [vmem:[#allocation2 + $0x152] sm:$0xff] }
 0x384   : > { %2449 = vmatmul.f32.gmra.mxu2 %v2684_v52  ;;  %2611 = vmatmul.f32.gmra.mxu3 %v2492_v56  ;;  %v6405_v37 = vadd.f32 %v2755_v20, %v2637_v54  ;;  %v4443_v52 = vld [vmem:[%s7195_s4 + $0x2a0] sm:$0xff]  ;;  %v4457_v54 = vld [vmem:[%s7195_s4 + $0x310] sm:$0xff] }
 0x385   : > { %2951 = vmatmul.f32.gmra.mxu1 %v6400_v43  ;;  %3495 = vmatpush.msra.mxu0 %v4476_v12  ;;  %v4439_v12 = vld [vmem:[%s7195_s4 + $0x280] sm:$0xff] }
 0x386   : > { %3107 = vmatpush.msra.mxu2 %v4443_v52  ;;  %3304 = vmatpush.msra.mxu3 %v4457_v54  ;;  %v4455_v52 = vld [vmem:[%s7195_s4 + $0x300] sm:$0xff] }
 0x387   : > { %v2402_v20 = vpop.f32.mrf.mxu2  ;;  %v2564_v60 = vpop.f32.mrf.mxu3  ;;  %3496 = vmatpush.msra.mxu0 %v4475_v32 }
 0x388   : > { %v2403_v7 = vadd.f32 %v2402_v20, %v6163_v53  ;;  %v2761_v6 = vpop.f32.mrf.mxu0  ;;  %3108 = vmatpush.msra.mxu2 %v4442_v28  ;;  %v4441_v53 = vld [vmem:[%s7195_s4 + $0x290] sm:$0xff]  ;;  %v4471_v28 = vld [vmem:[%s7195_s4 + $0x380] sm:$0xff] }
 0x389   : > { %3497 = vmatpush.msra.mxu0 %v4474_v11 }
 0x38a   : > { %v2638_v2 = vadd.f32 %v2564_v60, %v2403_v7  ;;  %v6430_v48 = vpop.f32.mrf.mxu1  ;;  %3109 = vmatpush.msra.mxu2 %v4441_v53  ;;  %v2688_v60 = vld [vmem:[#allocation2 + $0x170] sm:$0xff]  ;;  %v2494_v7 = vld [vmem:[#allocation2 + $0x15a] sm:$0xff] }
 0x38b   : > { %2808 = vmatmul.f32.gmra.mxu0 %v2687_v30 }
 0x38c   : > { %2452 = vmatmul.f32.gmra.mxu2 %v6354_v45  ;;  %2614 = vmatmul.f32.gmra.mxu3 %v2493_v44  ;;  %v6447_v56 = vadd.f32 %v2758_v42, %v2638_v2  ;;  %v4456_v45 = vld [vmem:[%s7195_s4 + $0x308] sm:$0xff] }
 0x38d   : > { %2954 = vmatmul.f32.gmra.mxu1 %v6442_v25  ;;  %3498 = vmatpush.msra.mxu0 %v4473_v31 }
 0x38e   : > { %7210 = vst [vmem:[#allocation3_spill] sm:$0xff] %v6447_v56  ;;  %3110 = vmatpush.msra.mxu2 %v4440_v5  ;;  %3305 = vmatpush.msra.mxu3 %v4456_v45  ;;  %v2495_v45 = vld [vmem:[#allocation2 + $0x16a] sm:$0xff]  ;;  %v6643_v56 = vld [vmem:[#allocation2 + $0x9a] sm:$0xff] }
 0x38f   : > { %v2405_v9 = vpop.f32.mrf.mxu2  ;;  %v2567_v42 = vpop.f32.mrf.mxu3  ;;  %3499 = vmatpush.msra.mxu0 %v4472_v22  ;;  %v6483_v22 = vld [vmem:[#allocation2 + $0xc1] sm:$0xff] }
 0x390   : > { %v2406_v49 = vadd.f32 %v2405_v9, %v6169_v59  ;;  %v2764_v1 = vpop.f32.mrf.mxu0  ;;  %3111 = vmatpush.msra.mxu2 %v4439_v12  ;;  %3306 = vmatpush.msra.mxu3 %v4455_v52  ;;  %v6472_v59 = vld [vmem:[#allocation2 + $0xb1] sm:$0xff] }
 0x391   : > { %3500 = vmatpush.msra.mxu0 %v4471_v28  ;;  %v2496_v28 = vld [vmem:[#allocation2 + $0x172] sm:$0xff] }
 0x392   : > { %v2639_v20 = vadd.f32 %v2567_v42, %v2406_v49  ;;  %v6466_v32 = vpop.f32.mrf.mxu1  ;;  %v2690_v49 = vld [vmem:[#allocation2 + $0x188] sm:$0xff] }
 0x393   : > { %2811 = vmatmul.f32.gmra.mxu0 %v2688_v60 }
 0x394   : > { %2455 = vmatmul.f32.gmra.mxu2 %v6383_v19  ;;  %2617 = vmatmul.f32.gmra.mxu3 %v2494_v7  ;;  %v6477_v2 = vadd.f32 %v2761_v6, %v2639_v20  ;;  %v2689_v19 = vld [vmem:[#allocation2 + $0x180] sm:$0xff] }
 0x395   : > { %2957 = vmatmul.f32.gmra.mxu1 %v6472_v59 }
 0x396   : > { %7211 = vst [vmem:[#allocation4_spill] sm:$0xff] %v6477_v2  ;;  %v3252_v2 = vld [vmem:[#allocation2 + $0xa8] sm:$0xff] }
 0x397   : > { %v2408_v11 = vpop.f32.mrf.mxu2  ;;  %v2570_v44 = vpop.f32.mrf.mxu3 }
 0x398   : > { %v2409_v53 = vadd.f32 %v2408_v11, %v6178_v47  ;;  %v2767_v54 = vpop.f32.mrf.mxu0 }
 0x39a   : > { %v2640_v31 = vadd.f32 %v2570_v44, %v2409_v53  ;;  %v6481_v5 = vpop.f32.mrf.mxu1 }
 0x39b   : > { %2814 = vmatmul.f32.gmra.mxu0 %v2689_v19  ;;  %v3242_v19 = vld [vmem:[#allocation2 + $0x30] sm:$0xff] }
 0x39c   : > { %2458 = vmatmul.f32.gmra.mxu2 %v2687_v30  ;;  %2620 = vmatmul.f32.gmra.mxu3 %v2495_v45  ;;  %v6485_v6 = vadd.f32 %v2764_v1, %v2640_v31  ;;  %v6491_v30 = vld [vmem:[#allocation2 + $0xc9] sm:$0xff]  ;;  %v6503_v45 = vld [vmem:[#allocation2 + $0xd9] sm:$0xff] }
 0x39d   : > { %2960 = vmatmul.f32.gmra.mxu1 %v6483_v22  ;;  %v4493_v1 = vld [vmem:[%s7195_s4 + $0x430] sm:$0xff] }
 0x39e   : > { %7212 = vst [vmem:[#allocation5_spill] sm:$0xff] %v6485_v6  ;;  %3688 = vmatpush.msra.mxu1 %v4493_v1  ;;  %v3243_v1 = vld [vmem:[#allocation2 + $0x38] sm:$0xff]  ;;  %v6616_v6 = vld [vmem:[#allocation2 + $0x82] sm:$0xff] }
 0x39f   : > { %v2411_v9 = vpop.f32.mrf.mxu2  ;;  %v2573_v42 = vpop.f32.mrf.mxu3 }
 0x3a0   : > { %v2412_v12 = vadd.f32 %v2411_v9, %v6196_v23  ;;  %v2770_v47 = vpop.f32.mrf.mxu0 }
 0x3a2   : > { %v2641_v52 = vadd.f32 %v2573_v42, %v2412_v12  ;;  %v6489_v20 = vpop.f32.mrf.mxu1 }
 0x3a3   : > { %2817 = vmatmul.f32.gmra.mxu0 %v2690_v49 }
 0x3a4   : > { %2461 = vmatmul.f32.gmra.mxu2 %v2688_v60  ;;  %2623 = vmatmul.f32.gmra.mxu3 %v2496_v28  ;;  %v6496_v7 = vadd.f32 %v2767_v54, %v2641_v52  ;;  %v3047_v60 = vld [vmem:[#allocation2 + $0x1a] sm:$0xff]  ;;  %v3048_v28 = vld [vmem:[#allocation2 + $0x22] sm:$0xff] }
 0x3a5   : > { %2963 = vmatmul.f32.gmra.mxu1 %v6491_v30 }
 0x3a6   : > { %7213 = vst [vmem:[#allocation6_spill] sm:$0xff] %v6496_v7  ;;  %v3250_v7 = vld [vmem:[#allocation2 + $0x90] sm:$0xff] }
 0x3a7   : > { %v2414_v23 = vpop.f32.mrf.mxu2  ;;  %v2576_v4 = vpop.f32.mrf.mxu3 }
 0x3a8   : > { %v2415_v11 = vadd.f32 %v2414_v23, %v6208_v38  ;;  %v2773_v44 = vpop.f32.mrf.mxu0 }
 0x3aa   : > { %v2642_v53 = vadd.f32 %v2576_v4, %v2415_v11  ;;  %v6500_v31 = vpop.f32.mrf.mxu1 }
 0x3ab   : > { %3501 = vmatmul.f32.vlgmr.msra.gmra.mxu0 %v6250_v62  ;;  %v6512_v62 = vld [vmem:[#allocation2 + $0xe1] sm:$0xff] }
 0x3ac   : > { %3112 = vmatmul.f32.vlgmr.msra.gmra.mxu2 %v3047_v60  ;;  %3307 = vmatmul.f32.vlgmr.msra.gmra.mxu3 %v3242_v19  ;;  %v6505_v54 = vadd.f32 %v2770_v47, %v2642_v53  ;;  %v4492_v47 = vld [vmem:[%s7195_s4 + $0x428] sm:$0xff]  ;;  %v6523_v19 = vld [vmem:[#allocation2 + $0x32] sm:$0xff] }
 0x3ad   : > { %2966 = vmatmul.f32.gmra.mxu1 %v6503_v45 }
 0x3ae   : > { %7214 = vst [vmem:[#allocation7_spill] sm:$0xff] %v6505_v54  ;;  %3689 = vmatpush.msra.mxu1 %v4492_v47  ;;  %v6589_v54 = vld [vmem:[#allocation2 + $0x6a] sm:$0xff] }
 0x3af   : > { %v2417_v9 = vpop.f32.mrf.mxu2  ;;  %v2579_v42 = vpop.f32.mrf.mxu3 }
 0x3b0   : > { %v2418_v38 = vadd.f32 %v2417_v9, %v6220_v16  ;;  %v2776_v12 = vpop.f32.mrf.mxu0  ;;  %v3244_v9 = vld [vmem:[#allocation2 + $0x48] sm:$0xff] }
 0x3b2   : > { %v2643_v52 = vadd.f32 %v2579_v42, %v2418_v38  ;;  %v6509_v49 = vpop.f32.mrf.mxu1 }
 0x3b3   : > { %3504 = vmatmul.f32.gmra.mxu0 %v6261_v18 }
 0x3b4   : > { %3115 = vmatmul.f32.gmra.mxu2 %v3048_v28  ;;  %3310 = vmatmul.f32.gmra.mxu3 %v3243_v1  ;;  %v6517_v23 = vadd.f32 %v2773_v44, %v2643_v52  ;;  %v6527_v44 = vld [vmem:[#allocation2 + $0xf1] sm:$0xff] }
 0x3b5   : > { %2969 = vmatmul.f32.gmra.mxu1 %v6512_v62 }
 0x3b6   : > { %7215 = vst [vmem:[#allocation8_spill] sm:$0xff] %v6517_v23  ;;  %v3248_v23 = vld [vmem:[#allocation2 + $0x78] sm:$0xff] }
 0x3b7   : > { %v2420_v16 = vpop.f32.mrf.mxu2  ;;  %v2582_v4 = vpop.f32.mrf.mxu3 }
 0x3b8   : > { %v2421_v11 = vadd.f32 %v2420_v16, %v6231_v40  ;;  %v2779_v53 = vpop.f32.mrf.mxu0  ;;  %v6535_v16 = vld [vmem:[#allocation2 + $0x3a] sm:$0xff] }
 0x3ba   : > { %v2644_v60 = vadd.f32 %v2582_v4, %v2421_v11  ;;  %v6521_v18 = vpop.f32.mrf.mxu1  ;;  %v4491_v4 = vld [vmem:[%s7195_s4 + $0x420] sm:$0xff] }
 0x3bb   : > { %3507 = vmatmul.f32.gmra.mxu0 %v6278_v14  ;;  %v3245_v14 = vld [vmem:[#allocation2 + $0x50] sm:$0xff]  ;;  %3690 = vmatpush.msra.mxu1 %v4491_v4 }
 0x3bc   : > { %3118 = vmatmul.f32.gmra.mxu2 %v6523_v19  ;;  %3313 = vmatmul.f32.gmra.mxu3 %v3244_v9  ;;  %v6529_v42 = vadd.f32 %v2776_v12, %v2644_v60  ;;  %v6539_v12 = vld [vmem:[#allocation2 + $0xf9] sm:$0xff] }
 0x3bd   : > { %2972 = vmatmul.f32.gmra.mxu1 %v6527_v44 }
 0x3be   : > { %7216 = vst [vmem:[#allocation9_spill] sm:$0xff] %v6529_v42  ;;  %v6562_v42 = vld [vmem:[#allocation2 + $0x52] sm:$0xff] }
 0x3bf   : > { %v2423_v38 = vpop.f32.mrf.mxu2  ;;  %v2585_v40 = vpop.f32.mrf.mxu3 }
 0x3c0   : > { %v2424_v52 = vadd.f32 %v2423_v38, %v6242_v0  ;;  %v2782_v28 = vpop.f32.mrf.mxu0 }
 0x3c2   : > { %v2645_v1 = vadd.f32 %v2585_v40, %v2424_v52  ;;  %v6533_v47 = vpop.f32.mrf.mxu1  ;;  %v6550_v52 = vld [vmem:[#allocation2 + $0x4a] sm:$0xff] }
 0x3c3   : > { %3510 = vmatmul.f32.gmra.mxu0 %v6289_v63 }
 0x3c4   : > { %3121 = vmatmul.f32.gmra.mxu2 %v6535_v16  ;;  %3316 = vmatmul.f32.gmra.mxu3 %v3245_v14  ;;  %v6544_v11 = vadd.f32 %v2779_v53, %v2645_v1  ;;  %v3246_v14 = vld [vmem:[#allocation2 + $0x60] sm:$0xff]  ;;  %v6554_v53 = vld [vmem:[#allocation2 + $0x109] sm:$0xff] }
 0x3c5   : > { %2975 = vmatmul.f32.gmra.mxu1 %v6539_v12 }
 0x3c6   : > { %7217 = vst [vmem:[#allocation10_spill] sm:$0xff] %v6544_v11 }
 0x3c7   : > { %v2426_v0 = vpop.f32.mrf.mxu2  ;;  %v2588_v60 = vpop.f32.mrf.mxu3 }
 0x3c8   : > { %v2427_v9 = vadd.f32 %v2426_v0, %v6256_v26  ;;  %v2785_v38 = vpop.f32.mrf.mxu0 }
 0x3ca   : > { %v2646_v63 = vadd.f32 %v2588_v60, %v2427_v9  ;;  %v6548_v40 = vpop.f32.mrf.mxu1 }
 0x3cb   : > { %3513 = vmatmul.f32.gmra.mxu0 %v6306_v21  ;;  %v3247_v21 = vld [vmem:[#allocation2 + $0x68] sm:$0xff] }
 0x3cc   : > { %3124 = vmatmul.f32.gmra.mxu2 %v6550_v52  ;;  %3319 = vmatmul.f32.gmra.mxu3 %v3246_v14  ;;  %v6556_v1 = vadd.f32 %v2782_v28, %v2646_v63  ;;  %v6566_v28 = vld [vmem:[#allocation2 + $0x111] sm:$0xff] }
 0x3cd   : > { %2978 = vmatmul.f32.gmra.mxu1 %v6554_v53  ;;  %v4490_v63 = vld [vmem:[%s7195_s4 + $0x418] sm:$0xff] }
 0x3ce   : > { %7218 = vst [vmem:[#allocation11_spill] sm:$0xff] %v6556_v1  ;;  %3691 = vmatpush.msra.mxu1 %v4490_v63 }
 0x3cf   : > { %v2429_v4 = vpop.f32.mrf.mxu2  ;;  %v2591_v26 = vpop.f32.mrf.mxu3 }
 0x3d0   : > { %v2430_v0 = vadd.f32 %v2429_v4, %v6270_v13  ;;  %v2788_v60 = vpop.f32.mrf.mxu0 }
 0x3d2   : > { %v2647_v9 = vadd.f32 %v2591_v26, %v2430_v0  ;;  %v6560_v11 = vpop.f32.mrf.mxu1 }
 0x3d3   : > { %3516 = vmatmul.f32.gmra.mxu0 %v6317_v58 }
 0x3d4   : > { %3127 = vmatmul.f32.gmra.mxu2 %v6562_v42  ;;  %3322 = vmatmul.f32.gmra.mxu3 %v3247_v21  ;;  %v6571_v14 = vadd.f32 %v2785_v38, %v2647_v9  ;;  %v6577_v21 = vld [vmem:[#allocation2 + $0x62] sm:$0xff] }
 0x3d5   : > { %2981 = vmatmul.f32.gmra.mxu1 %v6566_v28  ;;  %v6581_v38 = vld [vmem:[#allocation2 + $0x121] sm:$0xff] }
 0x3d6   : > { %7219 = vst [vmem:[#allocation12_spill] sm:$0xff] %v6571_v14 }
 0x3d7   : > { %v2432_v13 = vpop.f32.mrf.mxu2  ;;  %v2594_v4 = vpop.f32.mrf.mxu3 }
 0x3d8   : > { %v2433_v26 = vadd.f32 %v2432_v13, %v6284_v41  ;;  %v2791_v0 = vpop.f32.mrf.mxu0 }
 0x3da   : > { %v2648_v58 = vadd.f32 %v2594_v4, %v2433_v26  ;;  %v6575_v1 = vpop.f32.mrf.mxu1 }
 0x3db   : > { %3519 = vmatmul.f32.gmra.mxu0 %v6334_v15  ;;  %v3249_v15 = vld [vmem:[#allocation2 + $0x80] sm:$0xff] }
 0x3dc   : > { %3130 = vmatmul.f32.gmra.mxu2 %v6577_v21  ;;  %3325 = vmatmul.f32.gmra.mxu3 %v3248_v23  ;;  %v6583_v9 = vadd.f32 %v2788_v60, %v2648_v58  ;;  %v6593_v23 = vld [vmem:[#allocation2 + $0x129] sm:$0xff] }
 0x3dd   : > { %2984 = vmatmul.f32.gmra.mxu1 %v6581_v38  ;;  %v4489_v60 = vld [vmem:[%s7195_s4 + $0x410] sm:$0xff] }
 0x3de   : > { %7220 = vst [vmem:[#allocation13_spill] sm:$0xff] %v6583_v9  ;;  %3692 = vmatpush.msra.mxu1 %v4489_v60 }
 0x3df   : > { %v2435_v63 = vpop.f32.mrf.mxu2  ;;  %v2597_v41 = vpop.f32.mrf.mxu3 }
 0x3e0   : > { %v2436_v13 = vadd.f32 %v2435_v63, %v6298_v39  ;;  %v2794_v4 = vpop.f32.mrf.mxu0 }
 0x3e2   : > { %v2649_v26 = vadd.f32 %v2597_v41, %v2436_v13  ;;  %v6587_v14 = vpop.f32.mrf.mxu1 }
 0x3e3   : > { %3522 = vmatmul.f32.gmra.mxu0 %v6345_v50 }
 0x3e4   : > { %3133 = vmatmul.f32.gmra.mxu2 %v6589_v54  ;;  %3328 = vmatmul.f32.gmra.mxu3 %v3249_v15  ;;  %v6598_v58 = vadd.f32 %v2791_v0, %v2649_v26  ;;  %v6604_v15 = vld [vmem:[#allocation2 + $0x7a] sm:$0xff] }
 0x3e5   : > { %2987 = vmatmul.f32.gmra.mxu1 %v6593_v23  ;;  %v6608_v0 = vld [vmem:[#allocation2 + $0x139] sm:$0xff] }
 0x3e6   : > { %7221 = vst [vmem:[#allocation14_spill] sm:$0xff] %v6598_v58 }
 0x3e7   : > { %v2438_v39 = vpop.f32.mrf.mxu2  ;;  %v2600_v63 = vpop.f32.mrf.mxu3 }
 0x3e8   : > { %v2439_v41 = vadd.f32 %v2438_v39, %v6312_v55  ;;  %v2797_v13 = vpop.f32.mrf.mxu0 }
 0x3ea   : > { %v2650_v50 = vadd.f32 %v2600_v63, %v2439_v41  ;;  %v6602_v9 = vpop.f32.mrf.mxu1 }
 0x3eb   : > { %3525 = vmatmul.f32.gmra.mxu0 %v6368_v8  ;;  %v3251_v8 = vld [vmem:[#allocation2 + $0x98] sm:$0xff] }
 0x3ec   : > { %3136 = vmatmul.f32.gmra.mxu2 %v6604_v15  ;;  %3331 = vmatmul.f32.gmra.mxu3 %v3250_v7  ;;  %v6610_v26 = vadd.f32 %v2794_v4, %v2650_v50  ;;  %v6620_v7 = vld [vmem:[#allocation2 + $0x141] sm:$0xff] }
 0x3ed   : > { %2990 = vmatmul.f32.gmra.mxu1 %v6608_v0  ;;  %v4488_v4 = vld [vmem:[%s7195_s4 + $0x408] sm:$0xff] }
 0x3ee   : > { %7222 = vst [vmem:[#allocation15_spill] sm:$0xff] %v6610_v26  ;;  %3693 = vmatpush.msra.mxu1 %v4488_v4 }
 0x3ef   : > { %v2441_v60 = vpop.f32.mrf.mxu2  ;;  %v2603_v55 = vpop.f32.mrf.mxu3 }
 0x3f0   : > { %v2442_v39 = vadd.f32 %v2441_v60, %v6326_v36  ;;  %v2800_v63 = vpop.f32.mrf.mxu0 }
 0x3f2   : > { %v2651_v41 = vadd.f32 %v2603_v55, %v2442_v39  ;;  %v6614_v58 = vpop.f32.mrf.mxu1 }
 0x3f3   : > { %3528 = vmatmul.f32.gmra.mxu0 %v6400_v43 }
 0x3f4   : > { %3139 = vmatmul.f32.gmra.mxu2 %v6616_v6  ;;  %3334 = vmatmul.f32.gmra.mxu3 %v3251_v8  ;;  %v6625_v50 = vadd.f32 %v2797_v13, %v2651_v41  ;;  %v6631_v8 = vld [vmem:[#allocation2 + $0x92] sm:$0xff] }
 0x3f5   : > { %2993 = vmatmul.f32.gmra.mxu1 %v6620_v7  ;;  %v6635_v13 = vld [vmem:[#allocation2 + $0x151] sm:$0xff] }
 0x3f6   : > { %7223 = vst [vmem:[#allocation16_spill] sm:$0xff] %v6625_v50 }
 0x3f7   : > { %v2444_v36 = vpop.f32.mrf.mxu2  ;;  %v2606_v60 = vpop.f32.mrf.mxu3 }
 0x3f8   : > { %v2445_v55 = vadd.f32 %v2444_v36, %v6340_v61  ;;  %v2803_v39 = vpop.f32.mrf.mxu0 }
 0x3fa   : > { %v2652_v43 = vadd.f32 %v2606_v60, %v2445_v55  ;;  %v6629_v26 = vpop.f32.mrf.mxu1 }
 0x3fb   : > { %3531 = vmatmul.f32.gmra.mxu0 %v6442_v25  ;;  %v3253_v25 = vld [vmem:[#allocation2 + $0xb0] sm:$0xff] }
 0x3fc   : > { %3142 = vmatmul.f32.gmra.mxu2 %v6631_v8  ;;  %3337 = vmatmul.f32.gmra.mxu3 %v3252_v2  ;;  %v6637_v41 = vadd.f32 %v2800_v63, %v2652_v43  ;;  %v6647_v2 = vld [vmem:[#allocation2 + $0x159] sm:$0xff] }
 0x3fd   : > { %2996 = vmatmul.f32.gmra.mxu1 %v6635_v13  ;;  %v4487_v63 = vld [vmem:[%s7195_s4 + $0x400] sm:$0xff] }
 0x3fe   : > { %7224 = vst [vmem:[#allocation17_spill] sm:$0xff] %v6637_v41  ;;  %3694 = vmatpush.msra.mxu1 %v4487_v63  ;;  %v6658_v41 = vld [vmem:[#allocation2 + $0xaa] sm:$0xff] }
 0x3ff   : > { %v2447_v4 = vpop.f32.mrf.mxu2  ;;  %v2609_v61 = vpop.f32.mrf.mxu3 }
 0x400   : > { %v2448_v36 = vadd.f32 %v2447_v4, %v6356_v29  ;;  %v2806_v55 = vpop.f32.mrf.mxu0 }
 0x402   : > { %v2653_v60 = vadd.f32 %v2609_v61, %v2448_v36  ;;  %v6641_v50 = vpop.f32.mrf.mxu1 }
 0x403   : > { %7225 = vst [vmem:[#allocation18_spill] sm:$0xff] %v6641_v50  ;;  %3534 = vmatmul.f32.gmra.mxu0 %v6472_v59 }
 0x404   : > { %3145 = vmatmul.f32.gmra.mxu2 %v6643_v56  ;;  %3340 = vmatmul.f32.gmra.mxu3 %v3253_v25  ;;  %v6652_v43 = vadd.f32 %v2803_v39, %v2653_v60  ;;  %v3254_v25 = vld [vmem:[#allocation2 + $0xc0] sm:$0xff]  ;;  %v6662_v39 = vld [vmem:[#allocation2 + $0x169] sm:$0xff] }
 0x405   : > { %2999 = vmatmul.f32.gmra.mxu1 %v6647_v2 }
 0x406   : > { %7226 = vst [vmem:[#allocation19_spill] sm:$0xff] %v6652_v43  ;;  %v6670_v43 = vld [vmem:[#allocation2 + $0xb2] sm:$0xff] }
 0x407   : > { %v2450_v29 = vpop.f32.mrf.mxu2  ;;  %v2612_v4 = vpop.f32.mrf.mxu3 }
 0x408   : > { %v2451_v61 = vadd.f32 %v2450_v29, %v6385_v57  ;;  %v2809_v50 = vpop.f32.mrf.mxu0 }
 0x40a   : > { %v2654_v36 = vadd.f32 %v2612_v4, %v2451_v61  ;;  %v6656_v59 = vpop.f32.mrf.mxu1 }
 0x40b   : > { %7227 = vst [vmem:[#allocation20_spill] sm:$0xff] %v6656_v59  ;;  %3537 = vmatmul.f32.gmra.mxu0 %v6483_v22  ;;  %v3255_v22 = vld [vmem:[#allocation2 + $0xc8] sm:$0xff] }
 0x40c   : > { %3148 = vmatmul.f32.gmra.mxu2 %v6658_v41  ;;  %3343 = vmatmul.f32.gmra.mxu3 %v3254_v25  ;;  %v6664_v60 = vadd.f32 %v2806_v55, %v2654_v36  ;;  %v6674_v25 = vld [vmem:[#allocation2 + $0x171] sm:$0xff] }
 0x40d   : > { %3002 = vmatmul.f32.gmra.mxu1 %v6662_v39 }
 0x40e   : > { %7228 = vst [vmem:[#allocation21_spill] sm:$0xff] %v6664_v60 }
 0x40f   : > { %v2453_v63 = vpop.f32.mrf.mxu2  ;;  %v2615_v57 = vpop.f32.mrf.mxu3 }
 0x410   : > { %v2454_v29 = vadd.f32 %v2453_v63, %v6430_v48  ;;  %v2812_v36 = vpop.f32.mrf.mxu0 }
 0x412   : > { %v2655_v4 = vadd.f32 %v2615_v57, %v2454_v29  ;;  %v6668_v61 = vpop.f32.mrf.mxu1 }
 0x413   : > { %7229 = vst [vmem:[#allocation22_spill] sm:$0xff] %v6668_v61  ;;  %3540 = vmatmul.f32.gmra.mxu0 %v6491_v30  ;;  %v6682_v61 = vld [vmem:[#allocation2 + $0xc2] sm:$0xff]  ;;  %v3256_v30 = vld [vmem:[#allocation2 + $0xd8] sm:$0xff] }
 0x414   : > { %3151 = vmatmul.f32.gmra.mxu2 %v6670_v43  ;;  %3346 = vmatmul.f32.gmra.mxu3 %v3255_v22  ;;  %v6676_v55 = vadd.f32 %v2809_v50, %v2655_v4  ;;  %v6686_v50 = vld [vmem:[#allocation2 + $0x181] sm:$0xff] }
 0x415   : > { %3005 = vmatmul.f32.gmra.mxu1 %v6674_v25 }
 0x416   : > { %7230 = vst [vmem:[#allocation23_spill] sm:$0xff] %v6676_v55 }
 0x417   : > { %v2456_v60 = vpop.f32.mrf.mxu2  ;;  %v2618_v48 = vpop.f32.mrf.mxu3 }
 0x418   : > { %v2457_v63 = vadd.f32 %v2456_v60, %v6466_v32  ;;  %v2815_v60 = vpop.f32.mrf.mxu0 }
 0x41a   : > { %v2656_v57 = vadd.f32 %v2618_v48, %v2457_v63  ;;  %v6680_v29 = vpop.f32.mrf.mxu1 }
 0x41b   : > { %7231 = vst [vmem:[#allocation24_spill] sm:$0xff] %v6680_v29  ;;  %3543 = vmatmul.f32.gmra.mxu0 %v6503_v45  ;;  %v6694_v29 = vld [vmem:[#allocation2 + $0xca] sm:$0xff]  ;;  %v3257_v45 = vld [vmem:[#allocation2 + $0xe0] sm:$0xff] }
 0x41c   : > { %3154 = vmatmul.f32.gmra.mxu2 %v6682_v61  ;;  %3349 = vmatmul.f32.gmra.mxu3 %v3256_v30  ;;  %v6688_v4 = vadd.f32 %v2812_v36, %v2656_v57  ;;  %v6698_v36 = vld [vmem:[#allocation2 + $0x189] sm:$0xff] }
 0x41d   : > { %3008 = vmatmul.f32.gmra.mxu1 %v6686_v50 }
 0x41e   : > { %7232 = vst [vmem:[#allocation25_spill] sm:$0xff] %v6688_v4 }
 0x41f   : > { %v2459_v22 = vpop.f32.mrf.mxu2  ;;  %v2621_v55 = vpop.f32.mrf.mxu3 }
 0x420   : > { %v2460_v32 = vadd.f32 %v2459_v22, %v6481_v5  ;;  %v2818_v4 = vpop.f32.mrf.mxu0 }
 0x422   : > { %v2657_v48 = vadd.f32 %v2621_v55, %v2460_v32  ;;  %v6692_v63 = vpop.f32.mrf.mxu1 }
 0x423   : > { %7233 = vst [vmem:[#allocation26_spill] sm:$0xff] %v6692_v63  ;;  %3546 = vmatmul.f32.gmra.mxu0 %v6512_v62  ;;  %v6706_v63 = vld [vmem:[#allocation2 + $0xda] sm:$0xff]  ;;  %v3258_v62 = vld [vmem:[#allocation2 + $0xf0] sm:$0xff] }
 0x424   : > { %3157 = vmatmul.f32.gmra.mxu2 %v6694_v29  ;;  %3352 = vmatmul.f32.gmra.mxu3 %v3257_v45  ;;  %v6700_v57 = vadd.f32 %v2815_v60, %v2657_v48  ;;  %v3259_v45 = vld [vmem:[#allocation2 + $0xf8] sm:$0xff] }
 0x425   : > { %3011 = vmatmul.f32.gmra.mxu1 %v6698_v36 }
 0x426   : > { %7234 = vst [vmem:[#allocation27_spill] sm:$0xff] %v6700_v57 }
 0x427   : > { %v2462_v30 = vpop.f32.mrf.mxu2  ;;  %v2624_v55 = vpop.f32.mrf.mxu3 }
 0x428   : > { %v2463_v5 = vadd.f32 %v2462_v30, %v6489_v20  ;;  %v6715_v20 = vld [vmem:[#allocation2 + $0xe2] sm:$0xff]  ;;  %v6722_v30 = vld [vmem:[#allocation2 + $0xf2] sm:$0xff] }
 0x42a   : > { %v2658_v22 = vadd.f32 %v2624_v55, %v2463_v5  ;;  %v6704_v32 = vpop.f32.mrf.mxu1  ;;  %v3261_v5 = vld [vmem:[#allocation2 + $0x110] sm:$0xff]  ;;  %v3262_v55 = vld [vmem:[#allocation2 + $0x120] sm:$0xff] }
 0x42b   : > { %7235 = vst [vmem:[#allocation28_spill] sm:$0xff] %v6704_v32  ;;  %3549 = vmatmul.f32.gmra.mxu0 %v6527_v44 }
 0x42c   : > { %3160 = vmatmul.f32.gmra.mxu2 %v6706_v63  ;;  %3355 = vmatmul.f32.gmra.mxu3 %v3258_v62  ;;  %v6710_v60 = vadd.f32 %v2818_v4, %v2658_v22  ;;  %v3260_v4 = vld [vmem:[#allocation2 + $0x108] sm:$0xff]  ;;  %v3264_v62 = vld [vmem:[#allocation2 + $0x138] sm:$0xff] }
 0x42d   : > { %3695 = vmatmul.f32.vlgmr.msra.gmra.mxu1 %v6523_v19  ;;  %v3263_v22 = vld [vmem:[#allocation2 + $0x128] sm:$0xff] }
 0x42e   : > { %7236 = vst [vmem:[#allocation29_spill] sm:$0xff] %v6710_v60  ;;  %v3266_v60 = vld [vmem:[#allocation2 + $0x150] sm:$0xff] }
 0x432   : > { %v6713_v48 = vpop.f32.mrf.mxu1 }
 0x433   : > { %7237 = vst [vmem:[#allocation30_spill] sm:$0xff] %v6713_v48  ;;  %3552 = vmatmul.f32.gmra.mxu0 %v6539_v12  ;;  %v6729_v12 = vld [vmem:[#allocation2 + $0xfa] sm:$0xff] }
 0x434   : > { %3163 = vmatmul.f32.gmra.mxu2 %v6715_v20  ;;  %3358 = vmatmul.f32.gmra.mxu3 %v3259_v45  ;;  %v6756_v45 = vpop.f32.mrf.mxu2  ;;  %v3272_v48 = vld [vmem:[#allocation2 + $0x198] sm:$0xff] }
 0x435   : > { %3698 = vmatmul.f32.gmra.mxu1 %v6535_v16 }
 0x43a   : > { %v6720_v44 = vpop.f32.mrf.mxu1 }
 0x43b   : > { %7238 = vst [vmem:[#allocation31_spill] sm:$0xff] %v6720_v44  ;;  %3555 = vmatmul.f32.gmra.mxu0 %v6554_v53  ;;  %v6736_v53 = vld [vmem:[#allocation2 + $0x10a] sm:$0xff]  ;;  %v6835_v44 = vld [vmem:[#allocation2 + $0x172] sm:$0xff] }
 0x43c   : > { %3166 = vmatmul.f32.gmra.mxu2 %v6722_v30  ;;  %3361 = vmatmul.f32.gmra.mxu3 %v3260_v4  ;;  %7252 = vst [vmem:[#allocation45_spill] sm:$0xff] %v6835_v44 }
 0x43d   : > { %3701 = vmatmul.f32.gmra.mxu1 %v6550_v52 }
 0x442   : > { %v6727_v19 = vpop.f32.mrf.mxu1 }
 0x443   : > { %7239 = vst [vmem:[#allocation32_spill] sm:$0xff] %v6727_v19  ;;  %3558 = vmatmul.f32.gmra.mxu0 %v6566_v28  ;;  %v6743_v28 = vld [vmem:[#allocation2 + $0x112] sm:$0xff] }
 0x444   : > { %3169 = vmatmul.f32.gmra.mxu2 %v6729_v12  ;;  %3364 = vmatmul.f32.gmra.mxu3 %v3261_v5  ;;  %v3265_v5 = vld [vmem:[#allocation2 + $0x140] sm:$0xff] }
 0x445   : > { %3704 = vmatmul.f32.gmra.mxu1 %v6562_v42 }
 0x44a   : > { %v6734_v16 = vpop.f32.mrf.mxu1 }
 0x44b   : > { %7240 = vst [vmem:[#allocation33_spill] sm:$0xff] %v6734_v16  ;;  %3561 = vmatmul.f32.gmra.mxu0 %v6581_v38  ;;  %v6750_v38 = vld [vmem:[#allocation2 + $0x122] sm:$0xff] }
 0x44c   : > { %3172 = vmatmul.f32.gmra.mxu2 %v6736_v53  ;;  %3367 = vmatmul.f32.gmra.mxu3 %v3262_v55  ;;  %v6770_v55 = vpop.f32.mrf.mxu2 }
 0x44d   : > { %3707 = vmatmul.f32.gmra.mxu1 %v6577_v21  ;;  %v6754_v21 = vpop.f32.mrf.mxu0 }
 0x452   : > { %v6741_v52 = vpop.f32.mrf.mxu1 }
 0x453   : > { %7241 = vst [vmem:[#allocation34_spill] sm:$0xff] %v6741_v52  ;;  %3564 = vmatmul.f32.gmra.mxu0 %v6593_v23  ;;  %v6759_v23 = vpop.f32.mrf.mxu3  ;;  %v3268_v52 = vld [vmem:[#allocation2 + $0x168] sm:$0xff] }
 0x454   : > { %3175 = vmatmul.f32.gmra.mxu2 %v6743_v28  ;;  %3370 = vmatmul.f32.gmra.mxu3 %v3263_v22 }
 0x455   : > { %3710 = vmatmul.f32.gmra.mxu1 %v6589_v54  ;;  %v6763_v54 = vld [vmem:[#allocation2 + $0x12a] sm:$0xff] }
 0x45a   : > { %v6748_v42 = vpop.f32.mrf.mxu1 }
 0x45b   : > { %7242 = vst [vmem:[#allocation35_spill] sm:$0xff] %v6748_v42  ;;  %3567 = vmatmul.f32.gmra.mxu0 %v6608_v0  ;;  %v6768_v0 = vpop.f32.mrf.mxu0  ;;  %v6772_v22 = vpop.f32.mrf.mxu3  ;;  %v6800_v42 = vld [vmem:[#allocation2 + $0x152] sm:$0xff] }
 0x45c   : > { %3178 = vmatmul.f32.gmra.mxu2 %v6750_v38  ;;  %3373 = vmatmul.f32.gmra.mxu3 %v3264_v62  ;;  %v6776_v62 = vld [vmem:[#allocation2 + $0x13a] sm:$0xff] }
 0x45d   : > { %3713 = vmatmul.f32.gmra.mxu1 %v6604_v15 }
 0x462   : > { %v6761_v4 = vpop.f32.mrf.mxu1 }
 0x463   : > { %7243 = vst [vmem:[#allocation36_spill] sm:$0xff] %v6761_v4  ;;  %3570 = vmatmul.f32.gmra.mxu0 %v6620_v7  ;;  %v6781_v7 = vpop.f32.mrf.mxu0  ;;  %v6789_v4 = vld [vmem:[#allocation2 + $0x142] sm:$0xff] }
 0x464   : > { %3181 = vmatmul.f32.gmra.mxu2 %v6763_v54  ;;  %3376 = vmatmul.f32.gmra.mxu3 %v3265_v5  ;;  %v6785_v5 = vpop.f32.mrf.mxu3 }
 0x465   : > { %3716 = vmatmul.f32.gmra.mxu1 %v6616_v6  ;;  %v6783_v6 = vpop.f32.mrf.mxu2 }
 0x46a   : > { %v6774_v15 = vpop.f32.mrf.mxu1 }
 0x46b   : > { %7244 = vst [vmem:[#allocation37_spill] sm:$0xff] %v6774_v15  ;;  %3573 = vmatmul.f32.gmra.mxu0 %v6635_v13  ;;  %v3267_v15 = vld [vmem:[#allocation2 + $0x158] sm:$0xff] }
 0x46c   : > { %3184 = vmatmul.f32.gmra.mxu2 %v6776_v62  ;;  %3379 = vmatmul.f32.gmra.mxu3 %v3266_v60 }
 0x46d   : > { %3719 = vmatmul.f32.gmra.mxu1 %v6631_v8  ;;  %v6796_v8 = vpop.f32.mrf.mxu0  ;;  %v6798_v60 = vpop.f32.mrf.mxu2 }
 0x472   : > { %v6787_v57 = vpop.f32.mrf.mxu1 }
 0x473   : > { %7245 = vst [vmem:[#allocation38_spill] sm:$0xff] %v6787_v57  ;;  %3576 = vmatmul.f32.gmra.mxu0 %v6647_v2  ;;  %v6803_v57 = vpop.f32.mrf.mxu3 }
 0x474   : > { %3187 = vmatmul.f32.gmra.mxu2 %v6789_v4  ;;  %3382 = vmatmul.f32.gmra.mxu3 %v3267_v15  ;;  %v3269_v15 = vld [vmem:[#allocation2 + $0x170] sm:$0xff] }
 0x475   : > { %3722 = vmatmul.f32.gmra.mxu1 %v6643_v56  ;;  %v6809_v56 = vld [vmem:[#allocation2 + $0x15a] sm:$0xff] }
 0x476   : > { %7248 = vst [vmem:[#allocation41_spill] sm:$0xff] %v6809_v56 }
 0x47a   : > { %v6794_v13 = vpop.f32.mrf.mxu1 }
 0x47b   : > { %7246 = vst [vmem:[#allocation39_spill] sm:$0xff] %v6794_v13  ;;  %3579 = vmatmul.f32.gmra.mxu0 %v6662_v39  ;;  %v6813_v13 = vpop.f32.mrf.mxu0  ;;  %v6815_v39 = vpop.f32.mrf.mxu2 }
 0x47c   : > { %3190 = vmatmul.f32.gmra.mxu2 %v6800_v42  ;;  %3385 = vmatmul.f32.gmra.mxu3 %v3268_v52  ;;  %v6818_v16 = vpop.f32.mrf.mxu3 }
 0x47d   : > { %3725 = vmatmul.f32.gmra.mxu1 %v6658_v41  ;;  %v6822_v41 = vld [vmem:[#allocation2 + $0x16a] sm:$0xff] }
 0x47e   : > { %7250 = vst [vmem:[#allocation43_spill] sm:$0xff] %v6822_v41 }
 0x482   : > { %v6807_v2 = vpop.f32.mrf.mxu1 }
 0x483   : > { %7247 = vst [vmem:[#allocation40_spill] sm:$0xff] %v6807_v2  ;;  %3582 = vmatmul.f32.gmra.mxu0 %v6674_v25  ;;  %v3270_v2 = vld [vmem:[#allocation2 + $0x180] sm:$0xff]  ;;  %v6827_v25 = vpop.f32.mrf.mxu0 }
 0x484   : > { %3193 = vmatmul.f32.gmra.mxu2 %v6809_v56  ;;  %3388 = vmatmul.f32.gmra.mxu3 %v3269_v15  ;;  %v6829_v15 = vpop.f32.mrf.mxu2  ;;  %v6831_v19 = vpop.f32.mrf.mxu3  ;;  %v6859_v56 = vld [vmem:[#allocation2 + $0x18a] sm:$0xff] }
 0x485   : > { %3728 = vmatmul.f32.gmra.mxu1 %v6670_v43 }
 0x48a   : > { %v6820_v52 = vpop.f32.mrf.mxu1 }
 0x48b   : > { %7249 = vst [vmem:[#allocation42_spill] sm:$0xff] %v6820_v52  ;;  %3585 = vmatmul.f32.gmra.mxu0 %v6686_v50  ;;  %v3271_v52 = vld [vmem:[#allocation2 + $0x188] sm:$0xff]  ;;  %v3466_v50 = vld [vmem:[#allocation2 + $0x199] sm:$0xff] }
 0x48c   : > { %3196 = vmatmul.f32.gmra.mxu2 %v6822_v41  ;;  %3391 = vmatmul.f32.gmra.mxu3 %v3270_v2  ;;  %v6842_v2 = vpop.f32.mrf.mxu2  ;;  %v6844_v32 = vpop.f32.mrf.mxu3 }
 0x48d   : > { %3731 = vmatmul.f32.gmra.mxu1 %v6682_v61  ;;  %v6840_v61 = vpop.f32.mrf.mxu0 }
 0x492   : > { %v6833_v43 = vpop.f32.mrf.mxu1 }
 0x493   : > { %7251 = vst [vmem:[#allocation44_spill] sm:$0xff] %v6833_v43  ;;  %3588 = vmatmul.f32.gmra.mxu0 %v6698_v36  ;;  %v6848_v43 = vld [vmem:[#allocation2 + $0x182] sm:$0xff] }
 0x494   : > { %3199 = vmatmul.f32.gmra.mxu2 %v6835_v44  ;;  %3394 = vmatmul.f32.gmra.mxu3 %v3271_v52  ;;  %v3467_v36 = vld [vmem:[#allocation2 + $0x1a1] sm:$0xff] }
 0x495   : > { %3734 = vmatmul.f32.gmra.mxu1 %v6694_v29  ;;  %v3015_v29 = vadd.f32 %v6500_v31, %v6239_v46  ;;  %v6857_v41 = vpop.f32.mrf.mxu0  ;;  %v3016_v31 = vadd.f32 %v6509_v49, %v6252_v35  ;;  %v3017_v49 = vadd.f32 %v6521_v18, %v6266_v27 }
 0x497   : > { %v3209_v52 = vadd.f32 %v6756_v45, %v3015_v29  ;;  %v6875_v29 = vld [vmem:[%s7196_s5] ss:$0 sm:$0xff] }
 0x499   : > { %v3404_v46 = vadd.f32 %v6759_v23, %v3209_v52  ;;  %v6880_v23 = vld [vmem:[%s7197_s6] ss:$0 sm:$0xff]  ;;  %v3211_v52 = vadd.f32 %v6783_v6, %v3017_v49 }
 0x49a   : > { %v6846_v59 = vpop.f32.mrf.mxu1 }
 0x49b   : > { %7253 = vst [vmem:[#allocation46_spill] sm:$0xff] %v6846_v59  ;;  %3591 = vmatmul.f32.gmra.mxu0 %v3466_v50  ;;  %v6861_v59 = vpop.f32.mrf.mxu2  ;;  %v6863_v50 = vpop.f32.mrf.mxu3  ;;  %v3598_v45 = vadd.f32 %v6754_v21, %v3404_v46 }
 0x49c   : > { %3202 = vmatmul.f32.gmra.mxu2 %v6848_v43  ;;  %3397 = vmatmul.f32.gmra.mxu3 %v3272_v48  ;;  %v3210_v48 = vadd.f32 %v6770_v55, %v3016_v31 }
 0x49d   : > { %3737 = vmatmul.f32.gmra.mxu1 %v6706_v63  ;;  %v4557_v63 = vld [vmem:[#allocation2 + $0x8] sm:$0xff] }
 0x4a2   : > { %v6855_v44 = vpop.f32.mrf.mxu1 }
 0x4a3   : > { %7254 = vst [vmem:[#allocation47_spill] sm:$0xff] %v6855_v44  ;;  %3594 = vmatmul.f32.gmra.mxu0 %v3467_v36  ;;  %v6889_v55 = vpop.f32.mrf.mxu2  ;;  %v6903_v6 = vpop.f32.mrf.mxu3 }
 0x4a4   : > { %3205 = vmatmul.f32.gmra.mxu2 %v6859_v56  ;;  %3400 = vmatmul.f32.gmra.mxu3 %v4557_v63  ;;  %v4558_v63 = vld [vmem:[%s4744_s22 + $0x19] sm:$0xff] }
 0x4a5   : > { %3740 = vmatmul.f32.gmra.mxu1 %v6715_v20  ;;  %v3405_v20 = vadd.f32 %v6772_v22, %v3210_v48 }
 0x4a7   : > { %v3599_v31 = vadd.f32 %v6768_v0, %v3405_v20  ;;  %v3018_v0 = vadd.f32 %v6533_v47, %v6280_v33  ;;  %v4559_v20 = vld [vmem:[%s4744_s22 + $0x21] sm:$0xff]  ;;  %v3019_v47 = vadd.f32 %v6548_v40, %v6294_v51 }
 0x4aa   : > { %v3696_v36 = vpop.f32.mrf.mxu1 }
 0x4ab   : > { %v3792_v44 = vadd.f32 %v3696_v36, %v3598_v45  ;;  %v3212_v45 = vadd.f32 %v6798_v60, %v3018_v0  ;;  %v6909_v36 = vpop.f32.mrf.mxu0  ;;  %v6913_v49 = vpop.f32.mrf.mxu2 }
 0x4ad   : > { %v3828_v35 = vmul.f32 %v6875_v29, %v3792_v44  ;;  %3743 = vmatmul.f32.gmra.mxu1 %v6722_v30  ;;  %v3406_v30 = vadd.f32 %v6785_v5, %v3211_v52 }
 0x4af   : > { %v3864_v21 = vadd.f32 %v6880_v23, %v3828_v35  ;;  %v3600_v35 = vadd.f32 %v6781_v7, %v3406_v30  ;;  %v3213_v7 = vadd.f32 %v6815_v39, %v3019_v47  ;;  %v3020_v39 = vadd.f32 %v6560_v11, %v6308_v10 }
 0x4b1   : > { %v3896_v46 = vadd.f32 %v4558_v63, %v3864_v21  ;;  %v3407_v63 = vadd.f32 %v6803_v57, %v3212_v45  ;;  %v3408_v51 = vadd.f32 %v6818_v16, %v3213_v7  ;;  %v3214_v0 = vadd.f32 %v6829_v15, %v3020_v39 }
 0x4b2   : > { %v3699_v44 = vpop.f32.mrf.mxu1 }
 0x4b3   : > { %v3928_v27 = vmax.f32 %v3896_v46, 0.0  ;;  %v3793_v18 = vadd.f32 %v3699_v44, %v3599_v31  ;;  %v6922_v46 = vpop.f32.mrf.mxu3  ;;  %v4560_v31 = vld [vmem:[%s4744_s22 + $0x31] sm:$0xff]  ;;  %v3601_v57 = vadd.f32 %v6796_v8, %v3407_v63  ;;  %v4562_v63 = vld [vmem:[%s4744_s22 + $0x49] sm:$0xff] }
 0x4b5   : > { %3960 = vst [vmem:[%s6897_s15] sm:$0xff] %v3928_v27  ;;  %v3829_v22 = vmul.f32 %v6875_v29, %v3793_v18  ;;  %3746 = vmatmul.f32.gmra.mxu1 %v6729_v12  ;;  %v6927_v18 = vpop.f32.mrf.mxu0 }
 0x4b7   : > { %v3865_v48 = vadd.f32 %v6880_v23, %v3829_v22 }
 0x4b9   : > { %v3897_v5 = vadd.f32 %v4559_v20, %v3865_v48  ;;  %v4561_v48 = vld [vmem:[%s4744_s22 + $0x39] sm:$0xff]  ;;  %v3602_v20 = vadd.f32 %v6813_v13, %v3408_v51  ;;  %v3021_v13 = vadd.f32 %v6575_v1, %v6322_v3  ;;  %v3022_v1 = vadd.f32 %v6587_v14, %v6336_v34 }
 0x4ba   : > { %v3702_v21 = vpop.f32.mrf.mxu1 }
 0x4bb   : > { %v3929_v12 = vmax.f32 %v3897_v5, 0.0  ;;  %v3794_v52 = vadd.f32 %v3702_v21, %v3600_v35  ;;  %v6941_v5 = vpop.f32.mrf.mxu3 }
 0x4bd   : > { %3961 = vst [vmem:[%s6897_s15 + $0x8] sm:$0xff] %v3929_v12  ;;  %v3830_v33 = vmul.f32 %v6875_v29, %v3794_v52  ;;  %3749 = vmatmul.f32.gmra.mxu1 %v6736_v53  ;;  %v6929_v53 = vpop.f32.mrf.mxu2  ;;  %v3409_v12 = vadd.f32 %v6831_v19, %v3214_v0  ;;  %v3215_v52 = vadd.f32 %v6842_v2, %v3021_v13  ;;  %v4564_v0 = vld [vmem:[%s4744_s22 + $0x61] sm:$0xff] }
 0x4bf   : > { %v3866_v60 = vadd.f32 %v6880_v23, %v3830_v33  ;;  %v3603_v33 = vadd.f32 %v6827_v25, %v3409_v12  ;;  %v4565_v12 = vld [vmem:[%s4744_s22 + $0x69] sm:$0xff] }
 0x4c1   : > { %v3898_v44 = vadd.f32 %v4560_v31, %v3866_v60 }
 0x4c2   : > { %v3705_v27 = vpop.f32.mrf.mxu1 }
 0x4c3   : > { %v3930_v30 = vmax.f32 %v3898_v44, 0.0  ;;  %v3795_v22 = vadd.f32 %v3705_v27, %v3601_v57  ;;  %v6957_v31 = vpop.f32.mrf.mxu3  ;;  %v3216_v57 = vadd.f32 %v6861_v59, %v3022_v1  ;;  %v4563_v27 = vld [vmem:[%s4744_s22 + $0x51] sm:$0xff]  ;;  %v3023_v59 = vadd.f32 %v6602_v9, %v6350_v17 }
 0x4c4   : > { %v3024_v9 = vadd.f32 %v6614_v58, %v6376_v24 }
 0x4c5   : > { %3962 = vst [vmem:[%s6897_s15 + $0x10] sm:$0xff] %v3930_v30  ;;  %v3831_v40 = vmul.f32 %v6875_v29, %v3795_v22  ;;  %3752 = vmatmul.f32.gmra.mxu1 %v6743_v28  ;;  %v6944_v28 = vpop.f32.mrf.mxu0  ;;  %v6949_v11 = vpop.f32.mrf.mxu2 }
 0x4c7   : > { %v3867_v8 = vadd.f32 %v6880_v23, %v3831_v40 }
 0x4c9   : > { %v3899_v45 = vadd.f32 %v4561_v48, %v3867_v8 }
 0x4ca   : > { %v3708_v16 = vpop.f32.mrf.mxu1 }
 0x4cb   : > { %v3931_v35 = vmax.f32 %v3899_v45, 0.0  ;;  %v3796_v21 = vadd.f32 %v3708_v16, %v3602_v20  ;;  %v6977_v14 = vpop.f32.mrf.mxu3 }
 0x4cd   : > { %3963 = vst [vmem:[%s6897_s15 + $0x18] sm:$0xff] %v3931_v35  ;;  %v3832_v10 = vmul.f32 %v6875_v29, %v3796_v21  ;;  %3755 = vmatmul.f32.gmra.mxu1 %v6750_v38  ;;  %v3410_v38 = vadd.f32 %v6844_v32, %v3215_v52  ;;  %v6965_v2 = vpop.f32.mrf.mxu0  ;;  %v6968_v44 = vpop.f32.mrf.mxu2 }
 0x4cf   : > { %v3868_v15 = vadd.f32 %v6880_v23, %v3832_v10  ;;  %v3604_v30 = vadd.f32 %v6840_v61, %v3410_v38  ;;  %v3217_v61 = vadd.f32 %v6889_v55, %v3023_v59 }
 0x4d1   : > { %v3900_v19 = vadd.f32 %v4562_v63, %v3868_v15  ;;  %v3412_v35 = vadd.f32 %v6903_v6, %v3217_v61  ;;  %v7258_v61 = vld [vmem:[#allocation43_spill] sm:$0xff] }
 0x4d2   : > { %v3711_v47 = vpop.f32.mrf.mxu1 }
 0x4d3   : > { %v3932_v60 = vmax.f32 %v3900_v19, 0.0  ;;  %v3797_v7 = vadd.f32 %v3711_v47, %v3603_v33  ;;  %v6996_v21 = vpop.f32.mrf.mxu3  ;;  %v3606_v6 = vadd.f32 %v6909_v36, %v3412_v35  ;;  %v4566_v33 = vld [vmem:[%s4744_s22 + $0x79] sm:$0xff] }
 0x4d5   : > { %3964 = vst [vmem:[%s6897_s15 + $0x20] sm:$0xff] %v3932_v60  ;;  %v3833_v3 = vmul.f32 %v6875_v29, %v3797_v7  ;;  %3758 = vmatmul.f32.gmra.mxu1 %v6763_v54  ;;  %v3411_v54 = vadd.f32 %v6863_v50, %v3216_v57  ;;  %v6983_v8 = vpop.f32.mrf.mxu0  ;;  %v6987_v45 = vpop.f32.mrf.mxu2  ;;  %v7257_v57 = vld [vmem:[#allocation18_spill] sm:$0xff] }
 0x4d7   : > { %v3869_v25 = vadd.f32 %v6880_v23, %v3833_v3  ;;  %v3605_v48 = vadd.f32 %v6857_v41, %v3411_v54  ;;  %v3218_v41 = vadd.f32 %v6913_v49, %v3024_v9  ;;  %v3025_v49 = vadd.f32 %v6629_v26, %v6405_v37  ;;  %v7255_v26 = vld [vmem:[#allocation41_spill] sm:$0xff] }
 0x4d9   : > { %v3901_v32 = vadd.f32 %v4563_v27, %v3869_v25  ;;  %v3413_v24 = vadd.f32 %v6922_v46, %v3218_v41  ;;  %v3219_v19 = vadd.f32 %v6929_v53, %v3025_v49  ;;  %v7256_v25 = vld [vmem:[#allocation3_spill] sm:$0xff] }
 0x4da   : > { %v3714_v22 = vpop.f32.mrf.mxu1 }
 0x4db   : > { %v3933_v51 = vmax.f32 %v3901_v32, 0.0  ;;  %v3798_v40 = vadd.f32 %v3714_v22, %v3604_v30  ;;  %v3607_v60 = vadd.f32 %v6927_v18, %v3413_v24  ;;  %v7015_v7 = vpop.f32.mrf.mxu3  ;;  %v3414_v1 = vadd.f32 %v6941_v5, %v3219_v19  ;;  %v4567_v30 = vld [vmem:[%s4744_s22 + $0x81] sm:$0xff] }
 0x4dc   : > { %v3026_v18 = vadd.f32 %v7257_v57, %v7256_v25 }
 0x4dd   : > { %3965 = vst [vmem:[%s6897_s15 + $0x28] sm:$0xff] %v3933_v51  ;;  %v3834_v34 = vmul.f32 %v6875_v29, %v3798_v40  ;;  %3761 = vmatmul.f32.gmra.mxu1 %v6776_v62  ;;  %v7001_v15 = vpop.f32.mrf.mxu0  ;;  %v3608_v22 = vadd.f32 %v6944_v28, %v3414_v1 }
 0x4de   : > { %v3220_v32 = vadd.f32 %v6949_v11, %v3026_v18  ;;  %v7260_v11 = vld [vmem:[#allocation20_spill] sm:$0xff] }
 0x4df   : > { %v3870_v39 = vadd.f32 %v6880_v23, %v3834_v34 }
 0x4e0   : > { %v3415_v59 = vadd.f32 %v6957_v31, %v3220_v32 }
 0x4e1   : > { %v3902_v50 = vadd.f32 %v4564_v0, %v3870_v39  ;;  %v7259_v0 = vld [vmem:[#allocation4_spill] sm:$0xff] }
 0x4e2   : > { %v3717_v20 = vpop.f32.mrf.mxu1  ;;  %v3609_v35 = vadd.f32 %v6965_v2, %v3415_v59 }
 0x4e3   : > { %v3934_v62 = vmax.f32 %v3902_v50, 0.0  ;;  %v3799_v16 = vadd.f32 %v3717_v20, %v3605_v48  ;;  %v7031_v34 = vpop.f32.mrf.mxu3  ;;  %v3027_v50 = vadd.f32 %v7260_v11, %v7259_v0  ;;  %v3660_v0 = vld [vmem:[#allocation2 + $0x19a] sm:$0xff] }
 0x4e5   : > { %3966 = vst [vmem:[%s6897_s15 + $0x30] sm:$0xff] %v3934_v62  ;;  %v3835_v17 = vmul.f32 %v6875_v29, %v3799_v16  ;;  %3764 = vmatmul.f32.gmra.mxu1 %v6789_v4  ;;  %v7003_v4 = vpop.f32.mrf.mxu2  ;;  %v3221_v62 = vadd.f32 %v6968_v44, %v3027_v50  ;;  %v4568_v16 = vld [vmem:[%s4744_s22 + $0x91] sm:$0xff] }
 0x4e7   : > { %v3871_v55 = vadd.f32 %v6880_v23, %v3835_v17  ;;  %v3416_v41 = vadd.f32 %v6977_v14, %v3221_v62 }
 0x4e9   : > { %v3903_v10 = vadd.f32 %v4565_v12, %v3871_v55  ;;  %v3610_v14 = vadd.f32 %v6983_v8, %v3416_v41 }
 0x4ea   : > { %v3720_v13 = vpop.f32.mrf.mxu1 }
 0x4eb   : > { %v3935_v52 = vmax.f32 %v3903_v10, 0.0  ;;  %v3800_v63 = vadd.f32 %v3720_v13, %v3606_v6  ;;  %v7261_v10 = vld [vmem:[#allocation45_spill] sm:$0xff]  ;;  %v3356_v6 = vpop.f32.mrf.mxu3 }
 0x4ec   : > { %v7262_v13 = vld [vmem:[#allocation5_spill] sm:$0xff] }
 0x4ed   : > { %3967 = vst [vmem:[%s6897_s15 + $0x38] sm:$0xff] %v3935_v52  ;;  %v3836_v58 = vmul.f32 %v6875_v29, %v3800_v63  ;;  %3767 = vmatmul.f32.gmra.mxu1 %v6800_v42  ;;  %v7018_v42 = vpop.f32.mrf.mxu0  ;;  %v7023_v53 = vpop.f32.mrf.mxu2  ;;  %v7263_v52 = vld [vmem:[#allocation22_spill] sm:$0xff] }
 0x4ee   : > { %v3028_v44 = vadd.f32 %v7263_v52, %v7262_v13 }
 0x4ef   : > { %v3872_v36 = vadd.f32 %v6880_v23, %v3836_v58  ;;  %v4569_v58 = vld [vmem:[%s4744_s22 + $0x99] sm:$0xff] }
 0x4f0   : > { %v3222_v24 = vadd.f32 %v6987_v45, %v3028_v44  ;;  %v7264_v45 = vld [vmem:[#allocation6_spill] sm:$0xff] }
 0x4f1   : > { %v3904_v47 = vadd.f32 %v4566_v33, %v3872_v36 }
 0x4f2   : > { %v3723_v46 = vpop.f32.mrf.mxu1 }
 0x4f3   : > { %v3936_v38 = vmax.f32 %v3904_v47, 0.0  ;;  %v3801_v3 = vadd.f32 %v3723_v46, %v3607_v60  ;;  %v3417_v60 = vadd.f32 %v6996_v21, %v3222_v24  ;;  %v7270_v24 = vld [vmem:[#allocation9_spill] sm:$0xff] }
 0x4f5   : > { %3968 = vst [vmem:[%s6897_s15 + $0x40] sm:$0xff] %v3936_v38  ;;  %v3837_v37 = vmul.f32 %v6875_v29, %v3801_v3  ;;  %3770 = vmatmul.f32.gmra.mxu1 %v7255_v26  ;;  %v7039_v48 = vpop.f32.mrf.mxu0  ;;  %v7042_v20 = vpop.f32.mrf.mxu2  ;;  %v7265_v38 = vld [vmem:[#allocation24_spill] sm:$0xff]  ;;  %v4570_v26 = vld [vmem:[%s4744_s22 + $0xa9] sm:$0xff]  ;;  %v3611_v57 = vadd.f32 %v7001_v15, %v3417_v60 }
 0x4f6   : > { %v3029_v3 = vadd.f32 %v7265_v38, %v7264_v45 }
 0x4f7   : > { %v3873_v27 = vadd.f32 %v6880_v23, %v3837_v37  ;;  %v3359_v37 = vpop.f32.mrf.mxu3 }
 0x4f8   : > { %v3223_v8 = vadd.f32 %v7003_v4, %v3029_v3  ;;  %v7267_v4 = vld [vmem:[#allocation26_spill] sm:$0xff] }
 0x4f9   : > { %v3905_v5 = vadd.f32 %v4567_v30, %v3873_v27 }
 0x4fa   : > { %v3726_v51 = vpop.f32.mrf.mxu1 }
 0x4fb   : > { %v3937_v40 = vmax.f32 %v3905_v5, 0.0  ;;  %v3802_v54 = vadd.f32 %v3726_v51, %v3608_v22  ;;  %v7266_v22 = vld [vmem:[#allocation7_spill] sm:$0xff] }
 0x4fc   : > { %v3030_v51 = vadd.f32 %v7267_v4, %v7266_v22 }
 0x4fd   : > { %3969 = vst [vmem:[%s6897_s15 + $0x48] sm:$0xff] %v3937_v40  ;;  %v3838_v39 = vmul.f32 %v6875_v29, %v3802_v54  ;;  %3773 = vmatmul.f32.gmra.mxu1 %v7258_v61  ;;  %v7055_v2 = vpop.f32.mrf.mxu0  ;;  %v3164_v36 = vpop.f32.mrf.mxu2  ;;  %v4571_v54 = vld [vmem:[%s4744_s22 + $0xb1] sm:$0xff] }
 0x4fe   : > { %v3224_v15 = vadd.f32 %v7023_v53, %v3030_v51  ;;  %v7268_v53 = vld [vmem:[#allocation8_spill] sm:$0xff] }
 0x4ff   : > { %v3874_v28 = vadd.f32 %v6880_v23, %v3838_v39  ;;  %v3362_v61 = vpop.f32.mrf.mxu3 }
 0x501   : > { %v3906_v31 = vadd.f32 %v4568_v16, %v3874_v28  ;;  %v3419_v28 = vadd.f32 %v7031_v34, %v3224_v15  ;;  %v7275_v15 = vld [vmem:[#allocation32_spill] sm:$0xff] }
 0x502   : > { %v3729_v17 = vpop.f32.mrf.mxu1 }
 0x503   : > { %v3938_v9 = vmax.f32 %v3906_v31, 0.0  ;;  %v3803_v55 = vadd.f32 %v3729_v17, %v3609_v35  ;;  %v7269_v31 = vld [vmem:[#allocation28_spill] sm:$0xff]  ;;  %v3613_v41 = vadd.f32 %v7039_v48, %v3419_v28 }
 0x504   : > { %v3031_v35 = vadd.f32 %v7269_v31, %v7268_v53 }
 0x505   : > { %3970 = vst [vmem:[%s6897_s15 + $0x50] sm:$0xff] %v3938_v9  ;;  %v3839_v12 = vmul.f32 %v6875_v29, %v3803_v55  ;;  %3776 = vmatmul.f32.gmra.mxu1 %v7261_v10  ;;  %v3553_v18 = vpop.f32.mrf.mxu0  ;;  %v3167_v30 = vpop.f32.mrf.mxu2  ;;  %v4572_v9 = vld [vmem:[%s4744_s22 + $0xc1] sm:$0xff] }
 0x507   : > { %v3875_v63 = vadd.f32 %v6880_v23, %v3839_v12  ;;  %v3661_v12 = vld [vmem:[#allocation2 + $0x1a2] sm:$0xff]  ;;  %v3365_v52 = vpop.f32.mrf.mxu3 }
 0x509   : > { %v3907_v49 = vadd.f32 %v4569_v58, %v3875_v63  ;;  %v7271_v58 = vld [vmem:[#allocation30_spill] sm:$0xff] }
 0x50a   : > { %v3732_v19 = vpop.f32.mrf.mxu1 }
 0x50b   : > { %v3939_v33 = vmax.f32 %v3907_v49, 0.0  ;;  %v3804_v47 = vadd.f32 %v3732_v19, %v3610_v14  ;;  %v3032_v49 = vadd.f32 %v7271_v58, %v7270_v24  ;;  %v7278_v58 = vld [vmem:[#allocation13_spill] sm:$0xff] }
 0x50d   : > { %3971 = vst [vmem:[%s6897_s15 + $0x58] sm:$0xff] %v3939_v33  ;;  %v3840_v46 = vmul.f32 %v6875_v29, %v3804_v47  ;;  %3779 = vmatmul.f32.gmra.mxu1 %v6848_v43  ;;  %v3418_v43 = vadd.f32 %v7015_v7, %v3223_v8  ;;  %v3170_v16 = vpop.f32.mrf.mxu2  ;;  %v3226_v48 = vadd.f32 %v3164_v36, %v3032_v49  ;;  %v4573_v33 = vld [vmem:[%s4744_s22 + $0xc9] sm:$0xff] }
 0x50e   : > { %v7272_v8 = vld [vmem:[#allocation10_spill] sm:$0xff] }
 0x50f   : > { %v3876_v1 = vadd.f32 %v6880_v23, %v3840_v46  ;;  %v3612_v39 = vadd.f32 %v7018_v42, %v3418_v43  ;;  %v3225_v42 = vadd.f32 %v7042_v20, %v3031_v35  ;;  %v3421_v38 = vadd.f32 %v3359_v37, %v3226_v48  ;;  %v7276_v35 = vld [vmem:[#allocation12_spill] sm:$0xff]  ;;  %v7279_v49 = vld [vmem:[#allocation34_spill] sm:$0xff] }
 0x511   : > { %v3908_v25 = vadd.f32 %v4570_v26, %v3876_v1  ;;  %v3420_v44 = vadd.f32 %v3356_v6, %v3225_v42  ;;  %v3368_v1 = vpop.f32.mrf.mxu3  ;;  %v7273_v26 = vld [vmem:[#allocation31_spill] sm:$0xff] }
 0x512   : > { %v3735_v21 = vpop.f32.mrf.mxu1 }
 0x513   : > { %v3940_v27 = vmax.f32 %v3908_v25, 0.0  ;;  %v3805_v32 = vadd.f32 %v3735_v21, %v3611_v57  ;;  %v3614_v60 = vadd.f32 %v7055_v2, %v3420_v44  ;;  %v3033_v25 = vadd.f32 %v7273_v26, %v7272_v8  ;;  %v7281_v8 = vld [vmem:[#allocation35_spill] sm:$0xff] }
 0x514   : > { %v3615_v2 = vadd.f32 %v3553_v18, %v3421_v38 }
 0x515   : > { %3972 = vst [vmem:[%s6897_s15 + $0x60] sm:$0xff] %v3940_v27  ;;  %v3841_v5 = vmul.f32 %v6875_v29, %v3805_v32  ;;  %3782 = vmatmul.f32.gmra.mxu1 %v6859_v56  ;;  %v3556_v56 = vpop.f32.mrf.mxu0  ;;  %v3173_v19 = vpop.f32.mrf.mxu2  ;;  %v3227_v21 = vadd.f32 %v3167_v30, %v3033_v25  ;;  %v4574_v27 = vld [vmem:[%s4744_s22 + $0xd9] sm:$0xff] }
 0x517   : > { %v3877_v40 = vadd.f32 %v6880_v23, %v3841_v5  ;;  %v3422_v4 = vadd.f32 %v3362_v61, %v3227_v21 }
 0x519   : > { %v3909_v59 = vadd.f32 %v4571_v54, %v3877_v40  ;;  %v7274_v40 = vld [vmem:[#allocation11_spill] sm:$0xff]  ;;  %v3371_v30 = vpop.f32.mrf.mxu3  ;;  %v3616_v18 = vadd.f32 %v3556_v56, %v3422_v4 }
 0x51a   : > { %v3738_v7 = vpop.f32.mrf.mxu1  ;;  %v3034_v54 = vadd.f32 %v7275_v15, %v7274_v40  ;;  %v7282_v40 = vld [vmem:[#allocation15_spill] sm:$0xff]  ;;  %v7283_v15 = vld [vmem:[#allocation36_spill] sm:$0xff] }
 0x51b   : > { %v3941_v11 = vmax.f32 %v3909_v59, 0.0  ;;  %v3806_v50 = vadd.f32 %v3738_v7, %v3612_v39  ;;  %v4575_v7 = vld [vmem:[%s4744_s22 + $0xe1] sm:$0xff] }
 0x51c   : > { %v3228_v39 = vadd.f32 %v3170_v16, %v3034_v54  ;;  %v4576_v16 = vld [vmem:[%s4744_s22 + $0xf1] sm:$0xff]  ;;  %v3038_v54 = vadd.f32 %v7283_v15, %v7282_v40 }
 0x51d   : > { %3973 = vst [vmem:[%s6897_s15 + $0x68] sm:$0xff] %v3941_v11  ;;  %v3842_v62 = vmul.f32 %v6875_v29, %v3806_v50  ;;  %3785 = vmatmul.f32.gmra.mxu1 %v3660_v0  ;;  %v3559_v20 = vpop.f32.mrf.mxu0  ;;  %v3176_v43 = vpop.f32.mrf.mxu2  ;;  %v7291_v40 = vld [vmem:[#allocation40_spill] sm:$0xff] }
 0x51e   : > { %v3423_v53 = vadd.f32 %v3365_v52, %v3228_v39 }
 0x51f   : > { %v3878_v17 = vadd.f32 %v6880_v23, %v3842_v62 }
 0x520   : > { %v3617_v56 = vadd.f32 %v3559_v20, %v3423_v53 }
 0x521   : > { %v3910_v55 = vadd.f32 %v4572_v9, %v3878_v17  ;;  %v7277_v17 = vld [vmem:[#allocation33_spill] sm:$0xff] }
 0x522   : > { %v3741_v34 = vpop.f32.mrf.mxu1  ;;  %v3035_v42 = vadd.f32 %v7277_v17, %v7276_v35  ;;  %v7285_v35 = vld [vmem:[#allocation37_spill] sm:$0xff] }
 0x523   : > { %v3942_v10 = vmax.f32 %v3910_v55, 0.0  ;;  %v3807_v13 = vadd.f32 %v3741_v34, %v3613_v41  ;;  %v3374_v34 = vpop.f32.mrf.mxu3 }
 0x524   : > { %v3229_v55 = vadd.f32 %v3173_v19, %v3035_v42 }
 0x525   : > { %3974 = vst [vmem:[%s6897_s15 + $0x70] sm:$0xff] %v3942_v10  ;;  %v3843_v63 = vmul.f32 %v6875_v29, %v3807_v13  ;;  %3788 = vmatmul.f32.gmra.mxu1 %v3661_v12  ;;  %v3562_v36 = vpop.f32.mrf.mxu0  ;;  %v3179_v61 = vpop.f32.mrf.mxu2 }
 0x526   : > { %v3424_v44 = vadd.f32 %v3368_v1, %v3229_v55  ;;  %v7280_v1 = vld [vmem:[#allocation14_spill] sm:$0xff] }
 0x527   : > { %v3879_v14 = vadd.f32 %v6880_v23, %v3843_v63  ;;  %v3037_v26 = vadd.f32 %v7281_v8, %v7280_v1  ;;  %v7288_v8 = vld [vmem:[#allocation19_spill] sm:$0xff] }
 0x529   : > { %v3911_v47 = vadd.f32 %v4573_v33, %v3879_v14  ;;  %v3036_v14 = vadd.f32 %v7279_v49, %v7278_v58  ;;  %v4577_v33 = vld [vmem:[%s4744_s22 + $0xf9] sm:$0xff]  ;;  %v7287_v58 = vld [vmem:[#allocation38_spill] sm:$0xff] }
 0x52a   : > { %v3744_v46 = vpop.f32.mrf.mxu1 }
 0x52b   : > { %v3943_v6 = vmax.f32 %v3911_v47, 0.0  ;;  %v3808_v45 = vadd.f32 %v3744_v46, %v3614_v60  ;;  %v3230_v48 = vadd.f32 %v3176_v43, %v3036_v14  ;;  %v3618_v47 = vadd.f32 %v3562_v36, %v3424_v44 }
 0x52d   : > { %3975 = vst [vmem:[%s6897_s15 + $0x78] sm:$0xff] %v3943_v6  ;;  %v3844_v3 = vmul.f32 %v6875_v29, %v3808_v45  ;;  %v3565_v50 = vpop.f32.mrf.mxu0  ;;  %v3182_v24 = vpop.f32.mrf.mxu2  ;;  %v3425_v38 = vadd.f32 %v3371_v30, %v3230_v48  ;;  %v4581_v48 = vld [vmem:[%s4744_s22 + $0x129] sm:$0xff] }
 0x52e   : > { %v3377_v45 = vpop.f32.mrf.mxu3  ;;  %v3232_v30 = vadd.f32 %v3182_v24, %v3038_v54  ;;  %v7286_v24 = vld [vmem:[#allocation17_spill] sm:$0xff] }
 0x52f   : > { %v3880_v57 = vadd.f32 %v6880_v23, %v3844_v3  ;;  %v3040_v49 = vadd.f32 %v7287_v58, %v7286_v24  ;;  %v7295_v24 = vld [vmem:[#allocation44_spill] sm:$0xff] }
 0x531   : > { %v3912_v32 = vadd.f32 %v4574_v27, %v3880_v57  ;;  %v3231_v27 = vadd.f32 %v3179_v61, %v3037_v26  ;;  %v3427_v61 = vadd.f32 %v3377_v45, %v3232_v30  ;;  %v7289_v26 = vld [vmem:[#allocation39_spill] sm:$0xff] }
 0x532   : > { %v3747_v5 = vpop.f32.mrf.mxu1 }
 0x533   : > { %v3944_v22 = vmax.f32 %v3912_v32, 0.0  ;;  %v3809_v37 = vadd.f32 %v3747_v5, %v3615_v2  ;;  %v4578_v32 = vld [vmem:[%s4744_s22 + $0x109] sm:$0xff]  ;;  %v3619_v2 = vadd.f32 %v3565_v50, %v3425_v38 }
 0x535   : > { %3976 = vst [vmem:[%s6897_s15 + $0x80] sm:$0xff] %v3944_v22  ;;  %v3845_v51 = vmul.f32 %v6875_v29, %v3809_v37  ;;  %v3568_v52 = vpop.f32.mrf.mxu0  ;;  %v3185_v21 = vpop.f32.mrf.mxu2  ;;  %v3426_v37 = vadd.f32 %v3374_v34, %v3231_v27  ;;  %v4582_v27 = vld [vmem:[%s4744_s22 + $0x139] sm:$0xff] }
 0x537   : > { %v3881_v59 = vadd.f32 %v6880_v23, %v3845_v51  ;;  %v3380_v51 = vpop.f32.mrf.mxu3 }
 0x539   : > { %v3913_v0 = vadd.f32 %v4575_v7, %v3881_v59  ;;  %v4579_v7 = vld [vmem:[%s4744_s22 + $0x111] sm:$0xff] }
 0x53a   : > { %v3750_v11 = vpop.f32.mrf.mxu1 }
 0x53b   : > { %v3945_v28 = vmax.f32 %v3913_v0, 0.0  ;;  %v3810_v62 = vadd.f32 %v3750_v11, %v3616_v18  ;;  %v3620_v18 = vadd.f32 %v3568_v52, %v3426_v37 }
 0x53d   : > { %3977 = vst [vmem:[%s6897_s15 + $0x88] sm:$0xff] %v3945_v28  ;;  %v3846_v31 = vmul.f32 %v6875_v29, %v3810_v62  ;;  %v3571_v25 = vpop.f32.mrf.mxu0  ;;  %v3188_v11 = vpop.f32.mrf.mxu2 }
 0x53f   : > { %v3882_v9 = vadd.f32 %v6880_v23, %v3846_v31  ;;  %v7284_v31 = vld [vmem:[#allocation16_spill] sm:$0xff] }
 0x540   : > { %v3039_v17 = vadd.f32 %v7285_v35, %v7284_v31  ;;  %v7292_v31 = vld [vmem:[#allocation23_spill] sm:$0xff]  ;;  %v7293_v35 = vld [vmem:[#allocation42_spill] sm:$0xff] }
 0x541   : > { %v3914_v41 = vadd.f32 %v4576_v16, %v3882_v9  ;;  %v3383_v9 = vpop.f32.mrf.mxu3  ;;  %v4580_v16 = vld [vmem:[%s4744_s22 + $0x121] sm:$0xff] }
 0x542   : > { %v3753_v12 = vpop.f32.mrf.mxu1  ;;  %v3233_v55 = vadd.f32 %v3185_v21, %v3039_v17  ;;  %v3043_v17 = vadd.f32 %v7293_v35, %v7292_v31 }
 0x543   : > { %v3946_v10 = vmax.f32 %v3914_v41, 0.0  ;;  %v3811_v13 = vadd.f32 %v3753_v12, %v3617_v56  ;;  %v3621_v56 = vadd.f32 %v3571_v25, %v3427_v61  ;;  %v3041_v25 = vadd.f32 %v7289_v26, %v7288_v8  ;;  %v7297_v8 = vld [vmem:[#allocation46_spill] sm:$0xff] }
 0x544   : > { %v3428_v52 = vadd.f32 %v3380_v51, %v3233_v55  ;;  %v7290_v51 = vld [vmem:[#allocation21_spill] sm:$0xff] }
 0x545   : > { %3978 = vst [vmem:[%s6897_s15 + $0x90] sm:$0xff] %v3946_v10  ;;  %v3847_v63 = vmul.f32 %v6875_v29, %v3811_v13  ;;  %v3574_v39 = vpop.f32.mrf.mxu0  ;;  %v3191_v44 = vpop.f32.mrf.mxu2  ;;  %v3042_v15 = vadd.f32 %v7291_v40, %v7290_v51  ;;  %v7298_v40 = vld [vmem:[#allocation29_spill] sm:$0xff] }
 0x546   : > { %v3235_v21 = vadd.f32 %v3191_v44, %v3041_v25 }
 0x547   : > { %v3883_v19 = vadd.f32 %v6880_v23, %v3847_v63 }
 0x549   : > { %v3915_v20 = vadd.f32 %v4577_v33, %v3883_v19  ;;  %v3234_v19 = vadd.f32 %v3188_v11, %v3040_v49 }
 0x54a   : > { %v3756_v60 = vpop.f32.mrf.mxu1 }
 0x54b   : > { %v3947_v46 = vmax.f32 %v3915_v20, 0.0  ;;  %v3812_v6 = vadd.f32 %v3756_v60, %v3618_v47  ;;  %v3622_v20 = vadd.f32 %v3574_v39, %v3428_v52  ;;  %v3386_v47 = vpop.f32.mrf.mxu3  ;;  %v3429_v45 = vadd.f32 %v3383_v9, %v3234_v19 }
 0x54c   : > { %v3430_v37 = vadd.f32 %v3386_v47, %v3235_v21 }
 0x54d   : > { %3979 = vst [vmem:[%s6897_s15 + $0x98] sm:$0xff] %v3947_v46  ;;  %v3848_v3 = vmul.f32 %v6875_v29, %v3812_v6  ;;  %v3577_v12 = vpop.f32.mrf.mxu0  ;;  %v3194_v1 = vpop.f32.mrf.mxu2 }
 0x54e   : > { %v3236_v39 = vadd.f32 %v3194_v1, %v3042_v15  ;;  %v7296_v1 = vld [vmem:[#allocation27_spill] sm:$0xff] }
 0x54f   : > { %v3884_v57 = vadd.f32 %v6880_v23, %v3848_v3  ;;  %v3045_v26 = vadd.f32 %v7297_v8, %v7296_v1  ;;  %v7299_v15 = vld [vmem:[#allocation47_spill] sm:$0xff] }
 0x551   : > { %v3916_v36 = vadd.f32 %v4578_v32, %v3884_v57 }
 0x552   : > { %v3759_v43 = vpop.f32.mrf.mxu1 }
 0x553   : > { %v3948_v5 = vmax.f32 %v3916_v36, 0.0  ;;  %v3813_v22 = vadd.f32 %v3759_v43, %v3619_v2  ;;  %v3623_v36 = vadd.f32 %v3577_v12, %v3429_v45 }
 0x555   : > { %3980 = vst [vmem:[%s6897_s15 + $0xa0] sm:$0xff] %v3948_v5  ;;  %v3849_v4 = vmul.f32 %v6875_v29, %v3813_v22  ;;  %v3580_v38 = vpop.f32.mrf.mxu0  ;;  %v3389_v22 = vpop.f32.mrf.mxu3 }
 0x556   : > { %v3197_v30 = vpop.f32.mrf.mxu2 }
 0x557   : > { %v3885_v59 = vadd.f32 %v6880_v23, %v3849_v4  ;;  %v3237_v55 = vadd.f32 %v3197_v30, %v3043_v17  ;;  %v4588_v17 = vld [vmem:[%s4744_s22 + $0x181] sm:$0xff] }
 0x559   : > { %v3917_v0 = vadd.f32 %v4579_v7, %v3885_v59  ;;  %v4583_v7 = vld [vmem:[%s4744_s22 + $0x141] sm:$0xff] }
 0x55a   : > { %v3762_v50 = vpop.f32.mrf.mxu1 }
 0x55b   : > { %v3949_v28 = vmax.f32 %v3917_v0, 0.0  ;;  %v3814_v62 = vadd.f32 %v3762_v50, %v3620_v18  ;;  %v3624_v18 = vadd.f32 %v3580_v38, %v3430_v37 }
 0x55d   : > { %3981 = vst [vmem:[%s6897_s15 + $0xa8] sm:$0xff] %v3949_v28  ;;  %v3850_v53 = vmul.f32 %v6875_v29, %v3814_v62  ;;  %v3583_v54 = vpop.f32.mrf.mxu0  ;;  %v3431_v62 = vadd.f32 %v3389_v22, %v3236_v39 }
 0x55f   : > { %v3886_v42 = vadd.f32 %v6880_v23, %v3850_v53  ;;  %v3392_v53 = vpop.f32.mrf.mxu3 }
 0x560   : > { %v3432_v44 = vadd.f32 %v3392_v53, %v3237_v55 }
 0x561   : > { %v3918_v41 = vadd.f32 %v4580_v16, %v3886_v42  ;;  %v4584_v16 = vld [vmem:[%s4744_s22 + $0x151] sm:$0xff] }
 0x562   : > { %v3765_v34 = vpop.f32.mrf.mxu1 }
 0x563   : > { %v3950_v10 = vmax.f32 %v3918_v41, 0.0  ;;  %v3815_v13 = vadd.f32 %v3765_v34, %v3621_v56  ;;  %v3625_v56 = vadd.f32 %v3583_v54, %v3431_v62  ;;  %v3200_v34 = vpop.f32.mrf.mxu2  ;;  %v3046_v54 = vadd.f32 %v7299_v15, %v7298_v40 }
 0x565   : > { %3982 = vst [vmem:[%s6897_s15 + $0xb0] sm:$0xff] %v3950_v10  ;;  %v3851_v63 = vmul.f32 %v6875_v29, %v3815_v13  ;;  %v3586_v9 = vpop.f32.mrf.mxu0 }
 0x567   : > { %v3887_v14 = vadd.f32 %v6880_v23, %v3851_v63  ;;  %v7294_v63 = vld [vmem:[#allocation25_spill] sm:$0xff] }
 0x568   : > { %v3044_v58 = vadd.f32 %v7295_v24, %v7294_v63 }
 0x569   : > { %v3919_v33 = vadd.f32 %v4581_v48, %v3887_v14  ;;  %v3395_v14 = vpop.f32.mrf.mxu3  ;;  %v4585_v48 = vld [vmem:[%s4744_s22 + $0x159] sm:$0xff] }
 0x56a   : > { %v3768_v60 = vpop.f32.mrf.mxu1  ;;  %v3238_v19 = vadd.f32 %v3200_v34, %v3044_v58  ;;  %v4589_v34 = vld [vmem:[%s4744_s22 + $0x189] sm:$0xff] }
 0x56b   : > { %v3951_v46 = vmax.f32 %v3919_v33, 0.0  ;;  %v3816_v6 = vadd.f32 %v3768_v60, %v3622_v20  ;;  %v3626_v20 = vadd.f32 %v3586_v9, %v3432_v44  ;;  %v3203_v45 = vpop.f32.mrf.mxu2 }
 0x56c   : > { %v3433_v38 = vadd.f32 %v3395_v14, %v3238_v19  ;;  %v3239_v21 = vadd.f32 %v3203_v45, %v3045_v26 }
 0x56d   : > { %3983 = vst [vmem:[%s6897_s15 + $0xb8] sm:$0xff] %v3951_v46  ;;  %v3852_v3 = vmul.f32 %v6875_v29, %v3816_v6  ;;  %v3589_v6 = vpop.f32.mrf.mxu0 }
 0x56f   : > { %v3888_v57 = vadd.f32 %v6880_v23, %v3852_v3 }
 0x571   : > { %v3920_v32 = vadd.f32 %v4582_v27, %v3888_v57  ;;  %v3398_v57 = vpop.f32.mrf.mxu3  ;;  %v4586_v27 = vld [vmem:[%s4744_s22 + $0x169] sm:$0xff] }
 0x572   : > { %v3771_v2 = vpop.f32.mrf.mxu1  ;;  %v3434_v37 = vadd.f32 %v3398_v57, %v3239_v21 }
 0x573   : > { %v3952_v43 = vmax.f32 %v3920_v32, 0.0  ;;  %v3817_v5 = vadd.f32 %v3771_v2, %v3623_v36  ;;  %v3627_v36 = vadd.f32 %v3589_v6, %v3433_v38  ;;  %v3206_v51 = vpop.f32.mrf.mxu2 }
 0x574   : > { %v3240_v39 = vadd.f32 %v3206_v51, %v3046_v54 }
 0x575   : > { %3984 = vst [vmem:[%s6897_s15 + $0xc0] sm:$0xff] %v3952_v43  ;;  %v3853_v4 = vmul.f32 %v6875_v29, %v3817_v5  ;;  %v3592_v22 = vpop.f32.mrf.mxu0 }
 0x576   : > { %v3628_v30 = vadd.f32 %v3592_v22, %v3434_v37 }
 0x577   : > { %v3889_v59 = vadd.f32 %v6880_v23, %v3853_v4 }
 0x579   : > { %v3921_v0 = vadd.f32 %v4583_v7, %v3889_v59  ;;  %v4587_v7 = vld [vmem:[%s4744_s22 + $0x171] sm:$0xff] }
 0x57a   : > { %v3774_v11 = vpop.f32.mrf.mxu1 }
 0x57b   : > { %v3953_v50 = vmax.f32 %v3921_v0, 0.0  ;;  %v3818_v28 = vadd.f32 %v3774_v11, %v3624_v18  ;;  %v3401_v18 = vpop.f32.mrf.mxu3 }
 0x57c   : > { %v3435_v62 = vadd.f32 %v3401_v18, %v3240_v39 }
 0x57d   : > { %3985 = vst [vmem:[%s6897_s15 + $0xc8] sm:$0xff] %v3953_v50  ;;  %v3854_v61 = vmul.f32 %v6875_v29, %v3818_v28  ;;  %v3595_v53 = vpop.f32.mrf.mxu0 }
 0x57e   : > { %v3629_v35 = vadd.f32 %v3595_v53, %v3435_v62 }
 0x57f   : > { %v3890_v42 = vadd.f32 %v6880_v23, %v3854_v61 }
 0x581   : > { %v3922_v41 = vadd.f32 %v4584_v16, %v3890_v42 }
 0x582   : > { %v3777_v12 = vpop.f32.mrf.mxu1 }
 0x583   : > { %v3954_v10 = vmax.f32 %v3922_v41, 0.0  ;;  %v3819_v13 = vadd.f32 %v3777_v12, %v3625_v56 }
 0x585   : > { %3986 = vst [vmem:[%s6897_s15 + $0xd0] sm:$0xff] %v3954_v10  ;;  %v3855_v52 = vmul.f32 %v6875_v29, %v3819_v13 }
 0x587   : > { %v3891_v49 = vadd.f32 %v6880_v23, %v3855_v52 }
 0x589   : > { %v3923_v33 = vadd.f32 %v4585_v48, %v3891_v49 }
 0x58a   : > { %v3780_v47 = vpop.f32.mrf.mxu1 }
 0x58b   : > { %v3955_v60 = vmax.f32 %v3923_v33, 0.0  ;;  %v3820_v46 = vadd.f32 %v3780_v47, %v3626_v20 }
 0x58d   : > { %3987 = vst [vmem:[%s6897_s15 + $0xd8] sm:$0xff] %v3955_v60  ;;  %v3856_v3 = vmul.f32 %v6875_v29, %v3820_v46 }
 0x58f   : > { %v3892_v25 = vadd.f32 %v6880_v23, %v3856_v3 }
 0x591   : > { %v3924_v32 = vadd.f32 %v4586_v27, %v3892_v25 }
 0x592   : > { %v3783_v2 = vpop.f32.mrf.mxu1 }
 0x593   : > { %v3956_v43 = vmax.f32 %v3924_v32, 0.0  ;;  %v3821_v5 = vadd.f32 %v3783_v2, %v3627_v36 }
 0x595   : > { %3988 = vst [vmem:[%s6897_s15 + $0xe0] sm:$0xff] %v3956_v43  ;;  %v3857_v4 = vmul.f32 %v6875_v29, %v3821_v5 }
 0x597   : > { %v3893_v59 = vadd.f32 %v6880_v23, %v3857_v4 }
 0x599   : > { %v3925_v0 = vadd.f32 %v4587_v7, %v3893_v59 }
 0x59a   : > { %v3786_v11 = vpop.f32.mrf.mxu1 }
 0x59b   : > { %v3957_v50 = vmax.f32 %v3925_v0, 0.0  ;;  %v3822_v28 = vadd.f32 %v3786_v11, %v3628_v30 }
 0x59d   : > { %3989 = vst [vmem:[%s6897_s15 + $0xe8] sm:$0xff] %v3957_v50  ;;  %v3858_v61 = vmul.f32 %v6875_v29, %v3822_v28 }
 0x59f   : > { %v3894_v31 = vadd.f32 %v6880_v23, %v3858_v61 }
 0x5a1   : > { %v3926_v42 = vadd.f32 %v4588_v17, %v3894_v31 }
 0x5a2   : > { %v3789_v9 = vpop.f32.mrf.mxu1 }
 0x5a3   : > { %v3958_v55 = vmax.f32 %v3926_v42, 0.0  ;;  %v3823_v16 = vadd.f32 %v3789_v9, %v3629_v35 }
 0x5a5   : > { %3990 = vst [vmem:[%s6897_s15 + $0xf0] sm:$0xff] %v3958_v55  ;;  %v3859_v41 = vmul.f32 %v6875_v29, %v3823_v16 }
 0x5a7   : > { %v3895_v56 = vadd.f32 %v6880_v23, %v3859_v41 }
 0x5a9   : > { %v3927_v12 = vadd.f32 %v4589_v34, %v3895_v56 }
 0x5ab   : > { %v3959_v10 = vmax.f32 %v3927_v12, 0.0 }
 0x5ad   : > { %3991 = vst [vmem:[%s6897_s15 + $0xf8] sm:$0xff] %v3959_v10 }
 0x5ae PF: > { %s17_s24 = sadd.s32 1, %s4596_s24  }
 0x5af   : > { %p14_p4 = scmp.ge.s32.totalorder %s17_s24, 4  }
 0x5b1   :  { %16 = sbr.rel (!%p14_p4) target bundleno = 1 (0x1), region = 99 }

</bundles_post_ra>
